<compile_context>
chip_gen: v6e
topology: v6e:2x2x1
jax: 0.10.0
libtpu: 0.0.40
codegen_flags: <defaults>
</compile_context>

<pallas_src>
import functools

import jax
import jax.numpy as jnp
from jax.experimental import pallas as pl
from jax.experimental.pallas import tpu as pltpu

HIDDIM = 64            # LSTM hidden / per-modality embedding
HP = 128               # padded per-gate lane width (64 -> 128)
FEAT = 1000            # backbone feature dim (folded away in the Pallas path)
MLP_HID = 200          # MLP hidden width
MLP_HID_PAD = 256      # padded to a lane multiple
NUM_CLASSES = 5
OUT_PAD = 128          # lane-dense head output (sliced back to 5)
P_HI = jax.lax.Precision.HIGHEST


# ---------------- per-generation VMEM budgets ----------------


def _tpu_budgets():
    """Return (block_budget_bytes, vmem_limit_bytes) sized per TPU generation.

    v5e / v6e have 128 MiB VMEM per core -> 20 MiB blocks, 64 MiB scoped limit.
    v7x has 64 MiB VMEM per core       -> 10 MiB blocks, 48 MiB scoped limit
    (double-buffered input blocks + output buffers + weights stay well inside
    the limit, with headroom for Mosaic internal scratch).
    """
    try:
        phys = int(pltpu.get_tpu_info().vmem_capacity_bytes)
    except Exception:  # pragma: no cover - conservative fallback
        phys = 64 << 20
    if phys <= (64 << 20):
        return 10 << 20, 48 << 20
    return 20 << 20, 64 << 20


# ---------------- Pallas kernels ----------------


def video_gap_kernel(x_ref, w_ref, b_ref, o_ref):
    """Global-average-pool over H*W + tiny 3-channel mix (VPU broadcast FMAs).

    x: (C, TILE_T, HW)   w: (C, D)   b: (1, D)   o: (TILE_T, D)
    Equivalent to mean(x, -1).T @ w + b, but the K=C (=3) contraction is done
    as C broadcast FMAs instead of a nearly-empty MXU pass (hidden under the
    memory-bound GAP read).  The channel axis is the leading block dim, so the
    sublane dimension is TILE_T (no 3->8 sublane padding).
    """
    acc = jnp.zeros(o_ref.shape, jnp.float32)
    for c in range(x_ref.shape[0]):                                   # C == 3 (static)
        pooled_c = jnp.mean(x_ref[c], axis=-1, keepdims=True)         # (TILE_T, 1)
        acc = acc + pooled_c * w_ref[c:c + 1, :]                      # (TILE_T, D)
    o_ref[...] = acc + b_ref[...]


def tail_kernel(pre_ref, aud_ref, aud_w_ref, aud_b_ref, whh_ref, aw2_ref,
                ab2_ref, hw1_ref, hb1_ref, hw2_ref, hb2_ref, o_ref,
                *, hid, hid_pad):
    """LSTM recurrence + audio GAP/MLP + Concat fusion + head MLP in one call.

    pre_ref : (B, T, 4*hid_pad) precomputed x_t @ W_ih + b (padded gate layout)
    aud_ref : (B, Ha*Wa)        raw audio (GAP + folded fc1 done here)
    whh_ref : (hid_pad, 4*hid_pad) recurrent weights (zero-padded)
    """
    B, T = pre_ref.shape[0], pre_ref.shape[1]
    whh = whh_ref[...]

    # T is small and static: fully-unrolled recurrence; each step is only a
    # (B,128)x(128,512) matmul plus VPU/EUP nonlinearities.  Gate slices sit
    # at 128-lane boundaries (padded layout) so there is no mid-vreg slicing.
    # TODO(synk): for long clips (T>=16) switch to lax.fori_loop with (h,c)
    # carry and unroll=2-4; padding batch to 8 sublanes would also recover
    # VPU/MXU utilization when deployment batch allows.
    h = None
    c = None
    for t in range(T):
        if t == 0:
            gates = pre_ref[:, 0, :]                 # h == 0: skip dead matmul
        else:
            gates = pre_ref[:, t, :] + jnp.dot(h, whh,
                                               preferred_element_type=jnp.float32)
        i = jax.nn.sigmoid(gates[:, 0 * hid_pad:1 * hid_pad])
        f = jax.nn.sigmoid(gates[:, 1 * hid_pad:2 * hid_pad])
        g = jnp.tanh(gates[:, 2 * hid_pad:3 * hid_pad])
        o = jax.nn.sigmoid(gates[:, 3 * hid_pad:4 * hid_pad])
        c = i * g if t == 0 else f * c + i * g       # t == 0: c_prev == 0
        h = o * jnp.tanh(c)

    vid_h = h[:, :hid]                                                # (B, 64) == h_n

    # audio: GAP over Ha*Wa, folded (backbone Linear -> fc1) broadcast FMA,
    # ReLU, fc2.  Trivial VPU work kept inside this call to avoid a separate
    # pallas_call launch + HBM round trip for a few-KB workload.
    a_mean = jnp.mean(aud_ref[...], axis=-1, keepdims=True)           # (B, 1)
    pre_a = a_mean * aud_w_ref[...] + aud_b_ref[...]                  # (B, 256)
    aud_h = (jnp.dot(jnp.maximum(pre_a, 0.0), aw2_ref[...],
                     preferred_element_type=jnp.float32) + ab2_ref[...])  # (B, 64)

    # Concat fusion + head fc1, expressed as a split matmul (avoids lane concat)
    hh = (jnp.dot(vid_h, hw1_ref[:hid, :], preferred_element_type=jnp.float32)
          + jnp.dot(aud_h, hw1_ref[hid:2 * hid, :], preferred_element_type=jnp.float32)
          + hb1_ref[...])
    hh = jnp.maximum(hh, 0.0)
    o_ref[...] = (jnp.dot(hh, hw2_ref[...], preferred_element_type=jnp.float32)
                  + hb2_ref[...])                                     # (B, 128) lane-dense


# ---------------- wrappers ----------------


def video_pregates(video, w, b):
    """video (B, C, T, H, W) -> per-frame LSTM pre-gates, shape (B, T, 4*HP).

    Reads the video in its native layout (no transpose copy): grid=(B, T_tiles)
    with block (None, C, TILE_T, H*W); the channel mix happens in-kernel.
    """
    B, C, T, H, W = video.shape
    HW = H * W
    D = w.shape[1]
    block_budget_bytes, vmem_limit_bytes = _tpu_budgets()

    x = video.reshape(B, C, T, HW)           # contiguous merge of (H, W): no data movement
    frame_bytes = C * HW * x.dtype.itemsize
    tile_t = int(max(1, min(T, block_budget_bytes // max(frame_bytes, 1))))
    if tile_t < T:
        tile_t = max(8, (tile_t // 8) * 8)   # sublane-aligned tiles (8,128 rule)
    grid_t = pl.cdiv(T, tile_t)              # ragged last tile is fine: rows independent,
                                             # OOB output rows are masked on store.
    out = pl.pallas_call(
        video_gap_kernel,
        out_shape=jax.ShapeDtypeStruct((B, T, D), jnp.float32),
        grid=(B, grid_t),
        in_specs=[
            pl.BlockSpec((None, C, tile_t, HW), lambda bi, ti: (bi, 0, ti, 0)),
            pl.BlockSpec((C, D), lambda bi, ti: (0, 0)),
            pl.BlockSpec((1, D), lambda bi, ti: (0, 0)),
        ],
        out_specs=pl.BlockSpec((None, tile_t, D), lambda bi, ti: (bi, ti, 0)),
        compiler_params=pltpu.CompilerParams(
            dimension_semantics=("parallel", "parallel"),   # shards across 2 TCs on v7x
            vmem_limit_bytes=vmem_limit_bytes,
        ),
    )(x, w, b)
    return out                                              # (B, T, 4*HP)


def fused_tail(pre_g, audio2d, d):
    B = audio2d.shape[0]
    out = pl.pallas_call(
        functools.partial(tail_kernel, hid=HIDDIM, hid_pad=HP),
        out_shape=jax.ShapeDtypeStruct((B, OUT_PAD), jnp.float32),
    )(pre_g, audio2d, d["aud_w"], d["aud_b"], d["whh"], d["aw2"], d["ab2"],
      d["hw1"], d["hb1"], d["hw2"], d["hb2"])
    return out[:, :NUM_CLASSES]


# ---------------- parameters (deterministic) ----------------


def init_params(key):
    ks = jax.random.split(key, 9)

    def lin(k, fan_in, fan_out):
        s = fan_in ** -0.5
        kw, kb = jax.random.split(k)
        w = jax.random.uniform(kw, (fan_in, fan_out), jnp.float32, -s, s)
        b = jax.random.uniform(kb, (1, fan_out), jnp.float32, -s, s)
        return w, b

    p = {}
    p["r18_w"], p["r18_b"] = lin(ks[0], 3, FEAT)      # video backbone stand-in
    p["r50_w"], p["r50_b"] = lin(ks[1], 1, FEAT)      # audio backbone stand-in
    s = HIDDIM ** -0.5                                 # nn.LSTM(1000, 64)
    p["lstm_wih"] = jax.random.uniform(ks[2], (FEAT, 4 * HIDDIM), jnp.float32, -s, s)
    p["lstm_whh"] = jax.random.uniform(ks[3], (HIDDIM, 4 * HIDDIM), jnp.float32, -s, s)
    p["lstm_b"] = jax.random.uniform(ks[4], (1, 4 * HIDDIM), jnp.float32, -s, s)
    p["amlp_w1"], p["amlp_b1"] = lin(ks[5], FEAT, MLP_HID)        # MLP(1000, 200, 64)
    p["amlp_w2"], p["amlp_b2"] = lin(ks[6], MLP_HID, HIDDIM)
    p["head_w1"], p["head_b1"] = lin(ks[7], 2 * HIDDIM, MLP_HID)  # MLP(128, 200, 5)
    p["head_w2"], p["head_b2"] = lin(ks[8], MLP_HID, NUM_CLASSES)
    return p


def fold_and_pad_params(p):
    """Fold the purely-linear backbone stand-ins into downstream layers and
    re-lay-out weights lane-dense / gate-padded for the Pallas kernels."""
    H = HIDDIM

    def pad_gate_cols(m):   # (..., 4H) -> (..., 4*HP): each gate gets its own 128-lane group
        parts = []
        for k in range(4):
            g = m[..., k * H:(k + 1) * H]
            parts.append(jnp.pad(g, [(0, 0)] * (m.ndim - 1) + [(0, HP - H)]))
        return jnp.concatenate(parts, axis=-1)

    # video: GAP -> Linear(3,1000) -> LSTM W_ih collapses to a (3, 4H) projection
    w_eff = jnp.dot(p["r18_w"], p["lstm_wih"], precision=P_HI)
    b_eff = jnp.dot(p["r18_b"], p["lstm_wih"], precision=P_HI) + p["lstm_b"]
    whh_p = jnp.pad(pad_gate_cols(p["lstm_whh"]), ((0, HP - H), (0, 0)))

    # audio: GAP -> Linear(1,1000) -> MLP fc1 collapses to a (1, 200) projection
    wa = jnp.dot(p["r50_w"], p["amlp_w1"], precision=P_HI)
    ba = jnp.dot(p["r50_b"], p["amlp_w1"], precision=P_HI) + p["amlp_b1"]

    ph = MLP_HID_PAD - MLP_HID
    po = OUT_PAD - NUM_CLASSES
    return {
        "vid_w": pad_gate_cols(w_eff),                       # (3, 512)
        "vid_b": pad_gate_cols(b_eff),                       # (1, 512)
        "whh":   whh_p,                                      # (128, 512)
        "aud_w": jnp.pad(wa, ((0, 0), (0, ph))),             # (1, 256)
        "aud_b": jnp.pad(ba, ((0, 0), (0, ph))),             # (1, 256)
        "aw2":   jnp.pad(p["amlp_w2"], ((0, ph), (0, 0))),   # (256, 64)
        "ab2":   p["amlp_b2"],                               # (1, 64)
        "hw1":   jnp.pad(p["head_w1"], ((0, 0), (0, ph))),   # (128, 256)
        "hb1":   jnp.pad(p["head_b1"], ((0, 0), (0, ph))),   # (1, 256)
        "hw2":   jnp.pad(p["head_w2"], ((0, ph), (0, po))),  # (256, 128)
        "hb2":   jnp.pad(p["head_b2"], ((0, 0), (0, po))),   # (1, 128)
    }


# ---------------- MMDL forward ----------------


def mmdl_forward(derived, video, audio):
    # video: (B, 3, T, H, W)   audio: (B, Ha, Wa)
    B = video.shape[0]

    # encoder[0]: frames -> LSTM pre-gates (input projection hoisted out of the
    # recurrence), read directly in the native video layout (no transpose copy).
    pre_g = video_pregates(video, derived["vid_w"], derived["vid_b"])   # (B, T, 512)

    # encoder[1] (audio), fusion and head all run inside ONE tail kernel
    # together with the LSTM recurrence.
    audio2d = audio.reshape(B, audio.shape[1] * audio.shape[2])         # (B, Ha*Wa)
    return fused_tail(pre_g, audio2d, derived)                          # (B, 5)


# ---------------- plain-JAX reference (for verification) ----------------


def mmdl_reference(params, video, audio):
    def gap_lin(x, w, b):
        pooled = x.reshape(x.shape[0], x.shape[1], -1).mean(-1)
        return jnp.dot(pooled, w, precision=P_HI) + b

    def mlp_ref(x, w1, b1, w2, b2):
        h = jnp.maximum(jnp.dot(x, w1, precision=P_HI) + b1, 0.0)
        return jnp.dot(h, w2, precision=P_HI) + b2

    B = video.shape[0]
    x = jnp.transpose(video, (0, 2, 1, 3, 4)).reshape(-1, 3, video.shape[3], video.shape[4])
    feats = gap_lin(x, params["r18_w"], params["r18_b"]).reshape(B, -1, FEAT)
    H = HIDDIM
    h = jnp.zeros((B, H), jnp.float32)
    c = jnp.zeros((B, H), jnp.float32)
    for t in range(feats.shape[1]):
        gates = (jnp.dot(feats[:, t], params["lstm_wih"], precision=P_HI)
                 + jnp.dot(h, params["lstm_whh"], precision=P_HI) + params["lstm_b"])
        i = jax.nn.sigmoid(gates[:, :H]); f = jax.nn.sigmoid(gates[:, H:2 * H])
        g = jnp.tanh(gates[:, 2 * H:3 * H]); o = jax.nn.sigmoid(gates[:, 3 * H:])
        c = f * c + i * g
        h = o * jnp.tanh(c)
    afeat = gap_lin(audio[:, None], params["r50_w"], params["r50_b"])
    aud = mlp_ref(afeat, params["amlp_w1"], params["amlp_b1"],
                  params["amlp_w2"], params["amlp_b2"])
    fused = jnp.concatenate([h, aud], axis=1)
    return mlp_ref(fused, params["head_w1"], params["head_b1"],
                   params["head_w2"], params["head_b2"])


if __name__ == "__main__":
    key = jax.random.PRNGKey(0)
    kp, kv, ka = jax.random.split(key, 3)
    params = init_params(kp)
    derived = fold_and_pad_params(params)

    B, T, Hs, Ws = 2, 8, 16, 16
    video = jax.random.normal(kv, (B, 3, T, Hs, Ws), jnp.float32)   # like (B,3,T,112,112)
    audio = jax.random.normal(ka, (B, Hs, Ws), jnp.float32)         # unsqueezed to (B,1,H,W)

    fwd = jax.jit(mmdl_forward)
    out = jax.block_until_ready(fwd(derived, video, audio))
    ref = mmdl_reference(params, video, audio)

    assert out.shape == (B, NUM_CLASSES), out.shape
    assert jnp.allclose(out, ref, rtol=2e-4, atol=2e-4), (out, ref)
    print("KERNEL_OK")
</pallas_src>

<mosaic_0001>
module attributes {stable_mosaic.version = 11 : i64} {
  func.func @video_gap_kernel(%arg0: i32, %arg1: i32, %arg2: memref<1x3x8x256xf32, #tpu.memory_space<vmem>>, %arg3: memref<3x512xf32, #tpu.memory_space<vmem>>, %arg4: memref<1x512xf32, #tpu.memory_space<vmem>>, %arg5: memref<1x8x512xf32, #tpu.memory_space<vmem>>) attributes {dimension_semantics = [#tpu.dimension_semantics<parallel>, #tpu.dimension_semantics<parallel>], iteration_bounds = array<i64: 2, 1>, scalar_prefetch = 0 : i64, scratch_operands = 0 : i64, tpu.core_type = #tpu.core_type<tc>, window_params = [{transform_indices = @transform_0, window_bounds = array<i64: 1, 3, 8, 256>}, {pipeline_mode = #tpu.pipeline_mode<synchronous>, transform_indices = @transform_1, window_bounds = array<i64: 3, 512>}, {pipeline_mode = #tpu.pipeline_mode<synchronous>, transform_indices = @transform_2, window_bounds = array<i64: 1, 512>}, {transform_indices = @transform_3, window_bounds = array<i64: 1, 8, 512>}]} {
    %cst = arith.constant 0.000000e+00 : f32
    %0 = vector.broadcast %cst : f32 to vector<8x512xf32>
    %c0 = arith.constant 0 : index
    %c0_0 = arith.constant 0 : index
    %c0_1 = arith.constant 0 : index
    %c0_2 = arith.constant 0 : index
    %1 = vector.load %arg2[%c0, %c0_0, %c0_1, %c0_2] : memref<1x3x8x256xf32, #tpu.memory_space<vmem>>, vector<1x1x8x256xf32>
    %2 = vector.shape_cast %1 : vector<1x1x8x256xf32> to vector<8x256xf32>
    %cst_3 = arith.constant dense<0.000000e+00> : vector<8xf32>
    %3 = vector.multi_reduction <add>, %2, %cst_3 [1] : vector<8x256xf32> to vector<8xf32>
    %4 = vector.shape_cast %3 : vector<8xf32> to vector<8x1xf32>
    %cst_4 = arith.constant 2.560000e+02 : f32
    %5 = vector.broadcast %cst_4 : f32 to vector<8x1xf32>
    %6 = arith.divf %4, %5 : vector<8x1xf32>
    %c0_5 = arith.constant 0 : index
    %c0_6 = arith.constant 0 : index
    %7 = vector.load %arg3[%c0_5, %c0_6] : memref<3x512xf32, #tpu.memory_space<vmem>>, vector<1x512xf32>
    %8 = vector.broadcast %6 : vector<8x1xf32> to vector<8x512xf32>
    %9 = vector.broadcast %7 : vector<1x512xf32> to vector<8x512xf32>
    %10 = arith.mulf %8, %9 : vector<8x512xf32>
    %11 = arith.addf %0, %10 : vector<8x512xf32>
    %c0_7 = arith.constant 0 : index
    %c1 = arith.constant 1 : index
    %c0_8 = arith.constant 0 : index
    %c0_9 = arith.constant 0 : index
    %12 = vector.load %arg2[%c0_7, %c1, %c0_8, %c0_9] : memref<1x3x8x256xf32, #tpu.memory_space<vmem>>, vector<1x1x8x256xf32>
    %13 = vector.shape_cast %12 : vector<1x1x8x256xf32> to vector<8x256xf32>
    %cst_10 = arith.constant dense<0.000000e+00> : vector<8xf32>
    %14 = vector.multi_reduction <add>, %13, %cst_10 [1] : vector<8x256xf32> to vector<8xf32>
    %15 = vector.shape_cast %14 : vector<8xf32> to vector<8x1xf32>
    %cst_11 = arith.constant 2.560000e+02 : f32
    %16 = vector.broadcast %cst_11 : f32 to vector<8x1xf32>
    %17 = arith.divf %15, %16 : vector<8x1xf32>
    %c1_12 = arith.constant 1 : index
    %c0_13 = arith.constant 0 : index
    %18 = vector.load %arg3[%c1_12, %c0_13] : memref<3x512xf32, #tpu.memory_space<vmem>>, vector<1x512xf32>
    %19 = vector.broadcast %17 : vector<8x1xf32> to vector<8x512xf32>
    %20 = vector.broadcast %18 : vector<1x512xf32> to vector<8x512xf32>
    %21 = arith.mulf %19, %20 : vector<8x512xf32>
    %22 = arith.addf %11, %21 : vector<8x512xf32>
    %c0_14 = arith.constant 0 : index
    %c2 = arith.constant 2 : index
    %c0_15 = arith.constant 0 : index
    %c0_16 = arith.constant 0 : index
    %23 = vector.load %arg2[%c0_14, %c2, %c0_15, %c0_16] : memref<1x3x8x256xf32, #tpu.memory_space<vmem>>, vector<1x1x8x256xf32>
    %24 = vector.shape_cast %23 : vector<1x1x8x256xf32> to vector<8x256xf32>
    %cst_17 = arith.constant dense<0.000000e+00> : vector<8xf32>
    %25 = vector.multi_reduction <add>, %24, %cst_17 [1] : vector<8x256xf32> to vector<8xf32>
    %26 = vector.shape_cast %25 : vector<8xf32> to vector<8x1xf32>
    %cst_18 = arith.constant 2.560000e+02 : f32
    %27 = vector.broadcast %cst_18 : f32 to vector<8x1xf32>
    %28 = arith.divf %26, %27 : vector<8x1xf32>
    %c2_19 = arith.constant 2 : index
    %c0_20 = arith.constant 0 : index
    %29 = vector.load %arg3[%c2_19, %c0_20] : memref<3x512xf32, #tpu.memory_space<vmem>>, vector<1x512xf32>
    %30 = vector.broadcast %28 : vector<8x1xf32> to vector<8x512xf32>
    %31 = vector.broadcast %29 : vector<1x512xf32> to vector<8x512xf32>
    %32 = arith.mulf %30, %31 : vector<8x512xf32>
    %33 = arith.addf %22, %32 : vector<8x512xf32>
    %c0_21 = arith.constant 0 : index
    %c0_22 = arith.constant 0 : index
    %34 = vector.load %arg4[%c0_21, %c0_22] : memref<1x512xf32, #tpu.memory_space<vmem>>, vector<1x512xf32>
    %35 = vector.broadcast %34 : vector<1x512xf32> to vector<8x512xf32>
    %36 = arith.addf %33, %35 : vector<8x512xf32>
    %c0_23 = arith.constant 0 : index
    %c0_24 = arith.constant 0 : index
    %c0_25 = arith.constant 0 : index
    %37 = vector.load %arg5[%c0_23, %c0_24, %c0_25] : memref<1x8x512xf32, #tpu.memory_space<vmem>>, vector<1x8x512xf32>
    %38 = vector.shape_cast %37 : vector<1x8x512xf32> to vector<8x512xf32>
    %39 = vector.shape_cast %36 : vector<8x512xf32> to vector<1x8x512xf32>
    tpu.vector_store %arg5[%c0_23, %c0_24, %c0_25], %39 {strides = array<i32>} : memref<1x8x512xf32, #tpu.memory_space<vmem>>, vector<1x8x512xf32>,
    return
  }
  func.func @transform_0(%arg0: i32, %arg1: i32) -> (i32, i32, i32, i32) {
    %c0_i32 = arith.constant 0 : i32
    %c0_i32_0 = arith.constant 0 : i32
    %c0_i32_1 = arith.constant 0 : i32
    return %arg0, %c0_i32, %arg1, %c0_i32_0 : i32, i32, i32, i32
  }
  func.func @transform_1(%arg0: i32, %arg1: i32) -> (i32, i32) {
    %c0_i32 = arith.constant 0 : i32
    %c0_i32_0 = arith.constant 0 : i32
    %c0_i32_1 = arith.constant 0 : i32
    return %c0_i32, %c0_i32_0 : i32, i32
  }
  func.func @transform_2(%arg0: i32, %arg1: i32) -> (i32, i32) {
    %c0_i32 = arith.constant 0 : i32
    %c0_i32_0 = arith.constant 0 : i32
    %c0_i32_1 = arith.constant 0 : i32
    return %c0_i32, %c0_i32_0 : i32, i32
  }
  func.func @transform_3(%arg0: i32, %arg1: i32) -> (i32, i32, i32) {
    %c0_i32 = arith.constant 0 : i32
    %c0_i32_0 = arith.constant 0 : i32
    return %arg0, %arg1, %c0_i32 : i32, i32, i32
  }
}

module attributes {stable_mosaic.version = 11 : i64} {
  func.func @tail_kernel(%arg0: memref<2x8x512xf32, #tpu.memory_space<vmem>>, %arg1: memref<2x256xf32, #tpu.memory_space<vmem>>, %arg2: memref<1x256xf32, #tpu.memory_space<vmem>>, %arg3: memref<1x256xf32, #tpu.memory_space<vmem>>, %arg4: memref<128x512xf32, #tpu.memory_space<vmem>>, %arg5: memref<256x64xf32, #tpu.memory_space<vmem>>, %arg6: memref<1x64xf32, #tpu.memory_space<vmem>>, %arg7: memref<128x256xf32, #tpu.memory_space<vmem>>, %arg8: memref<1x256xf32, #tpu.memory_space<vmem>>, %arg9: memref<256x128xf32, #tpu.memory_space<vmem>>, %arg10: memref<1x128xf32, #tpu.memory_space<vmem>>, %arg11: memref<2x128xf32, #tpu.memory_space<vmem>>) attributes {dimension_semantics = [], scalar_prefetch = 0 : i64, scratch_operands = 0 : i64, tpu.core_type = #tpu.core_type<tc>} {
    %c0 = arith.constant 0 : index
    %c0_0 = arith.constant 0 : index
    %0 = vector.load %arg4[%c0, %c0_0] : memref<128x512xf32, #tpu.memory_space<vmem>>, vector<128x512xf32>
    %c0_1 = arith.constant 0 : index
    %c0_2 = arith.constant 0 : index
    %c0_3 = arith.constant 0 : index
    %1 = vector.load %arg0[%c0_1, %c0_2, %c0_3] : memref<2x8x512xf32, #tpu.memory_space<vmem>>, vector<2x1x512xf32>
    %2 = vector.shape_cast %1 : vector<2x1x512xf32> to vector<2x512xf32>
    %3 = vector.extract_strided_slice %2 {offsets = [0, 0], sizes = [2, 128], strides = [1, 1]} : vector<2x512xf32> to vector<2x128xf32>
    %4 = arith.negf %3 : vector<2x128xf32>
    %5 = math.exp %4 : vector<2x128xf32>
    %cst = arith.constant 1.000000e+00 : f32
    %6 = vector.broadcast %cst : f32 to vector<2x128xf32>
    %7 = arith.addf %6, %5 : vector<2x128xf32>
    %8 = arith.divf %6, %7 : vector<2x128xf32>
    %9 = vector.extract_strided_slice %2 {offsets = [0, 256], sizes = [2, 128], strides = [1, 1]} : vector<2x512xf32> to vector<2x128xf32>
    %10 = math.tanh %9 : vector<2x128xf32>
    %11 = vector.extract_strided_slice %2 {offsets = [0, 384], sizes = [2, 128], strides = [1, 1]} : vector<2x512xf32> to vector<2x128xf32>
    %12 = arith.negf %11 : vector<2x128xf32>
    %13 = math.exp %12 : vector<2x128xf32>
    %cst_4 = arith.constant 1.000000e+00 : f32
    %14 = vector.broadcast %cst_4 : f32 to vector<2x128xf32>
    %15 = arith.addf %14, %13 : vector<2x128xf32>
    %16 = arith.divf %14, %15 : vector<2x128xf32>
    %17 = arith.mulf %8, %10 : vector<2x128xf32>
    %18 = math.tanh %17 : vector<2x128xf32>
    %19 = arith.mulf %16, %18 : vector<2x128xf32>
    %c0_5 = arith.constant 0 : index
    %c1 = arith.constant 1 : index
    %c0_6 = arith.constant 0 : index
    %20 = vector.load %arg0[%c0_5, %c1, %c0_6] : memref<2x8x512xf32, #tpu.memory_space<vmem>>, vector<2x1x512xf32>
    %21 = vector.shape_cast %20 : vector<2x1x512xf32> to vector<2x512xf32>
    %cst_7 = arith.constant dense<0.000000e+00> : vector<2x512xf32>
    %22 = tpu.matmul %19, %0, %cst_7 {dimension_numbers = #tpu.dot_dimension_numbers<[1], [0], [0], [1], [0, 0, 1, 1], [], []>} : vector<2x128xf32>, vector<128x512xf32>, vector<2x512xf32> -> vector<2x512xf32>
    %23 = arith.addf %21, %22 : vector<2x512xf32>
    %24 = vector.extract_strided_slice %23 {offsets = [0, 0], sizes = [2, 128], strides = [1, 1]} : vector<2x512xf32> to vector<2x128xf32>
    %25 = arith.negf %24 : vector<2x128xf32>
    %26 = math.exp %25 : vector<2x128xf32>
    %cst_8 = arith.constant 1.000000e+00 : f32
    %27 = vector.broadcast %cst_8 : f32 to vector<2x128xf32>
    %28 = arith.addf %27, %26 : vector<2x128xf32>
    %29 = arith.divf %27, %28 : vector<2x128xf32>
    %30 = vector.extract_strided_slice %23 {offsets = [0, 128], sizes = [2, 128], strides = [1, 1]} : vector<2x512xf32> to vector<2x128xf32>
    %31 = arith.negf %30 : vector<2x128xf32>
    %32 = math.exp %31 : vector<2x128xf32>
    %cst_9 = arith.constant 1.000000e+00 : f32
    %33 = vector.broadcast %cst_9 : f32 to vector<2x128xf32>
    %34 = arith.addf %33, %32 : vector<2x128xf32>
    %35 = arith.divf %33, %34 : vector<2x128xf32>
    %36 = vector.extract_strided_slice %23 {offsets = [0, 256], sizes = [2, 128], strides = [1, 1]} : vector<2x512xf32> to vector<2x128xf32>
    %37 = math.tanh %36 : vector<2x128xf32>
    %38 = vector.extract_strided_slice %23 {offsets = [0, 384], sizes = [2, 128], strides = [1, 1]} : vector<2x512xf32> to vector<2x128xf32>
    %39 = arith.negf %38 : vector<2x128xf32>
    %40 = math.exp %39 : vector<2x128xf32>
    %cst_10 = arith.constant 1.000000e+00 : f32
    %41 = vector.broadcast %cst_10 : f32 to vector<2x128xf32>
    %42 = arith.addf %41, %40 : vector<2x128xf32>
    %43 = arith.divf %41, %42 : vector<2x128xf32>
    %44 = arith.mulf %35, %17 : vector<2x128xf32>
    %45 = arith.mulf %29, %37 : vector<2x128xf32>
    %46 = arith.addf %44, %45 : vector<2x128xf32>
    %47 = math.tanh %46 : vector<2x128xf32>
    %48 = arith.mulf %43, %47 : vector<2x128xf32>
    %c0_11 = arith.constant 0 : index
    %c2 = arith.constant 2 : index
    %c0_12 = arith.constant 0 : index
    %49 = vector.load %arg0[%c0_11, %c2, %c0_12] : memref<2x8x512xf32, #tpu.memory_space<vmem>>, vector<2x1x512xf32>
    %50 = vector.shape_cast %49 : vector<2x1x512xf32> to vector<2x512xf32>
    %cst_13 = arith.constant dense<0.000000e+00> : vector<2x512xf32>
    %51 = tpu.matmul %48, %0, %cst_13 {dimension_numbers = #tpu.dot_dimension_numbers<[1], [0], [0], [1], [0, 0, 1, 1], [], []>} : vector<2x128xf32>, vector<128x512xf32>, vector<2x512xf32> -> vector<2x512xf32>
    %52 = arith.addf %50, %51 : vector<2x512xf32>
    %53 = vector.extract_strided_slice %52 {offsets = [0, 0], sizes = [2, 128], strides = [1, 1]} : vector<2x512xf32> to vector<2x128xf32>
    %54 = arith.negf %53 : vector<2x128xf32>
    %55 = math.exp %54 : vector<2x128xf32>
    %cst_14 = arith.constant 1.000000e+00 : f32
    %56 = vector.broadcast %cst_14 : f32 to vector<2x128xf32>
    %57 = arith.addf %56, %55 : vector<2x128xf32>
    %58 = arith.divf %56, %57 : vector<2x128xf32>
    %59 = vector.extract_strided_slice %52 {offsets = [0, 128], sizes = [2, 128], strides = [1, 1]} : vector<2x512xf32> to vector<2x128xf32>
    %60 = arith.negf %59 : vector<2x128xf32>
    %61 = math.exp %60 : vector<2x128xf32>
    %cst_15 = arith.constant 1.000000e+00 : f32
    %62 = vector.broadcast %cst_15 : f32 to vector<2x128xf32>
    %63 = arith.addf %62, %61 : vector<2x128xf32>
    %64 = arith.divf %62, %63 : vector<2x128xf32>
    %65 = vector.extract_strided_slice %52 {offsets = [0, 256], sizes = [2, 128], strides = [1, 1]} : vector<2x512xf32> to vector<2x128xf32>
    %66 = math.tanh %65 : vector<2x128xf32>
    %67 = vector.extract_strided_slice %52 {offsets = [0, 384], sizes = [2, 128], strides = [1, 1]} : vector<2x512xf32> to vector<2x128xf32>
    %68 = arith.negf %67 : vector<2x128xf32>
    %69 = math.exp %68 : vector<2x128xf32>
    %cst_16 = arith.constant 1.000000e+00 : f32
    %70 = vector.broadcast %cst_16 : f32 to vector<2x128xf32>
    %71 = arith.addf %70, %69 : vector<2x128xf32>
    %72 = arith.divf %70, %71 : vector<2x128xf32>
    %73 = arith.mulf %64, %46 : vector<2x128xf32>
    %74 = arith.mulf %58, %66 : vector<2x128xf32>
    %75 = arith.addf %73, %74 : vector<2x128xf32>
    %76 = math.tanh %75 : vector<2x128xf32>
    %77 = arith.mulf %72, %76 : vector<2x128xf32>
    %c0_17 = arith.constant 0 : index
    %c3 = arith.constant 3 : index
    %c0_18 = arith.constant 0 : index
    %78 = vector.load %arg0[%c0_17, %c3, %c0_18] : memref<2x8x512xf32, #tpu.memory_space<vmem>>, vector<2x1x512xf32>
    %79 = vector.shape_cast %78 : vector<2x1x512xf32> to vector<2x512xf32>
    %cst_19 = arith.constant dense<0.000000e+00> : vector<2x512xf32>
    %80 = tpu.matmul %77, %0, %cst_19 {dimension_numbers = #tpu.dot_dimension_numbers<[1], [0], [0], [1], [0, 0, 1, 1], [], []>} : vector<2x128xf32>, vector<128x512xf32>, vector<2x512xf32> -> vector<2x512xf32>
    %81 = arith.addf %79, %80 : vector<2x512xf32>
    %82 = vector.extract_strided_slice %81 {offsets = [0, 0], sizes = [2, 128], strides = [1, 1]} : vector<2x512xf32> to vector<2x128xf32>
    %83 = arith.negf %82 : vector<2x128xf32>
    %84 = math.exp %83 : vector<2x128xf32>
    %cst_20 = arith.constant 1.000000e+00 : f32
    %85 = vector.broadcast %cst_20 : f32 to vector<2x128xf32>
    %86 = arith.addf %85, %84 : vector<2x128xf32>
    %87 = arith.divf %85, %86 : vector<2x128xf32>
    %88 = vector.extract_strided_slice %81 {offsets = [0, 128], sizes = [2, 128], strides = [1, 1]} : vector<2x512xf32> to vector<2x128xf32>
    %89 = arith.negf %88 : vector<2x128xf32>
    %90 = math.exp %89 : vector<2x128xf32>
    %cst_21 = arith.constant 1.000000e+00 : f32
    %91 = vector.broadcast %cst_21 : f32 to vector<2x128xf32>
    %92 = arith.addf %91, %90 : vector<2x128xf32>
    %93 = arith.divf %91, %92 : vector<2x128xf32>
    %94 = vector.extract_strided_slice %81 {offsets = [0, 256], sizes = [2, 128], strides = [1, 1]} : vector<2x512xf32> to vector<2x128xf32>
    %95 = math.tanh %94 : vector<2x128xf32>
    %96 = vector.extract_strided_slice %81 {offsets = [0, 384], sizes = [2, 128], strides = [1, 1]} : vector<2x512xf32> to vector<2x128xf32>
    %97 = arith.negf %96 : vector<2x128xf32>
    %98 = math.exp %97 : vector<2x128xf32>
    %cst_22 = arith.constant 1.000000e+00 : f32
    %99 = vector.broadcast %cst_22 : f32 to vector<2x128xf32>
    %100 = arith.addf %99, %98 : vector<2x128xf32>
    %101 = arith.divf %99, %100 : vector<2x128xf32>
    %102 = arith.mulf %93, %75 : vector<2x128xf32>
    %103 = arith.mulf %87, %95 : vector<2x128xf32>
    %104 = arith.addf %102, %103 : vector<2x128xf32>
    %105 = math.tanh %104 : vector<2x128xf32>
    %106 = arith.mulf %101, %105 : vector<2x128xf32>
    %c0_23 = arith.constant 0 : index
    %c4 = arith.constant 4 : index
    %c0_24 = arith.constant 0 : index
    %107 = vector.load %arg0[%c0_23, %c4, %c0_24] : memref<2x8x512xf32, #tpu.memory_space<vmem>>, vector<2x1x512xf32>
    %108 = vector.shape_cast %107 : vector<2x1x512xf32> to vector<2x512xf32>
    %cst_25 = arith.constant dense<0.000000e+00> : vector<2x512xf32>
    %109 = tpu.matmul %106, %0, %cst_25 {dimension_numbers = #tpu.dot_dimension_numbers<[1], [0], [0], [1], [0, 0, 1, 1], [], []>} : vector<2x128xf32>, vector<128x512xf32>, vector<2x512xf32> -> vector<2x512xf32>
    %110 = arith.addf %108, %109 : vector<2x512xf32>
    %111 = vector.extract_strided_slice %110 {offsets = [0, 0], sizes = [2, 128], strides = [1, 1]} : vector<2x512xf32> to vector<2x128xf32>
    %112 = arith.negf %111 : vector<2x128xf32>
    %113 = math.exp %112 : vector<2x128xf32>
    %cst_26 = arith.constant 1.000000e+00 : f32
    %114 = vector.broadcast %cst_26 : f32 to vector<2x128xf32>
    %115 = arith.addf %114, %113 : vector<2x128xf32>
    %116 = arith.divf %114, %115 : vector<2x128xf32>
    %117 = vector.extract_strided_slice %110 {offsets = [0, 128], sizes = [2, 128], strides = [1, 1]} : vector<2x512xf32> to vector<2x128xf32>
    %118 = arith.negf %117 : vector<2x128xf32>
    %119 = math.exp %118 : vector<2x128xf32>
    %cst_27 = arith.constant 1.000000e+00 : f32
    %120 = vector.broadcast %cst_27 : f32 to vector<2x128xf32>
    %121 = arith.addf %120, %119 : vector<2x128xf32>
    %122 = arith.divf %120, %121 : vector<2x128xf32>
    %123 = vector.extract_strided_slice %110 {offsets = [0, 256], sizes = [2, 128], strides = [1, 1]} : vector<2x512xf32> to vector<2x128xf32>
    %124 = math.tanh %123 : vector<2x128xf32>
    %125 = vector.extract_strided_slice %110 {offsets = [0, 384], sizes = [2, 128], strides = [1, 1]} : vector<2x512xf32> to vector<2x128xf32>
    %126 = arith.negf %125 : vector<2x128xf32>
    %127 = math.exp %126 : vector<2x128xf32>
    %cst_28 = arith.constant 1.000000e+00 : f32
    %128 = vector.broadcast %cst_28 : f32 to vector<2x128xf32>
    %129 = arith.addf %128, %127 : vector<2x128xf32>
    %130 = arith.divf %128, %129 : vector<2x128xf32>
    %131 = arith.mulf %122, %104 : vector<2x128xf32>
    %132 = arith.mulf %116, %124 : vector<2x128xf32>
    %133 = arith.addf %131, %132 : vector<2x128xf32>
    %134 = math.tanh %133 : vector<2x128xf32>
    %135 = arith.mulf %130, %134 : vector<2x128xf32>
    %c0_29 = arith.constant 0 : index
    %c5 = arith.constant 5 : index
    %c0_30 = arith.constant 0 : index
    %136 = vector.load %arg0[%c0_29, %c5, %c0_30] : memref<2x8x512xf32, #tpu.memory_space<vmem>>, vector<2x1x512xf32>
    %137 = vector.shape_cast %136 : vector<2x1x512xf32> to vector<2x512xf32>
    %cst_31 = arith.constant dense<0.000000e+00> : vector<2x512xf32>
    %138 = tpu.matmul %135, %0, %cst_31 {dimension_numbers = #tpu.dot_dimension_numbers<[1], [0], [0], [1], [0, 0, 1, 1], [], []>} : vector<2x128xf32>, vector<128x512xf32>, vector<2x512xf32> -> vector<2x512xf32>
    %139 = arith.addf %137, %138 : vector<2x512xf32>
    %140 = vector.extract_strided_slice %139 {offsets = [0, 0], sizes = [2, 128], strides = [1, 1]} : vector<2x512xf32> to vector<2x128xf32>
    %141 = arith.negf %140 : vector<2x128xf32>
    %142 = math.exp %141 : vector<2x128xf32>
    %cst_32 = arith.constant 1.000000e+00 : f32
    %143 = vector.broadcast %cst_32 : f32 to vector<2x128xf32>
    %144 = arith.addf %143, %142 : vector<2x128xf32>
    %145 = arith.divf %143, %144 : vector<2x128xf32>
    %146 = vector.extract_strided_slice %139 {offsets = [0, 128], sizes = [2, 128], strides = [1, 1]} : vector<2x512xf32> to vector<2x128xf32>
    %147 = arith.negf %146 : vector<2x128xf32>
    %148 = math.exp %147 : vector<2x128xf32>
    %cst_33 = arith.constant 1.000000e+00 : f32
    %149 = vector.broadcast %cst_33 : f32 to vector<2x128xf32>
    %150 = arith.addf %149, %148 : vector<2x128xf32>
    %151 = arith.divf %149, %150 : vector<2x128xf32>
    %152 = vector.extract_strided_slice %139 {offsets = [0, 256], sizes = [2, 128], strides = [1, 1]} : vector<2x512xf32> to vector<2x128xf32>
    %153 = math.tanh %152 : vector<2x128xf32>
    %154 = vector.extract_strided_slice %139 {offsets = [0, 384], sizes = [2, 128], strides = [1, 1]} : vector<2x512xf32> to vector<2x128xf32>
    %155 = arith.negf %154 : vector<2x128xf32>
    %156 = math.exp %155 : vector<2x128xf32>
    %cst_34 = arith.constant 1.000000e+00 : f32
    %157 = vector.broadcast %cst_34 : f32 to vector<2x128xf32>
    %158 = arith.addf %157, %156 : vector<2x128xf32>
    %159 = arith.divf %157, %158 : vector<2x128xf32>
    %160 = arith.mulf %151, %133 : vector<2x128xf32>
    %161 = arith.mulf %145, %153 : vector<2x128xf32>
    %162 = arith.addf %160, %161 : vector<2x128xf32>
    %163 = math.tanh %162 : vector<2x128xf32>
    %164 = arith.mulf %159, %163 : vector<2x128xf32>
    %c0_35 = arith.constant 0 : index
    %c6 = arith.constant 6 : index
    %c0_36 = arith.constant 0 : index
    %165 = vector.load %arg0[%c0_35, %c6, %c0_36] : memref<2x8x512xf32, #tpu.memory_space<vmem>>, vector<2x1x512xf32>
    %166 = vector.shape_cast %165 : vector<2x1x512xf32> to vector<2x512xf32>
    %cst_37 = arith.constant dense<0.000000e+00> : vector<2x512xf32>
    %167 = tpu.matmul %164, %0, %cst_37 {dimension_numbers = #tpu.dot_dimension_numbers<[1], [0], [0], [1], [0, 0, 1, 1], [], []>} : vector<2x128xf32>, vector<128x512xf32>, vector<2x512xf32> -> vector<2x512xf32>
    %168 = arith.addf %166, %167 : vector<2x512xf32>
    %169 = vector.extract_strided_slice %168 {offsets = [0, 0], sizes = [2, 128], strides = [1, 1]} : vector<2x512xf32> to vector<2x128xf32>
    %170 = arith.negf %169 : vector<2x128xf32>
    %171 = math.exp %170 : vector<2x128xf32>
    %cst_38 = arith.constant 1.000000e+00 : f32
    %172 = vector.broadcast %cst_38 : f32 to vector<2x128xf32>
    %173 = arith.addf %172, %171 : vector<2x128xf32>
    %174 = arith.divf %172, %173 : vector<2x128xf32>
    %175 = vector.extract_strided_slice %168 {offsets = [0, 128], sizes = [2, 128], strides = [1, 1]} : vector<2x512xf32> to vector<2x128xf32>
    %176 = arith.negf %175 : vector<2x128xf32>
    %177 = math.exp %176 : vector<2x128xf32>
    %cst_39 = arith.constant 1.000000e+00 : f32
    %178 = vector.broadcast %cst_39 : f32 to vector<2x128xf32>
    %179 = arith.addf %178, %177 : vector<2x128xf32>
    %180 = arith.divf %178, %179 : vector<2x128xf32>
    %181 = vector.extract_strided_slice %168 {offsets = [0, 256], sizes = [2, 128], strides = [1, 1]} : vector<2x512xf32> to vector<2x128xf32>
    %182 = math.tanh %181 : vector<2x128xf32>
    %183 = vector.extract_strided_slice %168 {offsets = [0, 384], sizes = [2, 128], strides = [1, 1]} : vector<2x512xf32> to vector<2x128xf32>
    %184 = arith.negf %183 : vector<2x128xf32>
    %185 = math.exp %184 : vector<2x128xf32>
    %cst_40 = arith.constant 1.000000e+00 : f32
    %186 = vector.broadcast %cst_40 : f32 to vector<2x128xf32>
    %187 = arith.addf %186, %185 : vector<2x128xf32>
    %188 = arith.divf %186, %187 : vector<2x128xf32>
    %189 = arith.mulf %180, %162 : vector<2x128xf32>
    %190 = arith.mulf %174, %182 : vector<2x128xf32>
    %191 = arith.addf %189, %190 : vector<2x128xf32>
    %192 = math.tanh %191 : vector<2x128xf32>
    %193 = arith.mulf %188, %192 : vector<2x128xf32>
    %c0_41 = arith.constant 0 : index
    %c7 = arith.constant 7 : index
    %c0_42 = arith.constant 0 : index
    %194 = vector.load %arg0[%c0_41, %c7, %c0_42] : memref<2x8x512xf32, #tpu.memory_space<vmem>>, vector<2x1x512xf32>
    %195 = vector.shape_cast %194 : vector<2x1x512xf32> to vector<2x512xf32>
    %cst_43 = arith.constant dense<0.000000e+00> : vector<2x512xf32>
    %196 = tpu.matmul %193, %0, %cst_43 {dimension_numbers = #tpu.dot_dimension_numbers<[1], [0], [0], [1], [0, 0, 1, 1], [], []>} : vector<2x128xf32>, vector<128x512xf32>, vector<2x512xf32> -> vector<2x512xf32>
    %197 = arith.addf %195, %196 : vector<2x512xf32>
    %198 = vector.extract_strided_slice %197 {offsets = [0, 0], sizes = [2, 128], strides = [1, 1]} : vector<2x512xf32> to vector<2x128xf32>
    %199 = arith.negf %198 : vector<2x128xf32>
    %200 = math.exp %199 : vector<2x128xf32>
    %cst_44 = arith.constant 1.000000e+00 : f32
    %201 = vector.broadcast %cst_44 : f32 to vector<2x128xf32>
    %202 = arith.addf %201, %200 : vector<2x128xf32>
    %203 = arith.divf %201, %202 : vector<2x128xf32>
    %204 = vector.extract_strided_slice %197 {offsets = [0, 128], sizes = [2, 128], strides = [1, 1]} : vector<2x512xf32> to vector<2x128xf32>
    %205 = arith.negf %204 : vector<2x128xf32>
    %206 = math.exp %205 : vector<2x128xf32>
    %cst_45 = arith.constant 1.000000e+00 : f32
    %207 = vector.broadcast %cst_45 : f32 to vector<2x128xf32>
    %208 = arith.addf %207, %206 : vector<2x128xf32>
    %209 = arith.divf %207, %208 : vector<2x128xf32>
    %210 = vector.extract_strided_slice %197 {offsets = [0, 256], sizes = [2, 128], strides = [1, 1]} : vector<2x512xf32> to vector<2x128xf32>
    %211 = math.tanh %210 : vector<2x128xf32>
    %212 = vector.extract_strided_slice %197 {offsets = [0, 384], sizes = [2, 128], strides = [1, 1]} : vector<2x512xf32> to vector<2x128xf32>
    %213 = arith.negf %212 : vector<2x128xf32>
    %214 = math.exp %213 : vector<2x128xf32>
    %cst_46 = arith.constant 1.000000e+00 : f32
    %215 = vector.broadcast %cst_46 : f32 to vector<2x128xf32>
    %216 = arith.addf %215, %214 : vector<2x128xf32>
    %217 = arith.divf %215, %216 : vector<2x128xf32>
    %218 = arith.mulf %209, %191 : vector<2x128xf32>
    %219 = arith.mulf %203, %211 : vector<2x128xf32>
    %220 = arith.addf %218, %219 : vector<2x128xf32>
    %221 = math.tanh %220 : vector<2x128xf32>
    %222 = arith.mulf %217, %221 : vector<2x128xf32>
    %223 = vector.extract_strided_slice %222 {offsets = [0, 0], sizes = [2, 64], strides = [1, 1]} : vector<2x128xf32> to vector<2x64xf32>
    %c0_47 = arith.constant 0 : index
    %c0_48 = arith.constant 0 : index
    %224 = vector.load %arg1[%c0_47, %c0_48] : memref<2x256xf32, #tpu.memory_space<vmem>>, vector<2x256xf32>
    %cst_49 = arith.constant dense<0.000000e+00> : vector<2xf32>
    %225 = vector.multi_reduction <add>, %224, %cst_49 [1] : vector<2x256xf32> to vector<2xf32>
    %226 = vector.shape_cast %225 : vector<2xf32> to vector<2x1xf32>
    %cst_50 = arith.constant 2.560000e+02 : f32
    %227 = vector.broadcast %cst_50 : f32 to vector<2x1xf32>
    %228 = arith.divf %226, %227 : vector<2x1xf32>
    %c0_51 = arith.constant 0 : index
    %c0_52 = arith.constant 0 : index
    %229 = vector.load %arg2[%c0_51, %c0_52] : memref<1x256xf32, #tpu.memory_space<vmem>>, vector<1x256xf32>
    %230 = vector.broadcast %228 : vector<2x1xf32> to vector<2x256xf32>
    %231 = vector.broadcast %229 : vector<1x256xf32> to vector<2x256xf32>
    %232 = arith.mulf %230, %231 : vector<2x256xf32>
    %c0_53 = arith.constant 0 : index
    %c0_54 = arith.constant 0 : index
    %233 = vector.load %arg3[%c0_53, %c0_54] : memref<1x256xf32, #tpu.memory_space<vmem>>, vector<1x256xf32>
    %234 = vector.broadcast %233 : vector<1x256xf32> to vector<2x256xf32>
    %235 = arith.addf %232, %234 : vector<2x256xf32>
    %cst_55 = arith.constant 0.000000e+00 : f32
    %236 = vector.broadcast %cst_55 : f32 to vector<2x256xf32>
    %237 = arith.maximumf %235, %236 : vector<2x256xf32>
    %c0_56 = arith.constant 0 : index
    %c0_57 = arith.constant 0 : index
    %238 = vector.load %arg5[%c0_56, %c0_57] : memref<256x64xf32, #tpu.memory_space<vmem>>, vector<256x64xf32>
    %cst_58 = arith.constant dense<0.000000e+00> : vector<2x64xf32>
    %239 = tpu.matmul %237, %238, %cst_58 {dimension_numbers = #tpu.dot_dimension_numbers<[1], [0], [0], [1], [0, 0, 1, 1], [], []>} : vector<2x256xf32>, vector<256x64xf32>, vector<2x64xf32> -> vector<2x64xf32>
    %c0_59 = arith.constant 0 : index
    %c0_60 = arith.constant 0 : index
    %240 = vector.load %arg6[%c0_59, %c0_60] : memref<1x64xf32, #tpu.memory_space<vmem>>, vector<1x64xf32>
    %241 = vector.broadcast %240 : vector<1x64xf32> to vector<2x64xf32>
    %242 = arith.addf %239, %241 : vector<2x64xf32>
    %c0_61 = arith.constant 0 : index
    %c0_62 = arith.constant 0 : index
    %243 = vector.load %arg7[%c0_61, %c0_62] : memref<128x256xf32, #tpu.memory_space<vmem>>, vector<64x256xf32>
    %cst_63 = arith.constant dense<0.000000e+00> : vector<2x256xf32>
    %244 = tpu.matmul %223, %243, %cst_63 {dimension_numbers = #tpu.dot_dimension_numbers<[1], [0], [0], [1], [0, 0, 1, 1], [], []>} : vector<2x64xf32>, vector<64x256xf32>, vector<2x256xf32> -> vector<2x256xf32>
    %c64 = arith.constant 64 : index
    %c0_64 = arith.constant 0 : index
    %245 = vector.load %arg7[%c64, %c0_64] : memref<128x256xf32, #tpu.memory_space<vmem>>, vector<64x256xf32>
    %cst_65 = arith.constant dense<0.000000e+00> : vector<2x256xf32>
    %246 = tpu.matmul %242, %245, %cst_65 {dimension_numbers = #tpu.dot_dimension_numbers<[1], [0], [0], [1], [0, 0, 1, 1], [], []>} : vector<2x64xf32>, vector<64x256xf32>, vector<2x256xf32> -> vector<2x256xf32>
    %247 = arith.addf %244, %246 : vector<2x256xf32>
    %c0_66 = arith.constant 0 : index
    %c0_67 = arith.constant 0 : index
    %248 = vector.load %arg8[%c0_66, %c0_67] : memref<1x256xf32, #tpu.memory_space<vmem>>, vector<1x256xf32>
    %249 = vector.broadcast %248 : vector<1x256xf32> to vector<2x256xf32>
    %250 = arith.addf %247, %249 : vector<2x256xf32>
    %cst_68 = arith.constant 0.000000e+00 : f32
    %251 = vector.broadcast %cst_68 : f32 to vector<2x256xf32>
    %252 = arith.maximumf %250, %251 : vector<2x256xf32>
    %c0_69 = arith.constant 0 : index
    %c0_70 = arith.constant 0 : index
    %253 = vector.load %arg9[%c0_69, %c0_70] : memref<256x128xf32, #tpu.memory_space<vmem>>, vector<256x128xf32>
    %cst_71 = arith.constant dense<0.000000e+00> : vector<2x128xf32>
    %254 = tpu.matmul %252, %253, %cst_71 {dimension_numbers = #tpu.dot_dimension_numbers<[1], [0], [0], [1], [0, 0, 1, 1], [], []>} : vector<2x256xf32>, vector<256x128xf32>, vector<2x128xf32> -> vector<2x128xf32>
    %c0_72 = arith.constant 0 : index
    %c0_73 = arith.constant 0 : index
    %255 = vector.load %arg10[%c0_72, %c0_73] : memref<1x128xf32, #tpu.memory_space<vmem>>, vector<1x128xf32>
    %256 = vector.broadcast %255 : vector<1x128xf32> to vector<2x128xf32>
    %257 = arith.addf %254, %256 : vector<2x128xf32>
    %c0_74 = arith.constant 0 : index
    %c0_75 = arith.constant 0 : index
    %258 = vector.load %arg11[%c0_74, %c0_75] : memref<2x128xf32, #tpu.memory_space<vmem>>, vector<2x128xf32>
    tpu.vector_store %arg11[%c0_74, %c0_75], %257 {strides = array<i32>} : memref<2x128xf32, #tpu.memory_space<vmem>>, vector<2x128xf32>,
    return
  }
}

</mosaic_0001>

<bundles_post_ra>
// kernel: mmdl_forward.2
= control target key start
LH: loop header
LB: loop body
LE: loop exit
PB: predicated region body
PF: predicated region fallthrough
CT: control target
= control target key end

     0   :  { %s528_s12 = smov 0   ;;  %s530_s13 = smov 0   ;;  %s577_s0 = inlined_call_operand.vmem [shape: f32[2,3,8,256], index: 0, kind: input, shape index: {}]   ;;  %s578_s1 = inlined_call_operand.vmem [shape: f32[3,512], index: 1, kind: input, shape index: {}]   ;;  %s579_s2 = inlined_call_operand.vmem [shape: f32[1,512], index: 2, kind: input, shape index: {}]   ;;  %s580_s3 = inlined_call_operand.vmem [shape: f32[2,8,512], index: 3, kind: output, shape index: {}]  }
   0x1   :  { %s532_s14 = smov 0  }
   0x2 LB: > { %s25_s15 = sadd.s32 1, %s502_s13  ;;  %p446_p0 = scmp.ge.s32.totalorder %s506_s14, 1  ;;  %s506_s14 = sphi %s532_s14, %s13_s14   ;;  %s502_s13 = sphi %s530_s13, %s582_s13   ;;  %s498_s12 = sphi %s528_s12, %s581_s12  }
   0x3   : > { %p27_p1 = scmp.ge.s32.totalorder %s25_s15, 2  ;;  %p157_p2 = scmp.lt.s32.totalorder %s506_s14, 3 }
   0x5   : > { %s584_s15 = smov (%p27_p1, %s25_s15), 0  ;;  %p158_p3 = pnand %p446_p0, %p157_p2 }
   0x6   : > { %p189_p4 = scmp.lt.s32.totalorder (!%p158_p3), %s498_s12, 1 }
   0x7   : > { %161 = sbr.rel (%p158_p3) target bundleno = 173 (0xad), region = 32 }
   0xc   : > { %s586_s12 = smov (!%p189_p4, %s498_s12), 1  ;;  %v216_v9 = vlaneseq  ;;  %v214_v13 = vld [vmem:[%s578_s1] ss:$4 sm:$0xf] }
   0xd   : > { %s459_s16 = smul.u32 48, %s586_s12  ;;  %v455_v16 = vld [vmem:[%s578_s1 + $0x2] ss:$4 sm:$0xf]  ;;  %s458_s28 = sshll.u32 %s586_s12, 5 }
   0xe   : > { %v217_v10 = vshrl.u32 %v216_v9, 7  ;;  %v452_v20 = vld [vmem:[%s578_s1 + $0x1] ss:$4 sm:$0xf]  ;;  %s206_s4 = scalar_lea.vmem %s580_s3, %s458_s28 }
   0xf   : > { %s197_s19 = scalar_lea.vmem %s577_s0, %s459_s16  ;;  %v320_v40 = vld [vmem:[%s579_s2] sm:$0xf] }
  0x10   : > { %v207_v0 = vld [vmem:[%s197_s19] sm:$0xff]  ;;  %v208_v1 = vld [vmem:[%s197_s19 + $0x8] sm:$0xff]  ;;  %v450_v2 = vld [vmem:[%s197_s19 + $0x10] sm:$0xff]  ;;  %v218_v11 = vsub.s32 0, %v217_v10  ;;  %v222_v12 = vsub.s32 1, %v217_v10  ;;  %v226_v14 = vsub.s32 2, %v217_v10 }
  0x11   : > { %v209_v3 = vadd.f32 %v208_v1, %v207_v0  ;;  %v451_v4 = vld [vmem:[%s197_s19 + $0x18] sm:$0xff]  ;;  %v453_v5 = vld [vmem:[%s197_s19 + $0x20] sm:$0xff]  ;;  %v454_v6 = vld [vmem:[%s197_s19 + $0x28] sm:$0xff]  ;;  %v230_v15 = vsub.s32 3, %v217_v10 }
  0x12   : > { %v285_v7 = vadd.f32 %v454_v6, %v453_v5  ;;  %v247_v8 = vadd.f32 %v451_v4, %v450_v2  ;;  %v219_v17 = vrot.slane %v214_v13, %v218_v11  ;;  %v223_v18 = vrot.slane %v214_v13, %v222_v12 }
  0x13   : > { %210 = vadd.xlane.f32.xlu0 %v209_v3  ;;  %v227_v21 = vrot.slane %v214_v13, %v226_v14  ;;  %v231_v22 = vrot.slane %v214_v13, %v230_v15  ;;  %v295_v24 = vrot.slane %v455_v16, %v218_v11  ;;  %v299_v26 = vrot.slane %v455_v16, %v222_v12 }
  0x14   : > { %286 = vadd.xlane.f32.xlu1 %v285_v7  ;;  %v303_v27 = vrot.slane %v455_v16, %v226_v14  ;;  %v307_v28 = vrot.slane %v455_v16, %v230_v15  ;;  %v257_v30 = vrot.slane %v452_v20, %v218_v11  ;;  %v261_v31 = vrot.slane %v452_v20, %v222_v12 }
  0x15   : > { %v265_v32 = vrot.slane %v452_v20, %v226_v14  ;;  %v269_v33 = vrot.slane %v452_v20, %v230_v15  ;;  %v325_v49 = vrot.slane %v320_v40, %v218_v11  ;;  %v329_v50 = vrot.slane %v320_v40, %v222_v12 }
  0x16   : > { %v333_v51 = vrot.slane %v320_v40, %v226_v14  ;;  %v337_v52 = vrot.slane %v320_v40, %v230_v15 }
  0x17   : > { %248 = vadd.xlane.f32.xlu0 %v247_v8 }
  0x9c   : > { %v211_v19 = vpop.xlane.xlu0 %210 }
  0x9d   : > { %v213_v23 = vmul.f32 0.00390625, %v211_v19  ;;  %v287_v25 = vpop.xlane.xlu1 %286 }
  0x9e   : > { %v288_v29 = vmul.f32 0.00390625, %v287_v25 }
  0x9f   : > { %v236_v34 = vmul.f32 %v219_v17, %v213_v23  ;;  %v237_v36 = vmul.f32 %v223_v18, %v213_v23  ;;  %v238_v37 = vmul.f32 %v227_v21, %v213_v23  ;;  %v239_v38 = vmul.f32 %v231_v22, %v213_v23 }
  0xa0   : > { %v249_v35 = vpop.xlane.xlu0 %248  ;;  %v312_v41 = vmul.f32 %v295_v24, %v288_v29  ;;  %v313_v42 = vmul.f32 %v299_v26, %v288_v29  ;;  %v314_v43 = vmul.f32 %v303_v27, %v288_v29  ;;  %v315_v44 = vmul.f32 %v307_v28, %v288_v29 }
  0xa1   : > { %v250_v39 = vmul.f32 0.00390625, %v249_v35 }
  0xa3   : > { %v274_v45 = vmul.f32 %v257_v30, %v250_v39  ;;  %v275_v46 = vmul.f32 %v261_v31, %v250_v39  ;;  %v276_v47 = vmul.f32 %v265_v32, %v250_v39  ;;  %v277_v48 = vmul.f32 %v269_v33, %v250_v39 }
  0xa5   : > { %v278_v53 = vadd.f32 %v274_v45, %v236_v34  ;;  %v279_v54 = vadd.f32 %v275_v46, %v237_v36  ;;  %v280_v55 = vadd.f32 %v276_v47, %v238_v37  ;;  %v281_v56 = vadd.f32 %v277_v48, %v239_v38 }
  0xa7   : > { %v316_v57 = vadd.f32 %v312_v41, %v278_v53  ;;  %v317_v58 = vadd.f32 %v313_v42, %v279_v54  ;;  %v318_v59 = vadd.f32 %v314_v43, %v280_v55  ;;  %v319_v60 = vadd.f32 %v315_v44, %v281_v56 }
  0xa9   : > { %v342_v61 = vadd.f32 %v325_v49, %v316_v57  ;;  %v343_v62 = vadd.f32 %v329_v50, %v317_v58  ;;  %v344_v63 = vadd.f32 %v333_v51, %v318_v59  ;;  %v345_v0 = vadd.f32 %v337_v52, %v319_v60 }
  0xab   : > { %346 = vst [vmem:[%s206_s4] sm:$0xff] %v342_v61  ;;  %347 = vst [vmem:[%s206_s4 + $0x8] sm:$0xff] %v343_v62 }
  0xac   : > { %348 = vst [vmem:[%s206_s4 + $0x10] sm:$0xff] %v344_v63  ;;  %349 = vst [vmem:[%s206_s4 + $0x18] sm:$0xff] %v345_v0 }
  0xad PF: > { %s13_s14 = sadd.s32 1, %s506_s14   ;;  %s581_s12 = smov %s502_s13 }
  0xae   : > { %p10_p5 = scmp.ge.s32.totalorder %s13_s14, 4   ;;  %s582_s13 = smov %s584_s15 }
  0xb0   :  { %12 = sbr.rel (!%p10_p5) target bundleno = 2 (0x2), region = 66 }

// kernel: mmdl_forward.3
= control target key start
LH: loop header
LB: loop body
LE: loop exit
PB: predicated region body
PF: predicated region fallthrough
CT: control target
= control target key end

     0   :  { %s4634_s0 = inlined_call_operand.vmem [shape: f32[2,8,512], index: 0, kind: input, shape index: {}]   ;;  %s4635_s1 = inlined_call_operand.vmem [shape: f32[2,256], index: 1, kind: input, shape index: {}]   ;;  %s4636_s2 = inlined_call_operand.vmem [shape: f32[1,256], index: 2, kind: input, shape index: {}]   ;;  %s4637_s3 = inlined_call_operand.vmem [shape: f32[1,256], index: 3, kind: input, shape index: {}]   ;;  %s4638_s4 = inlined_call_operand.vmem [shape: f32[128,512], index: 4, kind: input, shape index: {}]   ;;  %s4639_s5 = inlined_call_operand.vmem [shape: f32[256,64], index: 5, kind: input, shape index: {}]   ;;  %s4640_s6 = inlined_call_operand.vmem [shape: f32[1,64], index: 6, kind: input, shape index: {}]   ;;  %s4641_s7 = inlined_call_operand.vmem [shape: f32[128,256], index: 7, kind: input, shape index: {}]   ;;  %s4642_s8 = inlined_call_operand.vmem [shape: f32[1,256], index: 8, kind: input, shape index: {}]   ;;  %s4643_s9 = inlined_call_operand.vmem [shape: f32[256,128], index: 9, kind: input, shape index: {}]   ;;  %s4644_s10 = inlined_call_operand.vmem [shape: f32[1,128], index: 10, kind: input, shape index: {}]   ;;  %s4645_s11 = inlined_call_operand.hbm [shape: f32[2,128], index: 11, kind: output, shape index: {}]  }
   0x1   :  { %v3045_v0 = vld [vmem:[%s4638_s4 + $0x1e8] sm:$0xff]  ;;  %v3050_v1 = vld [vmem:[%s4638_s4 + $0x1f8] sm:$0xff]  ;;  %v3055_v2 = vld [vmem:[%s4638_s4 + $0x1e0] sm:$0xff] }
   0x2   :  { %4740 = vst [vmem:[#allocation5_spill] sm:$0xff] %v3045_v0  ;;  %4741 = vst [vmem:[#allocation6_spill] sm:$0xff] %v3050_v1  ;;  %170 = vmatprep.subr.mxu0 %v3045_v0  ;;  %241 = vmatprep.subr.mxu1 %v3050_v1  ;;  %v3062_v3 = vld [vmem:[%s4638_s4 + $0x1f0] sm:$0xff]  ;;  %v3067_v4 = vld [vmem:[%s4638_s4 + $0x1c8] sm:$0xff] }
   0x3   :  { %v3072_v5 = vld [vmem:[%s4638_s4 + $0x1d8] sm:$0xff]  ;;  %171 = vmatpush1.msra.mxu0 %v3055_v2  ;;  %242 = vmatpush1.msra.mxu1 %v3062_v3  ;;  %v3079_v6 = vld [vmem:[%s4638_s4 + $0x1c0] sm:$0xff]  ;;  %v3084_v7 = vld [vmem:[%s4638_s4 + $0x1d0] sm:$0xff] }
   0x4   :  { %v3089_v8 = vld [vmem:[%s4638_s4 + $0x1a8] sm:$0xff]  ;;  %172 = vmatprep.subr.mxu0 %v3067_v4  ;;  %243 = vmatprep.subr.mxu1 %v3072_v5  ;;  %v3096_v9 = vld [vmem:[%s4638_s4 + $0x1b8] sm:$0xff]  ;;  %v3101_v10 = vld [vmem:[%s4638_s4 + $0x1a0] sm:$0xff] }
   0x5   :  { %v3106_v11 = vld [vmem:[%s4638_s4 + $0x1b0] sm:$0xff]  ;;  %173 = vmatpush1.msra.mxu0 %v3079_v6  ;;  %244 = vmatpush1.msra.mxu1 %v3084_v7  ;;  %v3113_v12 = vld [vmem:[%s4638_s4 + $0x188] sm:$0xff]  ;;  %v3118_v13 = vld [vmem:[%s4638_s4 + $0x198] sm:$0xff] }
   0x6   :  { %174 = vmatprep.subr.mxu0 %v3089_v8  ;;  %245 = vmatprep.subr.mxu1 %v3096_v9  ;;  %v3125_v14 = vld [vmem:[%s4638_s4 + $0x180] sm:$0xff]  ;;  %v3130_v15 = vld [vmem:[%s4638_s4 + $0x190] sm:$0xff]  ;;  %v3137_v16 = vld [vmem:[%s4638_s4 + $0x168] sm:$0xff] }
   0x7   :  { %175 = vmatpush1.msra.mxu0 %v3101_v10  ;;  %246 = vmatpush1.msra.mxu1 %v3106_v11  ;;  %v3142_v17 = vld [vmem:[%s4638_s4 + $0x178] sm:$0xff]  ;;  %v3149_v18 = vld [vmem:[%s4638_s4 + $0x160] sm:$0xff]  ;;  %v3154_v19 = vld [vmem:[%s4638_s4 + $0x170] sm:$0xff] }
   0x8   :  { %176 = vmatprep.subr.mxu0 %v3113_v12  ;;  %247 = vmatprep.subr.mxu1 %v3118_v13  ;;  %v3161_v20 = vld [vmem:[%s4638_s4 + $0x148] sm:$0xff]  ;;  %v3166_v21 = vld [vmem:[%s4638_s4 + $0x158] sm:$0xff]  ;;  %v3173_v22 = vld [vmem:[%s4638_s4 + $0x140] sm:$0xff] }
   0x9   :  { %177 = vmatpush1.msra.mxu0 %v3125_v14  ;;  %248 = vmatpush1.msra.mxu1 %v3130_v15  ;;  %v3178_v23 = vld [vmem:[%s4638_s4 + $0x150] sm:$0xff]  ;;  %v3185_v24 = vld [vmem:[%s4638_s4 + $0x128] sm:$0xff]  ;;  %v3190_v25 = vld [vmem:[%s4638_s4 + $0x138] sm:$0xff] }
   0xa   :  { %178 = vmatprep.subr.mxu0 %v3137_v16  ;;  %249 = vmatprep.subr.mxu1 %v3142_v17  ;;  %v3197_v26 = vld [vmem:[%s4638_s4 + $0x120] sm:$0xff]  ;;  %v3202_v27 = vld [vmem:[%s4638_s4 + $0x130] sm:$0xff]  ;;  %v3209_v28 = vld [vmem:[%s4638_s4 + $0x108] sm:$0xff] }
   0xb   :  { %179 = vmatpush1.msra.mxu0 %v3149_v18  ;;  %250 = vmatpush1.msra.mxu1 %v3154_v19  ;;  %v3214_v29 = vld [vmem:[%s4638_s4 + $0x118] sm:$0xff]  ;;  %v3221_v30 = vld [vmem:[%s4638_s4 + $0x100] sm:$0xff]  ;;  %v3226_v31 = vld [vmem:[%s4638_s4 + $0x110] sm:$0xff] }
   0xc   :  { %180 = vmatprep.subr.mxu0 %v3161_v20  ;;  %251 = vmatprep.subr.mxu1 %v3166_v21  ;;  %v3233_v32 = vld [vmem:[%s4638_s4 + $0xe8] sm:$0xff]  ;;  %v3238_v33 = vld [vmem:[%s4638_s4 + $0xf8] sm:$0xff]  ;;  %v3245_v34 = vld [vmem:[%s4638_s4 + $0xe0] sm:$0xff] }
   0xd   :  { %181 = vmatpush1.msra.mxu0 %v3173_v22  ;;  %252 = vmatpush1.msra.mxu1 %v3178_v23  ;;  %v3250_v35 = vld [vmem:[%s4638_s4 + $0xf0] sm:$0xff]  ;;  %v3257_v36 = vld [vmem:[%s4638_s4 + $0xc8] sm:$0xff]  ;;  %v3262_v37 = vld [vmem:[%s4638_s4 + $0xd8] sm:$0xff] }
   0xe   :  { %182 = vmatprep.subr.mxu0 %v3185_v24  ;;  %253 = vmatprep.subr.mxu1 %v3190_v25  ;;  %v3269_v38 = vld [vmem:[%s4638_s4 + $0xc0] sm:$0xff]  ;;  %v3274_v39 = vld [vmem:[%s4638_s4 + $0xd0] sm:$0xff]  ;;  %v3281_v40 = vld [vmem:[%s4638_s4 + $0xa8] sm:$0xff] }
   0xf   :  { %183 = vmatpush1.msra.mxu0 %v3197_v26  ;;  %254 = vmatpush1.msra.mxu1 %v3202_v27  ;;  %v3286_v41 = vld [vmem:[%s4638_s4 + $0xb8] sm:$0xff]  ;;  %v3293_v42 = vld [vmem:[%s4638_s4 + $0xa0] sm:$0xff]  ;;  %v3298_v43 = vld [vmem:[%s4638_s4 + $0xb0] sm:$0xff] }
  0x10   :  { %184 = vmatprep.subr.mxu0 %v3209_v28  ;;  %255 = vmatprep.subr.mxu1 %v3214_v29  ;;  %v3303_v44 = vld [vmem:[%s4638_s4 + $0x88] sm:$0xff]  ;;  %v3310_v45 = vld [vmem:[%s4638_s4 + $0x98] sm:$0xff]  ;;  %v3315_v46 = vld [vmem:[%s4638_s4 + $0x80] sm:$0xff] }
  0x11   :  { %185 = vmatpush1.msra.mxu0 %v3221_v30  ;;  %256 = vmatpush1.msra.mxu1 %v3226_v31  ;;  %4742 = vst [vmem:[#allocation7_spill] sm:$0xff] %v3303_v44  ;;  %4743 = vst [vmem:[#allocation8_spill] sm:$0xff] %v3310_v45  ;;  %v3320_v47 = vld [vmem:[%s4638_s4 + $0x90] sm:$0xff]  ;;  %v3327_v48 = vld [vmem:[%s4638_s4 + $0x68] sm:$0xff] }
  0x12   :  { %186 = vmatprep.subr.mxu0 %v3233_v32  ;;  %257 = vmatprep.subr.mxu1 %v3238_v33  ;;  %4744 = vst [vmem:[#allocation9_spill] sm:$0xff] %v3315_v46  ;;  %4745 = vst [vmem:[#allocation10_spill] sm:$0xff] %v3320_v47  ;;  %v103_v49 = vld [vmem:[%s4634_s0] ss:$8 sm:$0xf] }
  0x13   :  { %187 = vmatpush1.msra.mxu0 %v3245_v34  ;;  %258 = vmatpush1.msra.mxu1 %v3250_v35  ;;  %4746 = vst [vmem:[#allocation11_spill] sm:$0xff] %v3327_v48 }
  0x14   :  { %188 = vmatprep.subr.mxu0 %v3257_v36  ;;  %259 = vmatprep.subr.mxu1 %v3262_v37 }
  0x15   :  { %189 = vmatpush1.msra.mxu0 %v3269_v38  ;;  %260 = vmatpush1.msra.mxu1 %v3274_v39 }
  0x16   :  { %190 = vmatprep.subr.mxu0 %v3281_v40  ;;  %261 = vmatprep.subr.mxu1 %v3286_v41 }
  0x17   :  { %16 = vsyncpa [#allocation3], 0  ;;  %191 = vmatpush1.msra.mxu0 %v3293_v42  ;;  %262 = vmatpush1.msra.mxu1 %v3298_v43  ;;  %v3337_v50 = vld [vmem:[%s4638_s4 + $0x78] sm:$0xff]  ;;  %v2507_v52 = vmul.f32 -1.442695, %v103_v49  ;;  %v3347_v53 = vld [vmem:[%s4638_s4 + $0x60] sm:$0xff] }
  0x18   :  { %4747 = vst [vmem:[#allocation12_spill] sm:$0xff] %v3337_v50  ;;  %v2506_v51 = vld [vmem:[%s4634_s0 + $0x20] ss:$8 sm:$0xf]  ;;  %192 = vmatprep.subr.mxu0 %v3303_v44  ;;  %263 = vmatprep.subr.mxu1 %v3310_v45  ;;  %4748 = vst [vmem:[#allocation13_spill] sm:$0xff] %v3347_v53  ;;  %v126_v62 = vrot.slane %v103_v49, 3 }
  0x19   :  { %v3352_v54 = vld [vmem:[%s4638_s4 + $0x70] sm:$0xff]  ;;  %v2508_v55 = vmul.f32 -1.442695, %v2506_v51  ;;  %193 = vmatpush1.msra.mxu0 %v3315_v46  ;;  %264 = vmatpush1.msra.mxu1 %v3320_v47  ;;  %v3359_v56 = vld [vmem:[%s4638_s4 + $0x48] sm:$0xff]  ;;  %v3364_v57 = vld [vmem:[%s4638_s4 + $0x58] sm:$0xff]  ;;  %2645 = vpow2.f32 %v2507_v52  ;;  %vm2022_vm0 = vcmask 1041408  }
  0x1a   :  { %4749 = vst [vmem:[#allocation14_spill] sm:$0xff] %v3352_v54  ;;  %4750 = vst [vmem:[#allocation15_spill] sm:$0xff] %v3359_v56  ;;  %194 = vmatprep.subr.mxu0 %v3327_v48  ;;  %265 = vmatprep.subr.mxu1 %v3337_v50  ;;  %v3371_v58 = vld [vmem:[%s4638_s4 + $0x40] sm:$0xff]  ;;  %v3376_v59 = vld [vmem:[%s4638_s4 + $0x50] sm:$0xff]  ;;  %vm2201_vm1 = vcmask 523264  }
  0x1b   :  { %4751 = vst [vmem:[#allocation16_spill] sm:$0xff] %v3364_v57  ;;  %4752 = vst [vmem:[#allocation17_spill] sm:$0xff] %v3371_v58  ;;  %2647 = vpow2.f32 %v2508_v55  ;;  %195 = vmatpush1.msra.mxu0 %v3347_v53  ;;  %266 = vmatpush1.msra.mxu1 %v3352_v54  ;;  %v3383_v60 = vld [vmem:[%s4638_s4 + $0x28] sm:$0xff]  ;;  %v3388_v61 = vld [vmem:[%s4638_s4 + $0x38] sm:$0xff]  ;;  %v127_v55 = vrot.slane %v2506_v51, 3 }
  0x1c   :  { %4753 = vst [vmem:[#allocation18_spill] sm:$0xff] %v3376_v59  ;;  %4754 = vst [vmem:[#allocation19_spill] sm:$0xff] %v3383_v60  ;;  %196 = vmatprep.subr.mxu0 %v3359_v56  ;;  %267 = vmatprep.subr.mxu1 %v3364_v57  ;;  %v3395_v63 = vld [vmem:[%s4638_s4 + $0x20] sm:$0xff]  ;;  %v3400_v52 = vld [vmem:[%s4638_s4 + $0x30] sm:$0xff]  ;;  %v2509_v54 = vmul.f32 -1.442695, %v126_v62 }
  0x1d   :  { %4755 = vst [vmem:[#allocation20_spill] sm:$0xff] %v3388_v61  ;;  %4756 = vst [vmem:[#allocation21_spill] sm:$0xff] %v3395_v63  ;;  %197 = vmatpush1.msra.mxu0 %v3371_v58  ;;  %268 = vmatpush1.msra.mxu1 %v3376_v59  ;;  %v3407_v56 = vld [vmem:[%s4638_s4 + $0x8] sm:$0xff]  ;;  %v3412_v57 = vld [vmem:[%s4638_s4 + $0x18] sm:$0xff]  ;;  %v121_v62 = vrot.slane %v2506_v51, 2 }
  0x1e   :  { %4757 = vst [vmem:[#allocation22_spill] sm:$0xff] %v3400_v52  ;;  %4758 = vst [vmem:[#allocation23_spill] sm:$0xff] %v3407_v56  ;;  %198 = vmatprep.subr.mxu0 %v3383_v60  ;;  %269 = vmatprep.subr.mxu1 %v3388_v61  ;;  %v3419_v58 = vld [vmem:[%s4638_s4] sm:$0xff]  ;;  %v3426_v59 = vld [vmem:[%s4638_s4 + $0x10] sm:$0xff]  ;;  %v2510_v61 = vmul.f32 -1.442695, %v127_v55  ;;  %2649 = vpow2.f32 %v2509_v54 }
  0x1f   :  { %4759 = vst [vmem:[#allocation24_spill] sm:$0xff] %v3412_v57  ;;  %4760 = vst [vmem:[#allocation25_spill] sm:$0xff] %v3419_v58  ;;  %199 = vmatpush1.msra.mxu0 %v3395_v63  ;;  %270 = vmatpush1.msra.mxu1 %v3400_v52  ;;  %v4674_v60 = vmov 0.0   ;;  %v120_v52 = vrot.slane %v103_v49, 2 }
  0x20   :  { %4761 = vst [vmem:[#allocation26_spill] sm:$0xff] %v3426_v59  ;;  %200 = vmatprep.subr.mxu0 %v3407_v56  ;;  %271 = vmatprep.subr.mxu1 %v3412_v57  ;;  %2651 = vpow2.f32 %v2510_v61 }
  0x21   :  { %201 = vmatpush1.msra.mxu0 %v3419_v58  ;;  %234 = vmatprep.mubr.f32.mxu0 %v4674_v60  ;;  %2653 = vtanh.f32 %v120_v52 }
  0x22   :  { %272 = vmatpush1.msra.mxu1 %v3426_v59  ;;  %305 = vmatprep.mubr.f32.mxu1 %v4674_v60  ;;  %2655 = vtanh.f32 %v121_v62 }
  0x23   :  { %436 = vmatprep.subr.mxu0 %v3045_v0  ;;  %507 = vmatprep.subr.mxu1 %v3050_v1 }
  0x26   :  { %v2646_v56 = vpop.eup %2645 }
  0x27   :  { %v112_v55 = vadd.f32 1.0, %v2646_v56  ;;  %v2980_v56 = vmov 1966171168  }
  0x28   :  { %v2648_v57 = vpop.eup %2647 }
  0x29   :  { %v113_v58 = vadd.f32 1.0, %v2648_v57  ;;  %2657 = vrcp.f32 %v112_v55  ;;  %v156_v57 = vunpack.c.l.s4 %v2980_v56  ;;  %v4763_v56 = vld [vmem:[#allocation12_spill] sm:$0xff] }
  0x2b   :  { %2659 = vrcp.f32 %v113_v58  ;;  %v2650_v63 = vpop.eup %2649  ;;  %v158_v58 = vlaneseq }
  0x2c   :  { %v136_v53 = vadd.f32 1.0, %v2650_v63  ;;  %v157_v63 = vunpack.c.0.s8 %v156_v57  ;;  %v4764_v57 = vld [vmem:[#allocation13_spill] sm:$0xff] }
  0x2d   :  { %v2652_v59 = vpop.eup %2651  ;;  %v3442_v52 = vshrl.u32 %v158_v58, 7  ;;  %v4765_v58 = vld [vmem:[#allocation14_spill] sm:$0xff] }
  0x2e   :  { %v2654_v60 = vpop.eup %2653  ;;  %v137_v49 = vadd.f32 1.0, %v2652_v59  ;;  %2661 = vrcp.f32 %v136_v53 }
  0x2f   :  { %v2656_v54 = vpop.eup %2655  ;;  %4762 = vst [vmem:[#allocation27_spill] sm:$0xff] %v3442_v52 }
  0x30   :  { %2663 = vrcp.f32 %v137_v49 }
  0x36   :  { %v2658_v50 = vpop.eup %2657 }
  0x37   :  { %v3436_v1 = vmul.f32 %v2658_v50, %v2654_v60  ;;  %v3445_v60 = vsub.s32 %v157_v63, %v3442_v52  ;;  %v4767_v63 = vld [vmem:[#allocation16_spill] sm:$0xff]  ;;  %v4776_v52 = vld [vmem:[#allocation25_spill] sm:$0xff] }
  0x38   :  { %v2660_v0 = vpop.eup %2659 }
  0x39   :  { %v3438_v51 = vmul.f32 %v2660_v0, %v2656_v54  ;;  %2665 = vtanh.f32 %v3436_v1 }
  0x3b   :  { %2667 = vtanh.f32 %v3438_v51  ;;  %v2662_v61 = vpop.eup %2661 }
  0x3d   :  { %v2664_v59 = vpop.eup %2663 }
  0x46   :  { %v2666_v62 = vpop.eup %2665 }
  0x47   :  { %v146_v53 = vmul.f32 %v2666_v62, %v2662_v61  ;;  %v4766_v61 = vld [vmem:[#allocation15_spill] sm:$0xff]  ;;  %v4769_v62 = vld [vmem:[#allocation18_spill] sm:$0xff] }
  0x48   :  { %v2668_v55 = vpop.eup %2667 }
  0x49   :  { %v147_v50 = vmul.f32 %v2668_v55, %v2664_v59  ;;  %v4768_v59 = vld [vmem:[#allocation17_spill] sm:$0xff]  ;;  %v4770_v55 = vld [vmem:[#allocation19_spill] sm:$0xff] }
  0x4b   :  { %v154_v0 = vcombine.low %v146_v53, %v147_v50  ;;  %v4771_v53 = vld [vmem:[#allocation20_spill] sm:$0xff]  ;;  %v4772_v50 = vld [vmem:[#allocation21_spill] sm:$0xff] }
  0x4d   :  { %v161_v49 = vrot.slane %v154_v0, %v3445_v60  ;;  %v4773_v0 = vld [vmem:[#allocation22_spill] sm:$0xff] }
  0x4f   :  { %v168_v54 = vrot.slane %v161_v49, %v3445_v60  ;;  %v4774_v49 = vld [vmem:[#allocation23_spill] sm:$0xff] }
  0x51   :  { %235 = vmatmul.mubr.f32.vlgmr.msra.gmra.mxu0 %v168_v54  ;;  %306 = vmatmul.mubr.f32.vlgmr.msra.gmra.mxu1 %v168_v54  ;;  %v4775_v54 = vld [vmem:[#allocation24_spill] sm:$0xff] }
  0x52   :  { %437 = vmatpush1.msra.mxu0 %v3055_v2  ;;  %508 = vmatpush1.msra.mxu1 %v3062_v3 }
  0x53   :  { %438 = vmatprep.subr.mxu0 %v3067_v4  ;;  %509 = vmatprep.subr.mxu1 %v3072_v5 }
  0x54   :  { %439 = vmatpush1.msra.mxu0 %v3079_v6  ;;  %510 = vmatpush1.msra.mxu1 %v3084_v7 }
  0x55   :  { %440 = vmatprep.subr.mxu0 %v3089_v8  ;;  %511 = vmatprep.subr.mxu1 %v3096_v9 }
  0x56   :  { %441 = vmatpush1.msra.mxu0 %v3101_v10  ;;  %512 = vmatpush1.msra.mxu1 %v3106_v11 }
  0x57   :  { %442 = vmatprep.subr.mxu0 %v3113_v12  ;;  %513 = vmatprep.subr.mxu1 %v3118_v13 }
  0x58   :  { %443 = vmatpush1.msra.mxu0 %v3125_v14  ;;  %514 = vmatpush1.msra.mxu1 %v3130_v15 }
  0x59   :  { %444 = vmatprep.subr.mxu0 %v3137_v16  ;;  %515 = vmatprep.subr.mxu1 %v3142_v17 }
  0x5a   :  { %445 = vmatpush1.msra.mxu0 %v3149_v18  ;;  %516 = vmatpush1.msra.mxu1 %v3154_v19 }
  0x5b   :  { %446 = vmatprep.subr.mxu0 %v3161_v20  ;;  %517 = vmatprep.subr.mxu1 %v3166_v21 }
  0x5c   :  { %447 = vmatpush1.msra.mxu0 %v3173_v22  ;;  %518 = vmatpush1.msra.mxu1 %v3178_v23 }
  0x5d   :  { %448 = vmatprep.subr.mxu0 %v3185_v24  ;;  %519 = vmatprep.subr.mxu1 %v3190_v25 }
  0x5e   :  { %449 = vmatpush1.msra.mxu0 %v3197_v26  ;;  %520 = vmatpush1.msra.mxu1 %v3202_v27 }
  0x5f   :  { %450 = vmatprep.subr.mxu0 %v3209_v28  ;;  %521 = vmatprep.subr.mxu1 %v3214_v29 }
  0x60   :  { %451 = vmatpush1.msra.mxu0 %v3221_v30  ;;  %522 = vmatpush1.msra.mxu1 %v3226_v31 }
  0x61   :  { %452 = vmatprep.subr.mxu0 %v3233_v32  ;;  %523 = vmatprep.subr.mxu1 %v3238_v33 }
  0x62   :  { %453 = vmatpush1.msra.mxu0 %v3245_v34  ;;  %524 = vmatpush1.msra.mxu1 %v3250_v35 }
  0x63   :  { %454 = vmatprep.subr.mxu0 %v3257_v36  ;;  %525 = vmatprep.subr.mxu1 %v3262_v37 }
  0x64   :  { %455 = vmatpush1.msra.mxu0 %v3269_v38  ;;  %526 = vmatpush1.msra.mxu1 %v3274_v39 }
  0x65   :  { %456 = vmatprep.subr.mxu0 %v3281_v40  ;;  %527 = vmatprep.subr.mxu1 %v3286_v41 }
  0x66   :  { %457 = vmatpush1.msra.mxu0 %v3293_v42  ;;  %528 = vmatpush1.msra.mxu1 %v3298_v43 }
  0x67   :  { %458 = vmatprep.subr.mxu0 %v3303_v44  ;;  %529 = vmatprep.subr.mxu1 %v3310_v45 }
  0x68   :  { %459 = vmatpush1.msra.mxu0 %v3315_v46  ;;  %530 = vmatpush1.msra.mxu1 %v3320_v47 }
  0x69   :  { %460 = vmatprep.subr.mxu0 %v3327_v48  ;;  %531 = vmatprep.subr.mxu1 %v4763_v56 }
  0x6a   :  { %461 = vmatpush1.msra.mxu0 %v4764_v57  ;;  %532 = vmatpush1.msra.mxu1 %v4765_v58 }
  0x6b   :  { %462 = vmatprep.subr.mxu0 %v4766_v61  ;;  %533 = vmatprep.subr.mxu1 %v4767_v63  ;;  %v4777_v61 = vmov 0.0   ;;  %v4778_v63 = vld [vmem:[#allocation26_spill] sm:$0xff] }
  0x6c   :  { %463 = vmatpush1.msra.mxu0 %v4768_v59  ;;  %534 = vmatpush1.msra.mxu1 %v4769_v62  ;;  %v4779_v62 = vld [vmem:[#allocation5_spill] sm:$0xff] }
  0x6d   :  { %464 = vmatprep.subr.mxu0 %v4770_v55  ;;  %535 = vmatprep.subr.mxu1 %v4771_v53  ;;  %v4780_v55 = vld [vmem:[#allocation6_spill] sm:$0xff] }
  0x6e   :  { %465 = vmatpush1.msra.mxu0 %v4772_v50  ;;  %536 = vmatpush1.msra.mxu1 %v4773_v0 }
  0x6f   :  { %466 = vmatprep.subr.mxu0 %v4774_v49  ;;  %537 = vmatprep.subr.mxu1 %v4775_v54 }
  0x70   :  { %467 = vmatpush1.msra.mxu0 %v4776_v52  ;;  %500 = vmatprep.mubr.f32.mxu0 %v4777_v61 }
  0x71   :  { %538 = vmatpush1.msra.mxu1 %v4778_v63  ;;  %571 = vmatprep.mubr.f32.mxu1 %v4777_v61  ;;  %v2511_v63 = vld [vmem:[%s4634_s0 + $0x1] ss:$8 sm:$0xf] }
  0x72   :  { %702 = vmatprep.subr.mxu0 %v4779_v62  ;;  %773 = vmatprep.subr.mxu1 %v4780_v55  ;;  %v2512_v55 = vld [vmem:[%s4634_s0 + $0x21] ss:$8 sm:$0xf] }
 0x111   :  { %v236_v53 = vpop.f32.mrf.mxu0  ;;  %v307_v50 = vpop.f32.mrf.mxu1 }
 0x113   :  { %v238_v59 = vpop.f32.mrf.mxu0  ;;  %v309_v0 = vpop.f32.mrf.mxu1 }
 0x114   :  { %v316_v58 = vcombine.low %v236_v53, %v238_v59  ;;  %v317_v49 = vcombine.low %v307_v50, %v309_v0 }
 0x116   :  { %v324_v54 = vrot.slane %v316_v58, %v3445_v60  ;;  %v331_v52 = vrot.slane %v317_v49, %v3445_v60 }
 0x118   :  { %v332_v57 = vcombine.low %v324_v54, %v331_v52  ;;  %v333_v56 = vcombine.high %v324_v54, %v331_v52 }
 0x11a   :  { %v340_v62 = vrot.slane %v332_v57, %v3445_v60  ;;  %v347_v61 = vrot.slane %v333_v56, %v3445_v60 }
 0x11c   :  { %v350_v59 = vadd.f32 %v2511_v63, %v340_v62  ;;  %v351_v53 = vadd.f32 %v2512_v55, %v347_v61 }
 0x11e   :  { %v2513_v50 = vmul.f32 -1.442695, %v350_v59  ;;  %v2514_v58 = vmul.f32 -1.442695, %v351_v53  ;;  %v366_v0 = vrot.slane %v350_v59, 1  ;;  %v367_v49 = vrot.slane %v351_v53, 1 }
 0x11f   :  { %v388_v48 = vrot.slane %v350_v59, 3  ;;  %v389_v47 = vrot.slane %v351_v53, 3  ;;  %v382_v46 = vrot.slane %v350_v59, 2  ;;  %v383_v45 = vrot.slane %v351_v53, 2 }
 0x120   :  { %2669 = vpow2.f32 %v2513_v50  ;;  %v2515_v52 = vmul.f32 -1.442695, %v366_v0  ;;  %v2516_v54 = vmul.f32 -1.442695, %v367_v49 }
 0x121   :  { %2671 = vpow2.f32 %v2514_v58  ;;  %v2517_v44 = vmul.f32 -1.442695, %v388_v48  ;;  %v2518_v57 = vmul.f32 -1.442695, %v389_v47 }
 0x122   :  { %2673 = vpow2.f32 %v2515_v52 }
 0x123   :  { %2675 = vpow2.f32 %v2516_v54 }
 0x124   :  { %2677 = vtanh.f32 %v382_v46 }
 0x125   :  { %2679 = vtanh.f32 %v383_v45 }
 0x126   :  { %2681 = vpow2.f32 %v2517_v44 }
 0x127   :  { %2683 = vpow2.f32 %v2518_v57 }
 0x12d   :  { %v2670_v56 = vpop.eup %2669 }
 0x12e   :  { %v2672_v61 = vpop.eup %2671  ;;  %v358_v63 = vadd.f32 1.0, %v2670_v56 }
 0x12f   :  { %v2674_v62 = vpop.eup %2673  ;;  %v359_v55 = vadd.f32 1.0, %v2672_v61 }
 0x130   :  { %v2676_v50 = vpop.eup %2675  ;;  %2685 = vrcp.f32 %v358_v63  ;;  %v376_v58 = vadd.f32 1.0, %v2674_v62 }
 0x131   :  { %2687 = vrcp.f32 %v359_v55  ;;  %v377_v0 = vadd.f32 1.0, %v2676_v50  ;;  %v2678_v59 = vpop.eup %2677 }
 0x132   :  { %2689 = vrcp.f32 %v376_v58  ;;  %v2680_v53 = vpop.eup %2679 }
 0x133   :  { %2691 = vrcp.f32 %v377_v0  ;;  %v2682_v48 = vpop.eup %2681 }
 0x134   :  { %v2684_v47 = vpop.eup %2683  ;;  %v398_v45 = vadd.f32 1.0, %v2682_v48 }
 0x135   :  { %v399_v54 = vadd.f32 1.0, %v2684_v47 }
 0x136   :  { %2693 = vrcp.f32 %v398_v45  ;;  %v4783_v45 = vld [vmem:[#allocation9_spill] sm:$0xff] }
 0x137   :  { %2695 = vrcp.f32 %v399_v54  ;;  %v4785_v54 = vld [vmem:[#allocation11_spill] sm:$0xff] }
 0x13d   :  { %v2686_v46 = vpop.eup %2685 }
 0x13e   :  { %v2688_v49 = vpop.eup %2687  ;;  %v406_v56 = vmul.f32 %v2686_v46, %v2678_v59  ;;  %v4781_v46 = vld [vmem:[#allocation7_spill] sm:$0xff] }
 0x13f   :  { %v2690_v52 = vpop.eup %2689  ;;  %v407_v61 = vmul.f32 %v2688_v49, %v2680_v53  ;;  %v4782_v49 = vld [vmem:[#allocation8_spill] sm:$0xff] }
 0x140   :  { %v2692_v44 = vpop.eup %2691  ;;  %v404_v57 = vmul.f32 %v2690_v52, %v3436_v1  ;;  %v4784_v52 = vld [vmem:[#allocation10_spill] sm:$0xff] }
 0x141   :  { %v405_v63 = vmul.f32 %v2692_v44, %v3438_v51  ;;  %v4786_v44 = vld [vmem:[#allocation12_spill] sm:$0xff] }
 0x142   :  { %v3527_v62 = vadd.f32 %v406_v56, %v404_v57  ;;  %v4787_v56 = vld [vmem:[#allocation13_spill] sm:$0xff]  ;;  %v4788_v57 = vld [vmem:[#allocation14_spill] sm:$0xff] }
 0x143   :  { %v3529_v55 = vadd.f32 %v407_v61, %v405_v63  ;;  %v2694_v50 = vpop.eup %2693  ;;  %v4789_v61 = vld [vmem:[#allocation15_spill] sm:$0xff]  ;;  %v4790_v63 = vld [vmem:[#allocation16_spill] sm:$0xff] }
 0x144   :  { %2697 = vtanh.f32 %v3527_v62  ;;  %v2696_v58 = vpop.eup %2695 }
 0x145   :  { %2699 = vtanh.f32 %v3529_v55 }
 0x151   :  { %v2698_v0 = vpop.eup %2697 }
 0x152   :  { %v2700_v48 = vpop.eup %2699  ;;  %v412_v59 = vmul.f32 %v2698_v0, %v2694_v50  ;;  %v4791_v50 = vld [vmem:[#allocation17_spill] sm:$0xff]  ;;  %v4793_v0 = vld [vmem:[#allocation19_spill] sm:$0xff] }
 0x153   :  { %v413_v47 = vmul.f32 %v2700_v48, %v2696_v58  ;;  %v4792_v58 = vld [vmem:[#allocation18_spill] sm:$0xff]  ;;  %v4794_v48 = vld [vmem:[#allocation20_spill] sm:$0xff] }
 0x155   :  { %v420_v1 = vcombine.low %v412_v59, %v413_v47  ;;  %v4795_v59 = vld [vmem:[#allocation21_spill] sm:$0xff]  ;;  %v4796_v47 = vld [vmem:[#allocation22_spill] sm:$0xff] }
 0x157   :  { %v427_v53 = vrot.slane %v420_v1, %v3445_v60  ;;  %v4797_v1 = vld [vmem:[#allocation23_spill] sm:$0xff] }
 0x159   :  { %v434_v51 = vrot.slane %v427_v53, %v3445_v60  ;;  %v4798_v53 = vld [vmem:[#allocation24_spill] sm:$0xff] }
 0x15b   :  { %501 = vmatmul.mubr.f32.vlgmr.msra.gmra.mxu0 %v434_v51  ;;  %572 = vmatmul.mubr.f32.vlgmr.msra.gmra.mxu1 %v434_v51  ;;  %v4799_v51 = vld [vmem:[#allocation25_spill] sm:$0xff] }
 0x15c   :  { %703 = vmatpush1.msra.mxu0 %v3055_v2  ;;  %774 = vmatpush1.msra.mxu1 %v3062_v3 }
 0x15d   :  { %704 = vmatprep.subr.mxu0 %v3067_v4  ;;  %775 = vmatprep.subr.mxu1 %v3072_v5 }
 0x15e   :  { %705 = vmatpush1.msra.mxu0 %v3079_v6  ;;  %776 = vmatpush1.msra.mxu1 %v3084_v7 }
 0x15f   :  { %706 = vmatprep.subr.mxu0 %v3089_v8  ;;  %777 = vmatprep.subr.mxu1 %v3096_v9 }
 0x160   :  { %707 = vmatpush1.msra.mxu0 %v3101_v10  ;;  %778 = vmatpush1.msra.mxu1 %v3106_v11 }
 0x161   :  { %708 = vmatprep.subr.mxu0 %v3113_v12  ;;  %779 = vmatprep.subr.mxu1 %v3118_v13 }
 0x162   :  { %709 = vmatpush1.msra.mxu0 %v3125_v14  ;;  %780 = vmatpush1.msra.mxu1 %v3130_v15 }
 0x163   :  { %710 = vmatprep.subr.mxu0 %v3137_v16  ;;  %781 = vmatprep.subr.mxu1 %v3142_v17 }
 0x164   :  { %711 = vmatpush1.msra.mxu0 %v3149_v18  ;;  %782 = vmatpush1.msra.mxu1 %v3154_v19 }
 0x165   :  { %712 = vmatprep.subr.mxu0 %v3161_v20  ;;  %783 = vmatprep.subr.mxu1 %v3166_v21 }
 0x166   :  { %713 = vmatpush1.msra.mxu0 %v3173_v22  ;;  %784 = vmatpush1.msra.mxu1 %v3178_v23 }
 0x167   :  { %714 = vmatprep.subr.mxu0 %v3185_v24  ;;  %785 = vmatprep.subr.mxu1 %v3190_v25 }
 0x168   :  { %715 = vmatpush1.msra.mxu0 %v3197_v26  ;;  %786 = vmatpush1.msra.mxu1 %v3202_v27 }
 0x169   :  { %716 = vmatprep.subr.mxu0 %v3209_v28  ;;  %787 = vmatprep.subr.mxu1 %v3214_v29 }
 0x16a   :  { %717 = vmatpush1.msra.mxu0 %v3221_v30  ;;  %788 = vmatpush1.msra.mxu1 %v3226_v31 }
 0x16b   :  { %718 = vmatprep.subr.mxu0 %v3233_v32  ;;  %789 = vmatprep.subr.mxu1 %v3238_v33 }
 0x16c   :  { %719 = vmatpush1.msra.mxu0 %v3245_v34  ;;  %790 = vmatpush1.msra.mxu1 %v3250_v35 }
 0x16d   :  { %720 = vmatprep.subr.mxu0 %v3257_v36  ;;  %791 = vmatprep.subr.mxu1 %v3262_v37 }
 0x16e   :  { %721 = vmatpush1.msra.mxu0 %v3269_v38  ;;  %792 = vmatpush1.msra.mxu1 %v3274_v39 }
 0x16f   :  { %722 = vmatprep.subr.mxu0 %v3281_v40  ;;  %793 = vmatprep.subr.mxu1 %v3286_v41 }
 0x170   :  { %723 = vmatpush1.msra.mxu0 %v3293_v42  ;;  %794 = vmatpush1.msra.mxu1 %v3298_v43 }
 0x171   :  { %724 = vmatprep.subr.mxu0 %v4781_v46  ;;  %795 = vmatprep.subr.mxu1 %v4782_v49 }
 0x172   :  { %725 = vmatpush1.msra.mxu0 %v4783_v45  ;;  %796 = vmatpush1.msra.mxu1 %v4784_v52 }
 0x173   :  { %726 = vmatprep.subr.mxu0 %v4785_v54  ;;  %797 = vmatprep.subr.mxu1 %v4786_v44 }
 0x174   :  { %727 = vmatpush1.msra.mxu0 %v4787_v56  ;;  %798 = vmatpush1.msra.mxu1 %v4788_v57 }
 0x175   :  { %728 = vmatprep.subr.mxu0 %v4789_v61  ;;  %799 = vmatprep.subr.mxu1 %v4790_v63  ;;  %v4800_v61 = vmov 0.0   ;;  %v4801_v63 = vld [vmem:[#allocation26_spill] sm:$0xff] }
 0x176   :  { %729 = vmatpush1.msra.mxu0 %v4791_v50  ;;  %800 = vmatpush1.msra.mxu1 %v4792_v58  ;;  %v4802_v58 = vld [vmem:[#allocation5_spill] sm:$0xff] }
 0x177   :  { %730 = vmatprep.subr.mxu0 %v4793_v0  ;;  %801 = vmatprep.subr.mxu1 %v4794_v48  ;;  %v4803_v0 = vld [vmem:[#allocation6_spill] sm:$0xff] }
 0x178   :  { %731 = vmatpush1.msra.mxu0 %v4795_v59  ;;  %802 = vmatpush1.msra.mxu1 %v4796_v47 }
 0x179   :  { %732 = vmatprep.subr.mxu0 %v4797_v1  ;;  %803 = vmatprep.subr.mxu1 %v4798_v53 }
 0x17a   :  { %733 = vmatpush1.msra.mxu0 %v4799_v51  ;;  %766 = vmatprep.mubr.f32.mxu0 %v4800_v61 }
 0x17b   :  { %804 = vmatpush1.msra.mxu1 %v4801_v63  ;;  %837 = vmatprep.mubr.f32.mxu1 %v4800_v61  ;;  %v2519_v63 = vld [vmem:[%s4634_s0 + $0x2] ss:$8 sm:$0xf] }
 0x17c   :  { %968 = vmatprep.subr.mxu0 %v4802_v58  ;;  %1039 = vmatprep.subr.mxu1 %v4803_v0  ;;  %v2520_v58 = vld [vmem:[%s4634_s0 + $0x22] ss:$8 sm:$0xf] }
 0x21b   :  { %v502_v48 = vpop.f32.mrf.mxu0  ;;  %v573_v59 = vpop.f32.mrf.mxu1 }
 0x21d   :  { %v504_v50 = vpop.f32.mrf.mxu0  ;;  %v575_v47 = vpop.f32.mrf.mxu1 }
 0x21e   :  { %v582_v57 = vcombine.low %v502_v48, %v504_v50  ;;  %v583_v1 = vcombine.low %v573_v59, %v575_v47 }
 0x220   :  { %v590_v53 = vrot.slane %v582_v57, %v3445_v60  ;;  %v597_v51 = vrot.slane %v583_v1, %v3445_v60 }
 0x222   :  { %v598_v56 = vcombine.low %v590_v53, %v597_v51  ;;  %v599_v44 = vcombine.high %v590_v53, %v597_v51 }
 0x224   :  { %v606_v0 = vrot.slane %v598_v56, %v3445_v60  ;;  %v613_v61 = vrot.slane %v599_v44, %v3445_v60 }
 0x226   :  { %v616_v50 = vadd.f32 %v2519_v63, %v606_v0  ;;  %v617_v48 = vadd.f32 %v2520_v58, %v613_v61 }
 0x228   :  { %v2521_v59 = vmul.f32 -1.442695, %v616_v50  ;;  %v2522_v57 = vmul.f32 -1.442695, %v617_v48  ;;  %v632_v47 = vrot.slane %v616_v50, 1  ;;  %v633_v1 = vrot.slane %v617_v48, 1 }
 0x229   :  { %v654_v54 = vrot.slane %v616_v50, 3  ;;  %v655_v52 = vrot.slane %v617_v48, 3  ;;  %v648_v45 = vrot.slane %v616_v50, 2  ;;  %v649_v49 = vrot.slane %v617_v48, 2 }
 0x22a   :  { %2701 = vpow2.f32 %v2521_v59  ;;  %v2523_v53 = vmul.f32 -1.442695, %v632_v47  ;;  %v2524_v51 = vmul.f32 -1.442695, %v633_v1 }
 0x22b   :  { %2703 = vpow2.f32 %v2522_v57  ;;  %v2525_v46 = vmul.f32 -1.442695, %v654_v54  ;;  %v2526_v56 = vmul.f32 -1.442695, %v655_v52 }
 0x22c   :  { %2705 = vpow2.f32 %v2523_v53 }
 0x22d   :  { %2707 = vpow2.f32 %v2524_v51 }
 0x22e   :  { %2709 = vtanh.f32 %v648_v45 }
 0x22f   :  { %2711 = vtanh.f32 %v649_v49 }
 0x230   :  { %2713 = vpow2.f32 %v2525_v46 }
 0x231   :  { %2715 = vpow2.f32 %v2526_v56 }
 0x237   :  { %v2702_v44 = vpop.eup %2701 }
 0x238   :  { %v2704_v61 = vpop.eup %2703  ;;  %v624_v63 = vadd.f32 1.0, %v2702_v44 }
 0x239   :  { %v2706_v58 = vpop.eup %2705  ;;  %v625_v0 = vadd.f32 1.0, %v2704_v61 }
 0x23a   :  { %v2708_v59 = vpop.eup %2707  ;;  %2717 = vrcp.f32 %v624_v63  ;;  %v642_v57 = vadd.f32 1.0, %v2706_v58 }
 0x23b   :  { %2719 = vrcp.f32 %v625_v0  ;;  %v643_v47 = vadd.f32 1.0, %v2708_v59  ;;  %v2710_v50 = vpop.eup %2709 }
 0x23c   :  { %2721 = vrcp.f32 %v642_v57  ;;  %v2712_v48 = vpop.eup %2711 }
 0x23d   :  { %2723 = vrcp.f32 %v643_v47  ;;  %v2714_v54 = vpop.eup %2713 }
 0x23e   :  { %v2716_v52 = vpop.eup %2715  ;;  %v664_v49 = vadd.f32 1.0, %v2714_v54 }
 0x23f   :  { %v665_v51 = vadd.f32 1.0, %v2716_v52 }
 0x240   :  { %2725 = vrcp.f32 %v664_v49 }
 0x241   :  { %2727 = vrcp.f32 %v665_v51 }
 0x247   :  { %v2718_v45 = vpop.eup %2717 }
 0x248   :  { %v2720_v1 = vpop.eup %2719  ;;  %v672_v44 = vmul.f32 %v2718_v45, %v2710_v50 }
 0x249   :  { %v2722_v53 = vpop.eup %2721  ;;  %v673_v61 = vmul.f32 %v2720_v1, %v2712_v48 }
 0x24a   :  { %v2724_v46 = vpop.eup %2723  ;;  %v670_v56 = vmul.f32 %v2722_v53, %v3527_v62 }
 0x24b   :  { %v671_v63 = vmul.f32 %v2724_v46, %v3529_v55 }
 0x24c   :  { %v3613_v58 = vadd.f32 %v672_v44, %v670_v56 }
 0x24d   :  { %v3615_v0 = vadd.f32 %v673_v61, %v671_v63  ;;  %v2726_v59 = vpop.eup %2725 }
 0x24e   :  { %2729 = vtanh.f32 %v3613_v58  ;;  %v2728_v57 = vpop.eup %2727 }
 0x24f   :  { %2731 = vtanh.f32 %v3615_v0 }
 0x25b   :  { %v2730_v47 = vpop.eup %2729 }
 0x25c   :  { %v2732_v54 = vpop.eup %2731  ;;  %v678_v50 = vmul.f32 %v2730_v47, %v2726_v59 }
 0x25d   :  { %v679_v52 = vmul.f32 %v2732_v54, %v2728_v57 }
 0x25f   :  { %v686_v62 = vcombine.low %v678_v50, %v679_v52 }
 0x261   :  { %v693_v48 = vrot.slane %v686_v62, %v3445_v60 }
 0x263   :  { %v700_v55 = vrot.slane %v693_v48, %v3445_v60 }
 0x265   :  { %767 = vmatmul.mubr.f32.vlgmr.msra.gmra.mxu0 %v700_v55  ;;  %838 = vmatmul.mubr.f32.vlgmr.msra.gmra.mxu1 %v700_v55 }
 0x266   :  { %969 = vmatpush1.msra.mxu0 %v3055_v2  ;;  %1040 = vmatpush1.msra.mxu1 %v3062_v3  ;;  %v4804_v2 = vld [vmem:[#allocation7_spill] sm:$0xff]  ;;  %v4805_v3 = vld [vmem:[#allocation8_spill] sm:$0xff] }
 0x267   :  { %970 = vmatprep.subr.mxu0 %v3067_v4  ;;  %1041 = vmatprep.subr.mxu1 %v3072_v5  ;;  %v4806_v4 = vld [vmem:[#allocation9_spill] sm:$0xff]  ;;  %v4807_v5 = vld [vmem:[#allocation10_spill] sm:$0xff] }
 0x268   :  { %971 = vmatpush1.msra.mxu0 %v3079_v6  ;;  %1042 = vmatpush1.msra.mxu1 %v3084_v7  ;;  %v4808_v6 = vld [vmem:[#allocation11_spill] sm:$0xff]  ;;  %v4809_v7 = vld [vmem:[#allocation12_spill] sm:$0xff] }
 0x269   :  { %972 = vmatprep.subr.mxu0 %v3089_v8  ;;  %1043 = vmatprep.subr.mxu1 %v3096_v9  ;;  %v4810_v8 = vld [vmem:[#allocation13_spill] sm:$0xff]  ;;  %v4811_v9 = vld [vmem:[#allocation14_spill] sm:$0xff] }
 0x26a   :  { %973 = vmatpush1.msra.mxu0 %v3101_v10  ;;  %1044 = vmatpush1.msra.mxu1 %v3106_v11  ;;  %v4812_v10 = vld [vmem:[#allocation15_spill] sm:$0xff]  ;;  %v4813_v11 = vld [vmem:[#allocation16_spill] sm:$0xff] }
 0x26b   :  { %974 = vmatprep.subr.mxu0 %v3113_v12  ;;  %1045 = vmatprep.subr.mxu1 %v3118_v13  ;;  %v4814_v12 = vld [vmem:[#allocation17_spill] sm:$0xff]  ;;  %v4815_v13 = vld [vmem:[#allocation18_spill] sm:$0xff] }
 0x26c   :  { %975 = vmatpush1.msra.mxu0 %v3125_v14  ;;  %1046 = vmatpush1.msra.mxu1 %v3130_v15  ;;  %v4816_v14 = vld [vmem:[#allocation19_spill] sm:$0xff]  ;;  %v4817_v15 = vld [vmem:[#allocation20_spill] sm:$0xff] }
 0x26d   :  { %976 = vmatprep.subr.mxu0 %v3137_v16  ;;  %1047 = vmatprep.subr.mxu1 %v3142_v17  ;;  %v4818_v16 = vld [vmem:[#allocation21_spill] sm:$0xff]  ;;  %v4819_v17 = vld [vmem:[#allocation22_spill] sm:$0xff] }
 0x26e   :  { %977 = vmatpush1.msra.mxu0 %v3149_v18  ;;  %1048 = vmatpush1.msra.mxu1 %v3154_v19  ;;  %v4820_v18 = vld [vmem:[#allocation23_spill] sm:$0xff]  ;;  %v4821_v19 = vld [vmem:[#allocation24_spill] sm:$0xff] }
 0x26f   :  { %978 = vmatprep.subr.mxu0 %v3161_v20  ;;  %1049 = vmatprep.subr.mxu1 %v3166_v21  ;;  %v4822_v20 = vld [vmem:[#allocation25_spill] sm:$0xff]  ;;  %v4823_v21 = vmov 0.0  }
 0x270   :  { %979 = vmatpush1.msra.mxu0 %v3173_v22  ;;  %1050 = vmatpush1.msra.mxu1 %v3178_v23  ;;  %v4824_v22 = vld [vmem:[#allocation26_spill] sm:$0xff] }
 0x271   :  { %980 = vmatprep.subr.mxu0 %v3185_v24  ;;  %1051 = vmatprep.subr.mxu1 %v3190_v25  ;;  %v3688_v23 = vld [vmem:[%s4638_s4 + $0x1e8] sm:$0xff]  ;;  %v3694_v24 = vld [vmem:[%s4638_s4 + $0x1f8] sm:$0xff] }
 0x272   :  { %981 = vmatpush1.msra.mxu0 %v3197_v26  ;;  %1052 = vmatpush1.msra.mxu1 %v3202_v27  ;;  %4825 = vst [vmem:[#allocation5_spill] sm:$0xff] %v3688_v23  ;;  %4826 = vst [vmem:[#allocation6_spill] sm:$0xff] %v3694_v24 }
 0x273   :  { %982 = vmatprep.subr.mxu0 %v3209_v28  ;;  %1053 = vmatprep.subr.mxu1 %v3214_v29 }
 0x274   :  { %983 = vmatpush1.msra.mxu0 %v3221_v30  ;;  %1054 = vmatpush1.msra.mxu1 %v3226_v31 }
 0x275   :  { %984 = vmatprep.subr.mxu0 %v3233_v32  ;;  %1055 = vmatprep.subr.mxu1 %v3238_v33 }
 0x276   :  { %985 = vmatpush1.msra.mxu0 %v3245_v34  ;;  %1056 = vmatpush1.msra.mxu1 %v3250_v35  ;;  %v2527_v35 = vld [vmem:[%s4634_s0 + $0x3] ss:$8 sm:$0xf] }
 0x277   :  { %986 = vmatprep.subr.mxu0 %v3257_v36  ;;  %1057 = vmatprep.subr.mxu1 %v3262_v37  ;;  %v2528_v36 = vld [vmem:[%s4634_s0 + $0x23] ss:$8 sm:$0xf] }
 0x278   :  { %987 = vmatpush1.msra.mxu0 %v3269_v38  ;;  %1058 = vmatpush1.msra.mxu1 %v3274_v39 }
 0x279   :  { %988 = vmatprep.subr.mxu0 %v3281_v40  ;;  %1059 = vmatprep.subr.mxu1 %v3286_v41 }
 0x27a   :  { %989 = vmatpush1.msra.mxu0 %v3293_v42  ;;  %1060 = vmatpush1.msra.mxu1 %v3298_v43 }
 0x27b   :  { %990 = vmatprep.subr.mxu0 %v4804_v2  ;;  %1061 = vmatprep.subr.mxu1 %v4805_v3 }
 0x27c   :  { %991 = vmatpush1.msra.mxu0 %v4806_v4  ;;  %1062 = vmatpush1.msra.mxu1 %v4807_v5 }
 0x27d   :  { %992 = vmatprep.subr.mxu0 %v4808_v6  ;;  %1063 = vmatprep.subr.mxu1 %v4809_v7 }
 0x27e   :  { %993 = vmatpush1.msra.mxu0 %v4810_v8  ;;  %1064 = vmatpush1.msra.mxu1 %v4811_v9 }
 0x27f   :  { %994 = vmatprep.subr.mxu0 %v4812_v10  ;;  %1065 = vmatprep.subr.mxu1 %v4813_v11 }
 0x280   :  { %995 = vmatpush1.msra.mxu0 %v4814_v12  ;;  %1066 = vmatpush1.msra.mxu1 %v4815_v13 }
 0x281   :  { %996 = vmatprep.subr.mxu0 %v4816_v14  ;;  %1067 = vmatprep.subr.mxu1 %v4817_v15 }
 0x282   :  { %997 = vmatpush1.msra.mxu0 %v4818_v16  ;;  %1068 = vmatpush1.msra.mxu1 %v4819_v17 }
 0x283   :  { %998 = vmatprep.subr.mxu0 %v4820_v18  ;;  %1069 = vmatprep.subr.mxu1 %v4821_v19 }
 0x284   :  { %999 = vmatpush1.msra.mxu0 %v4822_v20  ;;  %1032 = vmatprep.mubr.f32.mxu0 %v4823_v21 }
 0x285   :  { %1070 = vmatpush1.msra.mxu1 %v4824_v22  ;;  %1103 = vmatprep.mubr.f32.mxu1 %v4823_v21 }
 0x286   :  { %1234 = vmatprep.subr.mxu0 %v3688_v23  ;;  %1305 = vmatprep.subr.mxu1 %v3694_v24 }
 0x325   :  { %v768_v25 = vpop.f32.mrf.mxu0  ;;  %v839_v26 = vpop.f32.mrf.mxu1 }
 0x327   :  { %v770_v27 = vpop.f32.mrf.mxu0  ;;  %v841_v28 = vpop.f32.mrf.mxu1 }
 0x328   :  { %v848_v29 = vcombine.low %v768_v25, %v770_v27  ;;  %v849_v30 = vcombine.low %v839_v26, %v841_v28  ;;  %v3720_v26 = vld [vmem:[%s4638_s4 + $0x1e0] sm:$0xff]  ;;  %v3726_v27 = vld [vmem:[%s4638_s4 + $0x1f0] sm:$0xff]  ;;  %v3732_v28 = vld [vmem:[%s4638_s4 + $0x1c8] sm:$0xff] }
 0x32a   :  { %v856_v31 = vrot.slane %v848_v29, %v3445_v60  ;;  %v863_v32 = vrot.slane %v849_v30, %v3445_v60  ;;  %v3738_v29 = vld [vmem:[%s4638_s4 + $0x1d8] sm:$0xff]  ;;  %v3744_v30 = vld [vmem:[%s4638_s4 + $0x1c0] sm:$0xff] }
 0x32c   :  { %v864_v33 = vcombine.low %v856_v31, %v863_v32  ;;  %v865_v34 = vcombine.high %v856_v31, %v863_v32  ;;  %v3750_v31 = vld [vmem:[%s4638_s4 + $0x1d0] sm:$0xff]  ;;  %v3756_v32 = vld [vmem:[%s4638_s4 + $0x1a8] sm:$0xff] }
 0x32e   :  { %v872_v37 = vrot.slane %v864_v33, %v3445_v60  ;;  %v879_v38 = vrot.slane %v865_v34, %v3445_v60  ;;  %v3762_v33 = vld [vmem:[%s4638_s4 + $0x1b8] sm:$0xff]  ;;  %v3768_v34 = vld [vmem:[%s4638_s4 + $0x1a0] sm:$0xff] }
 0x330   :  { %v882_v39 = vadd.f32 %v2527_v35, %v872_v37  ;;  %v883_v40 = vadd.f32 %v2528_v36, %v879_v38  ;;  %v3774_v35 = vld [vmem:[%s4638_s4 + $0x1b0] sm:$0xff]  ;;  %v3780_v36 = vld [vmem:[%s4638_s4 + $0x188] sm:$0xff]  ;;  %v3786_v37 = vld [vmem:[%s4638_s4 + $0x198] sm:$0xff] }
 0x331   :  { %v3792_v38 = vld [vmem:[%s4638_s4 + $0x180] sm:$0xff] }
 0x332   :  { %v2529_v41 = vmul.f32 -1.442695, %v882_v39  ;;  %v2530_v42 = vmul.f32 -1.442695, %v883_v40  ;;  %v898_v43 = vrot.slane %v882_v39, 1  ;;  %v899_v45 = vrot.slane %v883_v40, 1 }
 0x333   :  { %v920_v53 = vrot.slane %v882_v39, 3  ;;  %v921_v51 = vrot.slane %v883_v40, 3  ;;  %v914_v46 = vrot.slane %v882_v39, 2  ;;  %v915_v44 = vrot.slane %v883_v40, 2  ;;  %v3798_v39 = vld [vmem:[%s4638_s4 + $0x190] sm:$0xff]  ;;  %v3804_v40 = vld [vmem:[%s4638_s4 + $0x168] sm:$0xff] }
 0x334   :  { %2733 = vpow2.f32 %v2529_v41  ;;  %v2531_v1 = vmul.f32 -1.442695, %v898_v43  ;;  %v2532_v49 = vmul.f32 -1.442695, %v899_v45  ;;  %v3810_v41 = vld [vmem:[%s4638_s4 + $0x178] sm:$0xff]  ;;  %v3822_v43 = vld [vmem:[%s4638_s4 + $0x170] sm:$0xff] }
 0x335   :  { %2735 = vpow2.f32 %v2530_v42  ;;  %v2533_v56 = vmul.f32 -1.442695, %v920_v53  ;;  %v2534_v61 = vmul.f32 -1.442695, %v921_v51  ;;  %v3816_v42 = vld [vmem:[%s4638_s4 + $0x160] sm:$0xff]  ;;  %v3828_v45 = vld [vmem:[%s4638_s4 + $0x148] sm:$0xff] }
 0x336   :  { %2737 = vpow2.f32 %v2531_v1  ;;  %v3834_v1 = vld [vmem:[%s4638_s4 + $0x158] sm:$0xff]  ;;  %v3846_v53 = vld [vmem:[%s4638_s4 + $0x150] sm:$0xff]  ;;  %v3852_v51 = vld [vmem:[%s4638_s4 + $0x128] sm:$0xff] }
 0x337   :  { %2739 = vpow2.f32 %v2532_v49  ;;  %v3840_v49 = vld [vmem:[%s4638_s4 + $0x140] sm:$0xff] }
 0x338   :  { %2741 = vtanh.f32 %v914_v46  ;;  %v3858_v46 = vld [vmem:[%s4638_s4 + $0x138] sm:$0xff] }
 0x339   :  { %2743 = vtanh.f32 %v915_v44  ;;  %v3864_v44 = vld [vmem:[%s4638_s4 + $0x120] sm:$0xff] }
 0x33a   :  { %2745 = vpow2.f32 %v2533_v56  ;;  %v3870_v56 = vld [vmem:[%s4638_s4 + $0x130] sm:$0xff] }
 0x33b   :  { %2747 = vpow2.f32 %v2534_v61  ;;  %v3876_v61 = vld [vmem:[%s4638_s4 + $0x108] sm:$0xff] }
 0x341   :  { %v2734_v63 = vpop.eup %2733 }
 0x342   :  { %v2736_v59 = vpop.eup %2735  ;;  %v890_v57 = vadd.f32 1.0, %v2734_v63  ;;  %v3882_v63 = vld [vmem:[%s4638_s4 + $0x118] sm:$0xff] }
 0x343   :  { %v2738_v47 = vpop.eup %2737  ;;  %v891_v54 = vadd.f32 1.0, %v2736_v59  ;;  %v3888_v59 = vld [vmem:[%s4638_s4 + $0x100] sm:$0xff] }
 0x344   :  { %v2740_v50 = vpop.eup %2739  ;;  %2749 = vrcp.f32 %v890_v57  ;;  %v908_v52 = vadd.f32 1.0, %v2738_v47  ;;  %v3894_v57 = vld [vmem:[%s4638_s4 + $0x110] sm:$0xff]  ;;  %v3900_v47 = vld [vmem:[%s4638_s4 + $0xe8] sm:$0xff] }
 0x345   :  { %2751 = vrcp.f32 %v891_v54  ;;  %v909_v62 = vadd.f32 1.0, %v2740_v50  ;;  %v2742_v48 = vpop.eup %2741  ;;  %v3906_v54 = vld [vmem:[%s4638_s4 + $0xf8] sm:$0xff]  ;;  %v3912_v50 = vld [vmem:[%s4638_s4 + $0xe0] sm:$0xff] }
 0x346   :  { %2753 = vrcp.f32 %v908_v52  ;;  %v2744_v55 = vpop.eup %2743  ;;  %v3918_v52 = vld [vmem:[%s4638_s4 + $0xf0] sm:$0xff] }
 0x347   :  { %2755 = vrcp.f32 %v909_v62  ;;  %v2746_v2 = vpop.eup %2745  ;;  %v3924_v62 = vld [vmem:[%s4638_s4 + $0xc8] sm:$0xff] }
 0x348   :  { %v2748_v3 = vpop.eup %2747  ;;  %v930_v6 = vadd.f32 1.0, %v2746_v2  ;;  %v3942_v2 = vld [vmem:[%s4638_s4 + $0xd0] sm:$0xff] }
 0x349   :  { %v931_v8 = vadd.f32 1.0, %v2748_v3  ;;  %v3948_v3 = vld [vmem:[%s4638_s4 + $0xa8] sm:$0xff] }
 0x34a   :  { %2757 = vrcp.f32 %v930_v6  ;;  %v3966_v6 = vld [vmem:[%s4638_s4 + $0xb0] sm:$0xff] }
 0x34b   :  { %2759 = vrcp.f32 %v931_v8  ;;  %v3978_v8 = vld [vmem:[%s4638_s4 + $0x98] sm:$0xff] }
 0x34c   :  { %4828 = vst [vmem:[#allocation8_spill] sm:$0xff] %v3978_v8 }
 0x351   :  { %v2750_v4 = vpop.eup %2749 }
 0x352   :  { %v2752_v5 = vpop.eup %2751  ;;  %v938_v10 = vmul.f32 %v2750_v4, %v2742_v48  ;;  %v3930_v48 = vld [vmem:[%s4638_s4 + $0xd8] sm:$0xff] }
 0x353   :  { %v2754_v7 = vpop.eup %2753  ;;  %v939_v12 = vmul.f32 %v2752_v5, %v2744_v55  ;;  %v3936_v55 = vld [vmem:[%s4638_s4 + $0xc0] sm:$0xff]  ;;  %v3954_v4 = vld [vmem:[%s4638_s4 + $0xb8] sm:$0xff] }
 0x354   :  { %v2756_v9 = vpop.eup %2755  ;;  %v936_v11 = vmul.f32 %v2754_v7, %v3613_v58  ;;  %v3960_v5 = vld [vmem:[%s4638_s4 + $0xa0] sm:$0xff]  ;;  %v3972_v7 = vld [vmem:[%s4638_s4 + $0x88] sm:$0xff] }
 0x355   :  { %v937_v13 = vmul.f32 %v2756_v9, %v3615_v0  ;;  %4827 = vst [vmem:[#allocation7_spill] sm:$0xff] %v3972_v7  ;;  %v3984_v9 = vld [vmem:[%s4638_s4 + $0x80] sm:$0xff] }
 0x356   :  { %v3709_v14 = vadd.f32 %v938_v10, %v936_v11  ;;  %4829 = vst [vmem:[#allocation9_spill] sm:$0xff] %v3984_v9  ;;  %v3990_v10 = vld [vmem:[%s4638_s4 + $0x90] sm:$0xff]  ;;  %v3996_v11 = vld [vmem:[%s4638_s4 + $0x68] sm:$0xff] }
 0x357   :  { %v3711_v15 = vadd.f32 %v939_v12, %v937_v13  ;;  %v2758_v16 = vpop.eup %2757  ;;  %4830 = vst [vmem:[#allocation10_spill] sm:$0xff] %v3990_v10  ;;  %4831 = vst [vmem:[#allocation11_spill] sm:$0xff] %v3996_v11  ;;  %v4002_v12 = vld [vmem:[%s4638_s4 + $0x78] sm:$0xff]  ;;  %v4008_v13 = vld [vmem:[%s4638_s4 + $0x60] sm:$0xff] }
 0x358   :  { %2761 = vtanh.f32 %v3709_v14  ;;  %v2760_v17 = vpop.eup %2759  ;;  %4832 = vst [vmem:[#allocation12_spill] sm:$0xff] %v4002_v12  ;;  %4833 = vst [vmem:[#allocation13_spill] sm:$0xff] %v4008_v13 }
 0x359   :  { %2763 = vtanh.f32 %v3711_v15 }
 0x365   :  { %v2762_v18 = vpop.eup %2761 }
 0x366   :  { %v2764_v19 = vpop.eup %2763  ;;  %v944_v20 = vmul.f32 %v2762_v18, %v2758_v16  ;;  %v4014_v16 = vld [vmem:[%s4638_s4 + $0x70] sm:$0xff]  ;;  %v4026_v18 = vld [vmem:[%s4638_s4 + $0x58] sm:$0xff] }
 0x367   :  { %v945_v22 = vmul.f32 %v2764_v19, %v2760_v17  ;;  %4834 = vst [vmem:[#allocation14_spill] sm:$0xff] %v4014_v16  ;;  %v4020_v17 = vld [vmem:[%s4638_s4 + $0x48] sm:$0xff]  ;;  %4836 = vst [vmem:[#allocation16_spill] sm:$0xff] %v4026_v18  ;;  %v4032_v19 = vld [vmem:[%s4638_s4 + $0x40] sm:$0xff] }
 0x368   :  { %4835 = vst [vmem:[#allocation15_spill] sm:$0xff] %v4020_v17  ;;  %4837 = vst [vmem:[#allocation17_spill] sm:$0xff] %v4032_v19 }
 0x369   :  { %v952_v58 = vcombine.low %v944_v20, %v945_v22  ;;  %v4038_v20 = vld [vmem:[%s4638_s4 + $0x50] sm:$0xff]  ;;  %v4044_v22 = vld [vmem:[%s4638_s4 + $0x28] sm:$0xff] }
 0x36a   :  { %4838 = vst [vmem:[#allocation18_spill] sm:$0xff] %v4038_v20  ;;  %4839 = vst [vmem:[#allocation19_spill] sm:$0xff] %v4044_v22 }
 0x36b   :  { %v959_v25 = vrot.slane %v952_v58, %v3445_v60  ;;  %v4050_v58 = vld [vmem:[%s4638_s4 + $0x38] sm:$0xff] }
 0x36c   :  { %4840 = vst [vmem:[#allocation20_spill] sm:$0xff] %v4050_v58 }
 0x36d   :  { %v966_v0 = vrot.slane %v959_v25, %v3445_v60  ;;  %v4056_v25 = vld [vmem:[%s4638_s4 + $0x20] sm:$0xff] }
 0x36e   :  { %4841 = vst [vmem:[#allocation21_spill] sm:$0xff] %v4056_v25 }
 0x36f   :  { %1033 = vmatmul.mubr.f32.vlgmr.msra.gmra.mxu0 %v966_v0  ;;  %1104 = vmatmul.mubr.f32.vlgmr.msra.gmra.mxu1 %v966_v0  ;;  %v4062_v0 = vld [vmem:[%s4638_s4 + $0x30] sm:$0xff] }
 0x370   :  { %1235 = vmatpush1.msra.mxu0 %v3720_v26  ;;  %1306 = vmatpush1.msra.mxu1 %v3726_v27  ;;  %4842 = vst [vmem:[#allocation22_spill] sm:$0xff] %v4062_v0 }
 0x371   :  { %1236 = vmatprep.subr.mxu0 %v3732_v28  ;;  %1307 = vmatprep.subr.mxu1 %v3738_v29 }
 0x372   :  { %1237 = vmatpush1.msra.mxu0 %v3744_v30  ;;  %1308 = vmatpush1.msra.mxu1 %v3750_v31 }
 0x373   :  { %1238 = vmatprep.subr.mxu0 %v3756_v32  ;;  %1309 = vmatprep.subr.mxu1 %v3762_v33 }
 0x374   :  { %1239 = vmatpush1.msra.mxu0 %v3768_v34  ;;  %1310 = vmatpush1.msra.mxu1 %v3774_v35 }
 0x375   :  { %1240 = vmatprep.subr.mxu0 %v3780_v36  ;;  %1311 = vmatprep.subr.mxu1 %v3786_v37 }
 0x376   :  { %1241 = vmatpush1.msra.mxu0 %v3792_v38  ;;  %1312 = vmatpush1.msra.mxu1 %v3798_v39 }
 0x377   :  { %1242 = vmatprep.subr.mxu0 %v3804_v40  ;;  %1313 = vmatprep.subr.mxu1 %v3810_v41 }
 0x378   :  { %1243 = vmatpush1.msra.mxu0 %v3816_v42  ;;  %1314 = vmatpush1.msra.mxu1 %v3822_v43 }
 0x379   :  { %1244 = vmatprep.subr.mxu0 %v3828_v45  ;;  %1315 = vmatprep.subr.mxu1 %v3834_v1 }
 0x37a   :  { %1245 = vmatpush1.msra.mxu0 %v3840_v49  ;;  %1316 = vmatpush1.msra.mxu1 %v3846_v53 }
 0x37b   :  { %1246 = vmatprep.subr.mxu0 %v3852_v51  ;;  %1317 = vmatprep.subr.mxu1 %v3858_v46 }
 0x37c   :  { %1247 = vmatpush1.msra.mxu0 %v3864_v44  ;;  %1318 = vmatpush1.msra.mxu1 %v3870_v56 }
 0x37d   :  { %1248 = vmatprep.subr.mxu0 %v3876_v61  ;;  %1319 = vmatprep.subr.mxu1 %v3882_v63 }
 0x37e   :  { %1249 = vmatpush1.msra.mxu0 %v3888_v59  ;;  %1320 = vmatpush1.msra.mxu1 %v3894_v57 }
 0x37f   :  { %1250 = vmatprep.subr.mxu0 %v3900_v47  ;;  %1321 = vmatprep.subr.mxu1 %v3906_v54 }
 0x380   :  { %1251 = vmatpush1.msra.mxu0 %v3912_v50  ;;  %1322 = vmatpush1.msra.mxu1 %v3918_v52 }
 0x381   :  { %1252 = vmatprep.subr.mxu0 %v3924_v62  ;;  %1323 = vmatprep.subr.mxu1 %v3930_v48 }
 0x382   :  { %1253 = vmatpush1.msra.mxu0 %v3936_v55  ;;  %1324 = vmatpush1.msra.mxu1 %v3942_v2 }
 0x383   :  { %1254 = vmatprep.subr.mxu0 %v3948_v3  ;;  %1325 = vmatprep.subr.mxu1 %v3954_v4 }
 0x384   :  { %1255 = vmatpush1.msra.mxu0 %v3960_v5  ;;  %1326 = vmatpush1.msra.mxu1 %v3966_v6 }
 0x385   :  { %1256 = vmatprep.subr.mxu0 %v3972_v7  ;;  %1327 = vmatprep.subr.mxu1 %v3978_v8 }
 0x386   :  { %1257 = vmatpush1.msra.mxu0 %v3984_v9  ;;  %1328 = vmatpush1.msra.mxu1 %v3990_v10 }
 0x387   :  { %1258 = vmatprep.subr.mxu0 %v3996_v11  ;;  %1329 = vmatprep.subr.mxu1 %v4002_v12 }
 0x388   :  { %1259 = vmatpush1.msra.mxu0 %v4008_v13  ;;  %1330 = vmatpush1.msra.mxu1 %v4014_v16 }
 0x389   :  { %1260 = vmatprep.subr.mxu0 %v4020_v17  ;;  %1331 = vmatprep.subr.mxu1 %v4026_v18 }
 0x38a   :  { %1261 = vmatpush1.msra.mxu0 %v4032_v19  ;;  %1332 = vmatpush1.msra.mxu1 %v4038_v20 }
 0x38b   :  { %1262 = vmatprep.subr.mxu0 %v4044_v22  ;;  %1333 = vmatprep.subr.mxu1 %v4050_v58  ;;  %v4068_v22 = vld [vmem:[%s4638_s4 + $0x8] sm:$0xff]  ;;  %v4074_v58 = vld [vmem:[%s4638_s4 + $0x18] sm:$0xff] }
 0x38c   :  { %1263 = vmatpush1.msra.mxu0 %v4056_v25  ;;  %1334 = vmatpush1.msra.mxu1 %v4062_v0  ;;  %4843 = vst [vmem:[#allocation23_spill] sm:$0xff] %v4068_v22  ;;  %4844 = vst [vmem:[#allocation24_spill] sm:$0xff] %v4074_v58  ;;  %v4080_v25 = vld [vmem:[%s4638_s4] sm:$0xff] }
 0x38d   :  { %1264 = vmatprep.subr.mxu0 %v4068_v22  ;;  %1335 = vmatprep.subr.mxu1 %v4074_v58  ;;  %4845 = vst [vmem:[#allocation25_spill] sm:$0xff] %v4080_v25  ;;  %v4087_v22 = vld [vmem:[%s4638_s4 + $0x10] sm:$0xff] }
 0x38e   :  { %1265 = vmatpush1.msra.mxu0 %v4080_v25  ;;  %1298 = vmatprep.mubr.f32.mxu0 %v4823_v21  ;;  %4846 = vst [vmem:[#allocation26_spill] sm:$0xff] %v4087_v22 }
 0x38f   :  { %1336 = vmatpush1.msra.mxu1 %v4087_v22  ;;  %1369 = vmatprep.mubr.f32.mxu1 %v4823_v21  ;;  %v2535_v22 = vld [vmem:[%s4634_s0 + $0x4] ss:$8 sm:$0xf] }
 0x390   :  { %1500 = vmatprep.subr.mxu0 %v3688_v23  ;;  %1571 = vmatprep.subr.mxu1 %v3694_v24  ;;  %v2536_v24 = vld [vmem:[%s4634_s0 + $0x24] ss:$8 sm:$0xf] }
 0x42f   :  { %v1034_v58 = vpop.f32.mrf.mxu0  ;;  %v1105_v0 = vpop.f32.mrf.mxu1 }
 0x431   :  { %v1036_v20 = vpop.f32.mrf.mxu0  ;;  %v1107_v19 = vpop.f32.mrf.mxu1 }
 0x432   :  { %v1114_v25 = vcombine.low %v1034_v58, %v1036_v20  ;;  %v1115_v18 = vcombine.low %v1105_v0, %v1107_v19 }
 0x434   :  { %v1122_v17 = vrot.slane %v1114_v25, %v3445_v60  ;;  %v1129_v16 = vrot.slane %v1115_v18, %v3445_v60 }
 0x436   :  { %v1130_v13 = vcombine.low %v1122_v17, %v1129_v16  ;;  %v1131_v12 = vcombine.high %v1122_v17, %v1129_v16 }
 0x438   :  { %v1138_v23 = vrot.slane %v1130_v13, %v3445_v60  ;;  %v1145_v21 = vrot.slane %v1131_v12, %v3445_v60 }
 0x43a   :  { %v1148_v20 = vadd.f32 %v2535_v22, %v1138_v23  ;;  %v1149_v19 = vadd.f32 %v2536_v24, %v1145_v21 }
 0x43c   :  { %v2537_v58 = vmul.f32 -1.442695, %v1148_v20  ;;  %v2538_v25 = vmul.f32 -1.442695, %v1149_v19  ;;  %v1164_v0 = vrot.slane %v1148_v20, 1  ;;  %v1165_v18 = vrot.slane %v1149_v19, 1 }
 0x43d   :  { %v1186_v11 = vrot.slane %v1148_v20, 3  ;;  %v1187_v10 = vrot.slane %v1149_v19, 3  ;;  %v1180_v9 = vrot.slane %v1148_v20, 2  ;;  %v1181_v8 = vrot.slane %v1149_v19, 2 }
 0x43e   :  { %2765 = vpow2.f32 %v2537_v58  ;;  %v2539_v16 = vmul.f32 -1.442695, %v1164_v0  ;;  %v2540_v17 = vmul.f32 -1.442695, %v1165_v18 }
 0x43f   :  { %2767 = vpow2.f32 %v2538_v25  ;;  %v2541_v7 = vmul.f32 -1.442695, %v1186_v11  ;;  %v2542_v13 = vmul.f32 -1.442695, %v1187_v10 }
 0x440   :  { %2769 = vpow2.f32 %v2539_v16 }
 0x441   :  { %2771 = vpow2.f32 %v2540_v17 }
 0x442   :  { %2773 = vtanh.f32 %v1180_v9 }
 0x443   :  { %2775 = vtanh.f32 %v1181_v8 }
 0x444   :  { %2777 = vpow2.f32 %v2541_v7 }
 0x445   :  { %2779 = vpow2.f32 %v2542_v13 }
 0x44b   :  { %v2766_v12 = vpop.eup %2765 }
 0x44c   :  { %v2768_v21 = vpop.eup %2767  ;;  %v1156_v23 = vadd.f32 1.0, %v2766_v12 }
 0x44d   :  { %v2770_v24 = vpop.eup %2769  ;;  %v1157_v22 = vadd.f32 1.0, %v2768_v21 }
 0x44e   :  { %v2772_v58 = vpop.eup %2771  ;;  %2781 = vrcp.f32 %v1156_v23  ;;  %v1174_v25 = vadd.f32 1.0, %v2770_v24 }
 0x44f   :  { %2783 = vrcp.f32 %v1157_v22  ;;  %v1175_v0 = vadd.f32 1.0, %v2772_v58  ;;  %v2774_v20 = vpop.eup %2773 }
 0x450   :  { %2785 = vrcp.f32 %v1174_v25  ;;  %v2776_v19 = vpop.eup %2775 }
 0x451   :  { %2787 = vrcp.f32 %v1175_v0  ;;  %v2778_v11 = vpop.eup %2777 }
 0x452   :  { %v2780_v10 = vpop.eup %2779  ;;  %v1196_v8 = vadd.f32 1.0, %v2778_v11 }
 0x453   :  { %v1197_v17 = vadd.f32 1.0, %v2780_v10 }
 0x454   :  { %2789 = vrcp.f32 %v1196_v8  ;;  %v4849_v8 = vld [vmem:[#allocation9_spill] sm:$0xff] }
 0x455   :  { %2791 = vrcp.f32 %v1197_v17  ;;  %v4851_v17 = vld [vmem:[#allocation11_spill] sm:$0xff] }
 0x45b   :  { %v2782_v9 = vpop.eup %2781 }
 0x45c   :  { %v2784_v18 = vpop.eup %2783  ;;  %v1204_v12 = vmul.f32 %v2782_v9, %v2774_v20  ;;  %v4847_v9 = vld [vmem:[#allocation7_spill] sm:$0xff] }
 0x45d   :  { %v2786_v16 = vpop.eup %2785  ;;  %v1205_v21 = vmul.f32 %v2784_v18, %v2776_v19  ;;  %v4848_v18 = vld [vmem:[#allocation8_spill] sm:$0xff] }
 0x45e   :  { %v2788_v7 = vpop.eup %2787  ;;  %v1202_v13 = vmul.f32 %v2786_v16, %v3709_v14  ;;  %v4850_v16 = vld [vmem:[#allocation10_spill] sm:$0xff] }
 0x45f   :  { %v1203_v23 = vmul.f32 %v2788_v7, %v3711_v15  ;;  %v4852_v7 = vld [vmem:[#allocation12_spill] sm:$0xff] }
 0x460   :  { %v4105_v24 = vadd.f32 %v1204_v12, %v1202_v13  ;;  %v4853_v12 = vld [vmem:[#allocation13_spill] sm:$0xff]  ;;  %v4854_v13 = vld [vmem:[#allocation14_spill] sm:$0xff] }
 0x461   :  { %v4107_v22 = vadd.f32 %v1205_v21, %v1203_v23  ;;  %v2790_v58 = vpop.eup %2789  ;;  %v4855_v21 = vld [vmem:[#allocation15_spill] sm:$0xff]  ;;  %v4856_v23 = vld [vmem:[#allocation16_spill] sm:$0xff] }
 0x462   :  { %2793 = vtanh.f32 %v4105_v24  ;;  %v2792_v25 = vpop.eup %2791 }
 0x463   :  { %2795 = vtanh.f32 %v4107_v22 }
 0x46f   :  { %v2794_v0 = vpop.eup %2793 }
 0x470   :  { %v2796_v11 = vpop.eup %2795  ;;  %v1210_v20 = vmul.f32 %v2794_v0, %v2790_v58  ;;  %v4857_v58 = vld [vmem:[#allocation17_spill] sm:$0xff]  ;;  %v4859_v0 = vld [vmem:[#allocation19_spill] sm:$0xff] }
 0x471   :  { %v1211_v10 = vmul.f32 %v2796_v11, %v2792_v25  ;;  %v4858_v25 = vld [vmem:[#allocation18_spill] sm:$0xff]  ;;  %v4860_v11 = vld [vmem:[#allocation20_spill] sm:$0xff] }
 0x473   :  { %v1218_v14 = vcombine.low %v1210_v20, %v1211_v10  ;;  %v4861_v20 = vld [vmem:[#allocation21_spill] sm:$0xff]  ;;  %v4862_v10 = vld [vmem:[#allocation22_spill] sm:$0xff] }
 0x475   :  { %v1225_v19 = vrot.slane %v1218_v14, %v3445_v60  ;;  %v4863_v14 = vld [vmem:[#allocation23_spill] sm:$0xff] }
 0x477   :  { %v1232_v15 = vrot.slane %v1225_v19, %v3445_v60  ;;  %v4864_v19 = vld [vmem:[#allocation24_spill] sm:$0xff] }
 0x479   :  { %1299 = vmatmul.mubr.f32.vlgmr.msra.gmra.mxu0 %v1232_v15  ;;  %1370 = vmatmul.mubr.f32.vlgmr.msra.gmra.mxu1 %v1232_v15  ;;  %v4865_v15 = vld [vmem:[#allocation25_spill] sm:$0xff] }
 0x47a   :  { %1501 = vmatpush1.msra.mxu0 %v3720_v26  ;;  %1572 = vmatpush1.msra.mxu1 %v3726_v27 }
 0x47b   :  { %1502 = vmatprep.subr.mxu0 %v3732_v28  ;;  %1573 = vmatprep.subr.mxu1 %v3738_v29 }
 0x47c   :  { %1503 = vmatpush1.msra.mxu0 %v3744_v30  ;;  %1574 = vmatpush1.msra.mxu1 %v3750_v31 }
 0x47d   :  { %1504 = vmatprep.subr.mxu0 %v3756_v32  ;;  %1575 = vmatprep.subr.mxu1 %v3762_v33 }
 0x47e   :  { %1505 = vmatpush1.msra.mxu0 %v3768_v34  ;;  %1576 = vmatpush1.msra.mxu1 %v3774_v35 }
 0x47f   :  { %1506 = vmatprep.subr.mxu0 %v3780_v36  ;;  %1577 = vmatprep.subr.mxu1 %v3786_v37 }
 0x480   :  { %1507 = vmatpush1.msra.mxu0 %v3792_v38  ;;  %1578 = vmatpush1.msra.mxu1 %v3798_v39 }
 0x481   :  { %1508 = vmatprep.subr.mxu0 %v3804_v40  ;;  %1579 = vmatprep.subr.mxu1 %v3810_v41 }
 0x482   :  { %1509 = vmatpush1.msra.mxu0 %v3816_v42  ;;  %1580 = vmatpush1.msra.mxu1 %v3822_v43 }
 0x483   :  { %1510 = vmatprep.subr.mxu0 %v3828_v45  ;;  %1581 = vmatprep.subr.mxu1 %v3834_v1 }
 0x484   :  { %1511 = vmatpush1.msra.mxu0 %v3840_v49  ;;  %1582 = vmatpush1.msra.mxu1 %v3846_v53 }
 0x485   :  { %1512 = vmatprep.subr.mxu0 %v3852_v51  ;;  %1583 = vmatprep.subr.mxu1 %v3858_v46 }
 0x486   :  { %1513 = vmatpush1.msra.mxu0 %v3864_v44  ;;  %1584 = vmatpush1.msra.mxu1 %v3870_v56 }
 0x487   :  { %1514 = vmatprep.subr.mxu0 %v3876_v61  ;;  %1585 = vmatprep.subr.mxu1 %v3882_v63 }
 0x488   :  { %1515 = vmatpush1.msra.mxu0 %v3888_v59  ;;  %1586 = vmatpush1.msra.mxu1 %v3894_v57 }
 0x489   :  { %1516 = vmatprep.subr.mxu0 %v3900_v47  ;;  %1587 = vmatprep.subr.mxu1 %v3906_v54 }
 0x48a   :  { %1517 = vmatpush1.msra.mxu0 %v3912_v50  ;;  %1588 = vmatpush1.msra.mxu1 %v3918_v52 }
 0x48b   :  { %1518 = vmatprep.subr.mxu0 %v3924_v62  ;;  %1589 = vmatprep.subr.mxu1 %v3930_v48 }
 0x48c   :  { %1519 = vmatpush1.msra.mxu0 %v3936_v55  ;;  %1590 = vmatpush1.msra.mxu1 %v3942_v2 }
 0x48d   :  { %1520 = vmatprep.subr.mxu0 %v3948_v3  ;;  %1591 = vmatprep.subr.mxu1 %v3954_v4 }
 0x48e   :  { %1521 = vmatpush1.msra.mxu0 %v3960_v5  ;;  %1592 = vmatpush1.msra.mxu1 %v3966_v6 }
 0x48f   :  { %1522 = vmatprep.subr.mxu0 %v4847_v9  ;;  %1593 = vmatprep.subr.mxu1 %v4848_v18 }
 0x490   :  { %1523 = vmatpush1.msra.mxu0 %v4849_v8  ;;  %1594 = vmatpush1.msra.mxu1 %v4850_v16  ;;  %v2543_v16 = vld [vmem:[%s4634_s0 + $0x5] ss:$8 sm:$0xf] }
 0x491   :  { %1524 = vmatprep.subr.mxu0 %v4851_v17  ;;  %1595 = vmatprep.subr.mxu1 %v4852_v7 }
 0x492   :  { %1525 = vmatpush1.msra.mxu0 %v4853_v12  ;;  %1596 = vmatpush1.msra.mxu1 %v4854_v13 }
 0x493   :  { %1526 = vmatprep.subr.mxu0 %v4855_v21  ;;  %1597 = vmatprep.subr.mxu1 %v4856_v23  ;;  %v4866_v21 = vmov 0.0   ;;  %v4867_v23 = vld [vmem:[#allocation26_spill] sm:$0xff] }
 0x494   :  { %1527 = vmatpush1.msra.mxu0 %v4857_v58  ;;  %1598 = vmatpush1.msra.mxu1 %v4858_v25  ;;  %v4868_v25 = vld [vmem:[#allocation5_spill] sm:$0xff] }
 0x495   :  { %1528 = vmatprep.subr.mxu0 %v4859_v0  ;;  %1599 = vmatprep.subr.mxu1 %v4860_v11  ;;  %v4869_v0 = vld [vmem:[#allocation6_spill] sm:$0xff] }
 0x496   :  { %1529 = vmatpush1.msra.mxu0 %v4861_v20  ;;  %1600 = vmatpush1.msra.mxu1 %v4862_v10  ;;  %v2567_v10 = vld.sshfl [vmem:[%s4635_s1] sm:$0x33 pattern:$0x76325410] }
 0x497   :  { %1530 = vmatprep.subr.mxu0 %v4863_v14  ;;  %1601 = vmatprep.subr.mxu1 %v4864_v19  ;;  %v2019_v14 = vcombine.high %v2567_v10, %v2567_v10  ;;  %v2023_v20 = vsel %vm2022_vm0, %v2567_v10, 0.0 }
 0x498   :  { %1531 = vmatpush1.msra.mxu0 %v4865_v15  ;;  %1564 = vmatprep.mubr.f32.mxu0 %v4866_v21 }
 0x499   :  { %1602 = vmatpush1.msra.mxu1 %v4867_v23  ;;  %1635 = vmatprep.mubr.f32.mxu1 %v4866_v21  ;;  %v2024_v19 = vsel %vm2022_vm0, %v2019_v14, 0.0 }
 0x49a   :  { %1766 = vmatprep.subr.mxu0 %v4868_v25  ;;  %1837 = vmatprep.subr.mxu1 %v4869_v0  ;;  %v2025_v11 = vadd.f32 %v2024_v19, %v2023_v20 }
 0x49c   :  { %2026 = vadd.xlane.f32.xlu0 %v2025_v11  ;;  %v2544_v11 = vld [vmem:[%s4634_s0 + $0x25] ss:$8 sm:$0xf] }
 0x539   :  { %v1300_v15 = vpop.f32.mrf.mxu0  ;;  %v1371_v58 = vpop.f32.mrf.mxu1 }
 0x53b   :  { %v1302_v13 = vpop.f32.mrf.mxu0  ;;  %v1373_v23 = vpop.f32.mrf.mxu1 }
 0x53c   :  { %v1380_v12 = vcombine.low %v1300_v15, %v1302_v13  ;;  %v1381_v21 = vcombine.low %v1371_v58, %v1373_v23 }
 0x53e   :  { %v1388_v25 = vrot.slane %v1380_v12, %v3445_v60  ;;  %v1395_v0 = vrot.slane %v1381_v21, %v3445_v60 }
 0x540   :  { %v1396_v7 = vcombine.low %v1388_v25, %v1395_v0  ;;  %v1397_v17 = vcombine.high %v1388_v25, %v1395_v0 }
 0x542   :  { %v1404_v20 = vrot.slane %v1396_v7, %v3445_v60  ;;  %v1411_v10 = vrot.slane %v1397_v17, %v3445_v60 }
 0x544   :  { %v1414_v13 = vadd.f32 %v2543_v16, %v1404_v20  ;;  %v1415_v23 = vadd.f32 %v2544_v11, %v1411_v10 }
 0x546   :  { %v2545_v58 = vmul.f32 -1.442695, %v1414_v13  ;;  %v2546_v12 = vmul.f32 -1.442695, %v1415_v23  ;;  %v1430_v14 = vrot.slane %v1414_v13, 1  ;;  %v1431_v21 = vrot.slane %v1415_v23, 1 }
 0x547   :  { %v1452_v25 = vrot.slane %v1414_v13, 3  ;;  %v1453_v0 = vrot.slane %v1415_v23, 3  ;;  %v1446_v8 = vrot.slane %v1414_v13, 2  ;;  %v1447_v18 = vrot.slane %v1415_v23, 2 }
 0x548   :  { %2797 = vpow2.f32 %v2545_v58  ;;  %v2547_v19 = vmul.f32 -1.442695, %v1430_v14  ;;  %v2548_v15 = vmul.f32 -1.442695, %v1431_v21 }
 0x549   :  { %2799 = vpow2.f32 %v2546_v12  ;;  %v2549_v9 = vmul.f32 -1.442695, %v1452_v25  ;;  %v2550_v7 = vmul.f32 -1.442695, %v1453_v0 }
 0x54a   :  { %2801 = vpow2.f32 %v2547_v19 }
 0x54b   :  { %2803 = vpow2.f32 %v2548_v15 }
 0x54c   :  { %2805 = vtanh.f32 %v1446_v8 }
 0x54d   :  { %2807 = vtanh.f32 %v1447_v18 }
 0x54e   :  { %2809 = vpow2.f32 %v2549_v9 }
 0x54f   :  { %2811 = vpow2.f32 %v2550_v7 }
 0x555   :  { %v2798_v17 = vpop.eup %2797 }
 0x556   :  { %v2800_v16 = vpop.eup %2799  ;;  %v1422_v11 = vadd.f32 1.0, %v2798_v17 }
 0x557   :  { %v2802_v20 = vpop.eup %2801  ;;  %v1423_v10 = vadd.f32 1.0, %v2800_v16 }
 0x558   :  { %v2804_v58 = vpop.eup %2803  ;;  %2813 = vrcp.f32 %v1422_v11  ;;  %v1440_v12 = vadd.f32 1.0, %v2802_v20 }
 0x559   :  { %2815 = vrcp.f32 %v1423_v10  ;;  %v1441_v14 = vadd.f32 1.0, %v2804_v58  ;;  %v2806_v13 = vpop.eup %2805 }
 0x55a   :  { %2817 = vrcp.f32 %v1440_v12  ;;  %v2808_v23 = vpop.eup %2807 }
 0x55b   :  { %2819 = vrcp.f32 %v1441_v14  ;;  %v2810_v21 = vpop.eup %2809 }
 0x55c   :  { %v2812_v19 = vpop.eup %2811  ;;  %v1462_v18 = vadd.f32 1.0, %v2810_v21 }
 0x55d   :  { %v1463_v0 = vadd.f32 1.0, %v2812_v19 }
 0x55e   :  { %2821 = vrcp.f32 %v1462_v18 }
 0x55f   :  { %2823 = vrcp.f32 %v1463_v0 }
 0x565   :  { %v2814_v8 = vpop.eup %2813 }
 0x566   :  { %v2816_v15 = vpop.eup %2815  ;;  %v1470_v17 = vmul.f32 %v2814_v8, %v2806_v13 }
 0x567   :  { %v2818_v25 = vpop.eup %2817  ;;  %v1471_v16 = vmul.f32 %v2816_v15, %v2808_v23 }
 0x568   :  { %v2820_v9 = vpop.eup %2819  ;;  %v1468_v7 = vmul.f32 %v2818_v25, %v4105_v24 }
 0x569   :  { %v1469_v11 = vmul.f32 %v2820_v9, %v4107_v22 }
 0x56a   :  { %v4194_v20 = vadd.f32 %v1470_v17, %v1468_v7 }
 0x56b   :  { %v4196_v10 = vadd.f32 %v1471_v16, %v1469_v11  ;;  %v2822_v58 = vpop.eup %2821 }
 0x56c   :  { %2825 = vtanh.f32 %v4194_v20  ;;  %v2824_v12 = vpop.eup %2823 }
 0x56d   :  { %2827 = vtanh.f32 %v4196_v10 }
 0x579   :  { %v2826_v14 = vpop.eup %2825 }
 0x57a   :  { %v2828_v21 = vpop.eup %2827  ;;  %v1476_v13 = vmul.f32 %v2826_v14, %v2822_v58 }
 0x57b   :  { %v1477_v19 = vmul.f32 %v2828_v21, %v2824_v12 }
 0x57d   :  { %v1484_v24 = vcombine.low %v1476_v13, %v1477_v19 }
 0x57f   :  { %v1491_v23 = vrot.slane %v1484_v24, %v3445_v60 }
 0x581   :  { %v1498_v22 = vrot.slane %v1491_v23, %v3445_v60 }
 0x583   :  { %1565 = vmatmul.mubr.f32.vlgmr.msra.gmra.mxu0 %v1498_v22  ;;  %1636 = vmatmul.mubr.f32.vlgmr.msra.gmra.mxu1 %v1498_v22 }
 0x584   :  { %1767 = vmatpush1.msra.mxu0 %v3720_v26  ;;  %1838 = vmatpush1.msra.mxu1 %v3726_v27  ;;  %v4870_v26 = vld [vmem:[#allocation7_spill] sm:$0xff]  ;;  %v4871_v27 = vld [vmem:[#allocation8_spill] sm:$0xff] }
 0x585   :  { %1768 = vmatprep.subr.mxu0 %v3732_v28  ;;  %1839 = vmatprep.subr.mxu1 %v3738_v29  ;;  %v4872_v28 = vld [vmem:[#allocation9_spill] sm:$0xff]  ;;  %v4873_v29 = vld [vmem:[#allocation10_spill] sm:$0xff] }
 0x586   :  { %1769 = vmatpush1.msra.mxu0 %v3744_v30  ;;  %1840 = vmatpush1.msra.mxu1 %v3750_v31  ;;  %v4874_v30 = vld [vmem:[#allocation11_spill] sm:$0xff]  ;;  %v4875_v31 = vld [vmem:[#allocation12_spill] sm:$0xff] }
 0x587   :  { %1770 = vmatprep.subr.mxu0 %v3756_v32  ;;  %1841 = vmatprep.subr.mxu1 %v3762_v33  ;;  %v4876_v32 = vld [vmem:[#allocation13_spill] sm:$0xff]  ;;  %v4877_v33 = vld [vmem:[#allocation14_spill] sm:$0xff] }
 0x588   :  { %1771 = vmatpush1.msra.mxu0 %v3768_v34  ;;  %1842 = vmatpush1.msra.mxu1 %v3774_v35  ;;  %v4878_v34 = vld [vmem:[#allocation15_spill] sm:$0xff]  ;;  %v4879_v35 = vld [vmem:[#allocation16_spill] sm:$0xff] }
 0x589   :  { %1772 = vmatprep.subr.mxu0 %v3780_v36  ;;  %1843 = vmatprep.subr.mxu1 %v3786_v37  ;;  %v4880_v36 = vld [vmem:[#allocation17_spill] sm:$0xff]  ;;  %v4881_v37 = vld [vmem:[#allocation18_spill] sm:$0xff] }
 0x58a   :  { %1773 = vmatpush1.msra.mxu0 %v3792_v38  ;;  %1844 = vmatpush1.msra.mxu1 %v3798_v39  ;;  %v4882_v38 = vld [vmem:[#allocation19_spill] sm:$0xff]  ;;  %v4883_v39 = vld [vmem:[#allocation20_spill] sm:$0xff] }
 0x58b   :  { %1774 = vmatprep.subr.mxu0 %v3804_v40  ;;  %1845 = vmatprep.subr.mxu1 %v3810_v41  ;;  %v4884_v40 = vld [vmem:[#allocation21_spill] sm:$0xff]  ;;  %v4885_v41 = vld [vmem:[#allocation22_spill] sm:$0xff] }
 0x58c   :  { %1775 = vmatpush1.msra.mxu0 %v3816_v42  ;;  %1846 = vmatpush1.msra.mxu1 %v3822_v43  ;;  %v4886_v42 = vld [vmem:[#allocation23_spill] sm:$0xff]  ;;  %v4887_v43 = vld [vmem:[#allocation24_spill] sm:$0xff] }
 0x58d   :  { %1776 = vmatprep.subr.mxu0 %v3828_v45  ;;  %1847 = vmatprep.subr.mxu1 %v3834_v1  ;;  %v4888_v45 = vld [vmem:[#allocation25_spill] sm:$0xff]  ;;  %v4889_v1 = vmov 0.0  }
 0x58e   :  { %1777 = vmatpush1.msra.mxu0 %v3840_v49  ;;  %1848 = vmatpush1.msra.mxu1 %v3846_v53  ;;  %v4890_v49 = vld [vmem:[#allocation26_spill] sm:$0xff]  ;;  %v2091_v53 = vld [vmem:[%s4639_s5 + $0xf8] sm:$0xff] }
 0x58f   :  { %1778 = vmatprep.subr.mxu0 %v3852_v51  ;;  %1849 = vmatprep.subr.mxu1 %v3858_v46 }
 0x590   :  { %1779 = vmatpush1.msra.mxu0 %v3864_v44  ;;  %1850 = vmatpush1.msra.mxu1 %v3870_v56 }
 0x591   :  { %1780 = vmatprep.subr.mxu0 %v3876_v61  ;;  %1851 = vmatprep.subr.mxu1 %v3882_v63 }
 0x592   :  { %1781 = vmatpush1.msra.mxu0 %v3888_v59  ;;  %1852 = vmatpush1.msra.mxu1 %v3894_v57 }
 0x593   :  { %1782 = vmatprep.subr.mxu0 %v3900_v47  ;;  %1853 = vmatprep.subr.mxu1 %v3906_v54 }
 0x594   :  { %1783 = vmatpush1.msra.mxu0 %v3912_v50  ;;  %1854 = vmatpush1.msra.mxu1 %v3918_v52  ;;  %v2551_v50 = vld [vmem:[%s4634_s0 + $0x6] ss:$8 sm:$0xf] }
 0x595   :  { %1784 = vmatprep.subr.mxu0 %v3924_v62  ;;  %1855 = vmatprep.subr.mxu1 %v3930_v48  ;;  %v2552_v52 = vld [vmem:[%s4634_s0 + $0x26] ss:$8 sm:$0xf] }
 0x596   :  { %1785 = vmatpush1.msra.mxu0 %v3936_v55  ;;  %1856 = vmatpush1.msra.mxu1 %v3942_v2 }
 0x597   :  { %1786 = vmatprep.subr.mxu0 %v3948_v3  ;;  %1857 = vmatprep.subr.mxu1 %v3954_v4 }
 0x598   :  { %1787 = vmatpush1.msra.mxu0 %v3960_v5  ;;  %1858 = vmatpush1.msra.mxu1 %v3966_v6 }
 0x599   :  { %1788 = vmatprep.subr.mxu0 %v4870_v26  ;;  %1859 = vmatprep.subr.mxu1 %v4871_v27 }
 0x59a   :  { %1789 = vmatpush1.msra.mxu0 %v4872_v28  ;;  %1860 = vmatpush1.msra.mxu1 %v4873_v29 }
 0x59b   :  { %1790 = vmatprep.subr.mxu0 %v4874_v30  ;;  %1861 = vmatprep.subr.mxu1 %v4875_v31 }
 0x59c   :  { %1791 = vmatpush1.msra.mxu0 %v4876_v32  ;;  %1862 = vmatpush1.msra.mxu1 %v4877_v33 }
 0x59d   :  { %1792 = vmatprep.subr.mxu0 %v4878_v34  ;;  %1863 = vmatprep.subr.mxu1 %v4879_v35 }
 0x59e   :  { %1793 = vmatpush1.msra.mxu0 %v4880_v36  ;;  %1864 = vmatpush1.msra.mxu1 %v4881_v37 }
 0x59f   :  { %1794 = vmatprep.subr.mxu0 %v4882_v38  ;;  %1865 = vmatprep.subr.mxu1 %v4883_v39  ;;  %v4891_v39 = vld [vmem:[#allocation27_spill] sm:$0xff] }
 0x5a0   :  { %1795 = vmatpush1.msra.mxu0 %v4884_v40  ;;  %1866 = vmatpush1.msra.mxu1 %v4885_v41  ;;  %v4288_v40 = vsub.s32 1, %v4891_v39  ;;  %v2027_v41 = vpop.xlane.xlu0 %2026 }
 0x5a1   :  { %1796 = vmatprep.subr.mxu0 %v4886_v42  ;;  %1867 = vmatprep.subr.mxu1 %v4887_v43  ;;  %v4302_v43 = vld [vmem:[%s4637_s3] sm:$0x3] }
 0x5a2   :  { %1797 = vmatpush1.msra.mxu0 %v4888_v45  ;;  %1830 = vmatprep.mubr.f32.mxu0 %v4889_v1 }
 0x5a3   :  { %1868 = vmatpush1.msra.mxu1 %v4890_v49  ;;  %1901 = vmatprep.mubr.f32.mxu1 %v4889_v1 }
 0x5a4   :  { %2572 = vmatprep.subr.mxu0 %v2091_v53 }
 0x643   :  { %v1566_v51 = vpop.f32.mrf.mxu0  ;;  %v1637_v46 = vpop.f32.mrf.mxu1 }
 0x645   :  { %v1568_v44 = vpop.f32.mrf.mxu0  ;;  %v1639_v56 = vpop.f32.mrf.mxu1 }
 0x646   :  { %v1646_v61 = vcombine.low %v1566_v51, %v1568_v44  ;;  %v1647_v63 = vcombine.low %v1637_v46, %v1639_v56  ;;  %v2053_v51 = vrot.slane %v4302_v43, %v4288_v40 }
 0x648   :  { %v1654_v59 = vrot.slane %v1646_v61, %v3445_v60  ;;  %v1661_v57 = vrot.slane %v1647_v63, %v3445_v60 }
 0x64a   :  { %v1662_v47 = vcombine.low %v1654_v59, %v1661_v57  ;;  %v1663_v54 = vcombine.high %v1654_v59, %v1661_v57 }
 0x64c   :  { %v1670_v62 = vrot.slane %v1662_v47, %v3445_v60  ;;  %v1677_v48 = vrot.slane %v1663_v54, %v3445_v60 }
 0x64e   :  { %v1680_v55 = vadd.f32 %v2551_v50, %v1670_v62  ;;  %v1681_v2 = vadd.f32 %v2552_v52, %v1677_v48  ;;  %v2075_v50 = vld [vmem:[%s4639_s5 + $0x78] sm:$0xff]  ;;  %v2090_v52 = vld [vmem:[%s4639_s5 + $0xf0] sm:$0xff]  ;;  %v2089_v48 = vld [vmem:[%s4639_s5 + $0xe8] sm:$0xff] }
 0x64f   :  { %v2074_v62 = vld [vmem:[%s4639_s5 + $0x70] sm:$0xff] }
 0x650   :  { %v2553_v3 = vmul.f32 -1.442695, %v1680_v55  ;;  %v2554_v4 = vmul.f32 -1.442695, %v1681_v2  ;;  %v1696_v5 = vrot.slane %v1680_v55, 1  ;;  %v1697_v6 = vrot.slane %v1681_v2, 1 }
 0x651   :  { %v1718_v18 = vrot.slane %v1680_v55, 3  ;;  %v1719_v25 = vrot.slane %v1681_v2, 3  ;;  %v1712_v0 = vrot.slane %v1680_v55, 2  ;;  %v1713_v9 = vrot.slane %v1681_v2, 2  ;;  %v2073_v55 = vld [vmem:[%s4639_s5 + $0x68] sm:$0xff]  ;;  %v2088_v2 = vld [vmem:[%s4639_s5 + $0xe0] sm:$0xff] }
 0x652   :  { %2829 = vpow2.f32 %v2553_v3  ;;  %v2555_v8 = vmul.f32 -1.442695, %v1696_v5  ;;  %v2556_v15 = vmul.f32 -1.442695, %v1697_v6  ;;  %v2072_v3 = vld [vmem:[%s4639_s5 + $0x60] sm:$0xff]  ;;  %v2071_v5 = vld [vmem:[%s4639_s5 + $0x58] sm:$0xff] }
 0x653   :  { %2831 = vpow2.f32 %v2554_v4  ;;  %v2557_v17 = vmul.f32 -1.442695, %v1718_v18  ;;  %v2558_v7 = vmul.f32 -1.442695, %v1719_v25  ;;  %v2087_v4 = vld [vmem:[%s4639_s5 + $0xd8] sm:$0xff]  ;;  %v2086_v6 = vld [vmem:[%s4639_s5 + $0xd0] sm:$0xff] }
 0x654   :  { %2833 = vpow2.f32 %v2555_v8  ;;  %v2070_v8 = vld [vmem:[%s4639_s5 + $0x50] sm:$0xff]  ;;  %v2069_v18 = vld [vmem:[%s4639_s5 + $0x48] sm:$0xff]  ;;  %v2084_v25 = vld [vmem:[%s4639_s5 + $0xc0] sm:$0xff] }
 0x655   :  { %2835 = vpow2.f32 %v2556_v15  ;;  %v2085_v15 = vld [vmem:[%s4639_s5 + $0xc8] sm:$0xff] }
 0x656   :  { %2837 = vtanh.f32 %v1712_v0  ;;  %v2068_v0 = vld [vmem:[%s4639_s5 + $0x40] sm:$0xff] }
 0x657   :  { %2839 = vtanh.f32 %v1713_v9  ;;  %v4356_v9 = vsub.s32 0, %v4891_v39  ;;  %v2197_v39 = vld [vmem:[%s4641_s7 + $0xe0] sm:$0xff] }
 0x658   :  { %2841 = vpow2.f32 %v2557_v17  ;;  %v2083_v17 = vld [vmem:[%s4639_s5 + $0xb8] sm:$0xff] }
 0x659   :  { %2843 = vpow2.f32 %v2558_v7  ;;  %v2067_v7 = vld [vmem:[%s4639_s5 + $0x38] sm:$0xff] }
 0x65f   :  { %v2830_v16 = vpop.eup %2829 }
 0x660   :  { %v2832_v11 = vpop.eup %2831  ;;  %v1688_v58 = vadd.f32 1.0, %v2830_v16  ;;  %v2082_v16 = vld [vmem:[%s4639_s5 + $0xb0] sm:$0xff] }
 0x661   :  { %v2834_v12 = vpop.eup %2833  ;;  %v1689_v14 = vadd.f32 1.0, %v2832_v11  ;;  %v2066_v11 = vld [vmem:[%s4639_s5 + $0x30] sm:$0xff] }
 0x662   :  { %v2836_v21 = vpop.eup %2835  ;;  %2845 = vrcp.f32 %v1688_v58  ;;  %v1706_v13 = vadd.f32 1.0, %v2834_v12  ;;  %v2081_v12 = vld [vmem:[%s4639_s5 + $0xa8] sm:$0xff] }
 0x663   :  { %2847 = vrcp.f32 %v1689_v14  ;;  %v1707_v19 = vadd.f32 1.0, %v2836_v21  ;;  %v2838_v24 = vpop.eup %2837  ;;  %v2065_v14 = vld [vmem:[%s4639_s5 + $0x28] sm:$0xff]  ;;  %v2080_v21 = vld [vmem:[%s4639_s5 + $0xa0] sm:$0xff] }
 0x664   :  { %2849 = vrcp.f32 %v1706_v13  ;;  %v2840_v23 = vpop.eup %2839 }
 0x665   :  { %2851 = vrcp.f32 %v1707_v19  ;;  %v2842_v22 = vpop.eup %2841  ;;  %v2049_v19 = vrot.slane %v4302_v43, %v4356_v9  ;;  %v2192_v43 = vld [vmem:[%s4641_s7 + $0xb8] sm:$0xff] }
 0x666   :  { %v2844_v26 = vpop.eup %2843  ;;  %v1728_v29 = vadd.f32 1.0, %v2842_v22  ;;  %v2063_v22 = vld [vmem:[%s4639_s5 + $0x18] sm:$0xff] }
 0x667   :  { %v1729_v31 = vadd.f32 1.0, %v2844_v26  ;;  %v2078_v26 = vld [vmem:[%s4639_s5 + $0x90] sm:$0xff] }
 0x668   :  { %2853 = vrcp.f32 %v1728_v29  ;;  %v2077_v29 = vld [vmem:[%s4639_s5 + $0x88] sm:$0xff] }
 0x669   :  { %2855 = vrcp.f32 %v1729_v31  ;;  %v2076_v31 = vld [vmem:[%s4639_s5 + $0x80] sm:$0xff] }
 0x66f   :  { %v2846_v27 = vpop.eup %2845 }
 0x670   :  { %v2848_v28 = vpop.eup %2847  ;;  %v1736_v33 = vmul.f32 %v2846_v27, %v2838_v24  ;;  %v2064_v24 = vld [vmem:[%s4639_s5 + $0x20] sm:$0xff] }
 0x671   :  { %v2850_v30 = vpop.eup %2849  ;;  %v1737_v35 = vmul.f32 %v2848_v28, %v2840_v23  ;;  %v2079_v23 = vld [vmem:[%s4639_s5 + $0x98] sm:$0xff]  ;;  %v2062_v28 = vld [vmem:[%s4639_s5 + $0x10] sm:$0xff] }
 0x672   :  { %v2852_v32 = vpop.eup %2851  ;;  %v1734_v34 = vmul.f32 %v2850_v30, %v4194_v20  ;;  %v4293_v20 = vld [vmem:[%s4636_s2] sm:$0x3]  ;;  %v2061_v30 = vld [vmem:[%s4639_s5 + $0x8] sm:$0xff] }
 0x673   :  { %v1735_v36 = vmul.f32 %v2852_v32, %v4196_v10  ;;  %v4295_v10 = vmul.f32 0.00390625, %v2027_v41  ;;  %v2039_v42 = vrot.slane %v4293_v20, %v4288_v40  ;;  %v2035_v58 = vrot.slane %v4293_v20, %v4356_v9  ;;  %v2196_v41 = vld [vmem:[%s4641_s7 + $0xd8] sm:$0xff]  ;;  %v2195_v20 = vld [vmem:[%s4641_s7 + $0xd0] sm:$0xff] }
 0x674   :  { %v4281_v37 = vadd.f32 %v1736_v33, %v1734_v34  ;;  %v2060_v33 = vld [vmem:[%s4639_s5] sm:$0xff]  ;;  %v2200_v34 = vld [vmem:[%s4641_s7 + $0xf8] sm:$0xff] }
 0x675   :  { %v4283_v38 = vadd.f32 %v1737_v35, %v1735_v36  ;;  %v2854_v45 = vpop.eup %2853  ;;  %v2043_v53 = vmul.f32 %v2039_v42, %v4295_v10  ;;  %v2042_v13 = vmul.f32 %v2035_v58, %v4295_v10  ;;  %2221 = vmatprep.subr.mxu1 %v2200_v34  ;;  %v2199_v35 = vld [vmem:[%s4641_s7 + $0xf0] sm:$0xff]  ;;  %v2198_v36 = vld [vmem:[%s4641_s7 + $0xe8] sm:$0xff]  ;;  %v2193_v42 = vld [vmem:[%s4641_s7 + $0xc0] sm:$0xff] }
 0x676   :  { %2857 = vtanh.f32 %v4281_v37  ;;  %v2856_v49 = vpop.eup %2855  ;;  %v2194_v10 = vld [vmem:[%s4641_s7 + $0xc8] sm:$0xff] }
 0x677   :  { %2859 = vtanh.f32 %v4283_v38  ;;  %v2057_v63 = vadd.f32 %v2053_v51, %v2043_v53  ;;  %v2056_v27 = vadd.f32 %v2049_v19, %v2042_v13  ;;  %v2189_v53 = vld [vmem:[%s4641_s7 + $0xa0] sm:$0xff]  ;;  %v2188_v51 = vld [vmem:[%s4641_s7 + $0x98] sm:$0xff] }
 0x679   :  { %v2059_v47 = vmax.f32 %v2057_v63, 0.0  ;;  %v2058_v32 = vmax.f32 %v2056_v27, 0.0  ;;  %v2413_v63 = vld [vmem:[%s4643_s9 + $0xf8] sm:$0xff] }
 0x683   :  { %v2858_v46 = vpop.eup %2857 }
 0x684   :  { %v2860_v44 = vpop.eup %2859  ;;  %v1742_v56 = vmul.f32 %v2858_v46, %v2854_v45  ;;  %v2191_v45 = vld [vmem:[%s4641_s7 + $0xb0] sm:$0xff] }
 0x685   :  { %v1743_v61 = vmul.f32 %v2860_v44, %v2856_v49  ;;  %v2190_v49 = vld [vmem:[%s4641_s7 + $0xa8] sm:$0xff]  ;;  %v2187_v46 = vld [vmem:[%s4641_s7 + $0x90] sm:$0xff] }
 0x686   :  { %v2186_v44 = vld [vmem:[%s4641_s7 + $0x88] sm:$0xff] }
 0x687   :  { %v1750_v59 = vcombine.low %v1742_v56, %v1743_v61  ;;  %v2185_v56 = vld [vmem:[%s4641_s7 + $0x80] sm:$0xff]  ;;  %v2184_v61 = vld [vmem:[%s4641_s7 + $0x78] sm:$0xff] }
 0x689   :  { %v1757_v57 = vrot.slane %v1750_v59, %v3445_v60  ;;  %v2397_v59 = vld [vmem:[%s4643_s9 + $0x78] sm:$0xff] }
 0x68b   :  { %v1764_v54 = vrot.slane %v1757_v57, %v3445_v60 }
 0x68d   :  { %1831 = vmatmul.mubr.f32.vlgmr.msra.gmra.mxu0 %v1764_v54  ;;  %1902 = vmatmul.mubr.f32.vlgmr.msra.gmra.mxu1 %v1764_v54 }
 0x68e   :  { %2573 = vmatpush3.msra.mxu0 %v2075_v50  ;;  %2163 = vmatprep.mubr.f32.mxu0 %v2059_v47 }
 0x68f   :  { %2574 = vmatprep.subr.mxu0 %v2090_v52  ;;  %2269 = vmatprep.mubr.f32.mxu1 %v4889_v1 }
 0x690   :  { %2575 = vmatpush3.msra.mxu0 %v2074_v62  ;;  %2222 = vmatpush1.msra.mxu1 %v2199_v35 }
 0x691   :  { %2576 = vmatprep.subr.mxu0 %v2089_v48  ;;  %2223 = vmatprep.subr.mxu1 %v2198_v36  ;;  %v2183_v36 = vld [vmem:[%s4641_s7 + $0x70] sm:$0xff] }
 0x692   :  { %2577 = vmatpush3.msra.mxu0 %v2073_v55  ;;  %2224 = vmatpush1.msra.mxu1 %v2197_v39  ;;  %v2182_v39 = vld [vmem:[%s4641_s7 + $0x68] sm:$0xff] }
 0x693   :  { %2578 = vmatprep.subr.mxu0 %v2088_v2  ;;  %2225 = vmatprep.subr.mxu1 %v2196_v41  ;;  %v2181_v41 = vld [vmem:[%s4641_s7 + $0x60] sm:$0xff] }
 0x694   :  { %2579 = vmatpush3.msra.mxu0 %v2072_v3  ;;  %2226 = vmatpush1.msra.mxu1 %v2195_v20 }
 0x695   :  { %2580 = vmatprep.subr.mxu0 %v2087_v4  ;;  %2227 = vmatprep.subr.mxu1 %v2194_v10  ;;  %v2559_v4 = vld [vmem:[%s4634_s0 + $0x7] ss:$8 sm:$0xf] }
 0x696   :  { %2581 = vmatpush3.msra.mxu0 %v2071_v5  ;;  %2228 = vmatpush1.msra.mxu1 %v2193_v42  ;;  %v2560_v5 = vld [vmem:[%s4634_s0 + $0x27] ss:$8 sm:$0xf] }
 0x697   :  { %2582 = vmatprep.subr.mxu0 %v2086_v6  ;;  %2229 = vmatprep.subr.mxu1 %v2192_v43  ;;  %v2180_v10 = vld [vmem:[%s4641_s7 + $0x58] sm:$0xff]  ;;  %v2179_v43 = vld [vmem:[%s4641_s7 + $0x50] sm:$0xff] }
 0x698   :  { %2583 = vmatpush3.msra.mxu0 %v2070_v8  ;;  %2230 = vmatpush1.msra.mxu1 %v2191_v45 }
 0x699   :  { %2584 = vmatprep.subr.mxu0 %v2085_v15  ;;  %2231 = vmatprep.subr.mxu1 %v2190_v49  ;;  %v2178_v49 = vld [vmem:[%s4641_s7 + $0x48] sm:$0xff] }
 0x69a   :  { %2585 = vmatpush3.msra.mxu0 %v2069_v18  ;;  %2232 = vmatpush1.msra.mxu1 %v2189_v53 }
 0x69b   :  { %2586 = vmatprep.subr.mxu0 %v2084_v25  ;;  %2233 = vmatprep.subr.mxu1 %v2188_v51  ;;  %v2177_v51 = vld [vmem:[%s4641_s7 + $0x40] sm:$0xff] }
 0x69c   :  { %2587 = vmatpush3.msra.mxu0 %v2068_v0  ;;  %2234 = vmatpush1.msra.mxu1 %v2187_v46 }
 0x69d   :  { %2588 = vmatprep.subr.mxu0 %v2083_v17  ;;  %2235 = vmatprep.subr.mxu1 %v2186_v44 }
 0x69e   :  { %2589 = vmatpush3.msra.mxu0 %v2067_v7  ;;  %2236 = vmatpush1.msra.mxu1 %v2185_v56 }
 0x69f   :  { %2590 = vmatprep.subr.mxu0 %v2082_v16  ;;  %2311 = vmatprep.subr.mxu1 %v2184_v61  ;;  %v2175_v61 = vld [vmem:[%s4641_s7 + $0x30] sm:$0xff] }
 0x6a0   :  { %2591 = vmatpush3.msra.mxu0 %v2066_v11 }
 0x6a1   :  { %2592 = vmatprep.subr.mxu0 %v2081_v12 }
 0x6a2   :  { %2593 = vmatpush3.msra.mxu0 %v2065_v14 }
 0x6a3   :  { %2594 = vmatprep.subr.mxu0 %v2080_v21 }
 0x6a4   :  { %2595 = vmatpush3.msra.mxu0 %v2064_v24 }
 0x6a5   :  { %2596 = vmatprep.subr.mxu0 %v2079_v23 }
 0x6a6   :  { %2597 = vmatpush3.msra.mxu0 %v2063_v22 }
 0x6a7   :  { %2598 = vmatprep.subr.mxu0 %v2078_v26 }
 0x6a8   :  { %2599 = vmatpush3.msra.mxu0 %v2062_v28 }
 0x6a9   :  { %2600 = vmatprep.subr.mxu0 %v2077_v29 }
 0x6aa   :  { %2601 = vmatpush3.msra.mxu0 %v2061_v30 }
 0x6ab   :  { %2602 = vmatprep.subr.mxu0 %v2076_v31 }
 0x6ac   :  { %2603 = vmatpush3.msra.mxu0 %v2060_v33 }
 0x6ad   :  { %2164 = vmatmul.mubr.f32.vlgmr.msra.gmra.mxu0 %v2058_v32  ;;  %2607 = vmatprep.subr.mxu0 %v2413_v63  ;;  %v2568_v32 = vld [vmem:[%s4640_s6] ss:$0 sm:$0xff] }
 0x6ae   :  { %2608 = vmatpush3.msra.mxu0 %v2397_v59 }
 0x74d   :  { %v1832_v57 = vpop.f32.mrf.mxu0  ;;  %v1903_v47 = vpop.f32.mrf.mxu1 }
 0x74f   :  { %v1834_v54 = vpop.f32.mrf.mxu0  ;;  %v1905_v50 = vpop.f32.mrf.mxu1 }
 0x750   :  { %v1912_v52 = vcombine.low %v1832_v57, %v1834_v54  ;;  %v1913_v62 = vcombine.low %v1903_v47, %v1905_v50  ;;  %v2174_v57 = vld [vmem:[%s4641_s7 + $0x28] sm:$0xff]  ;;  %v2173_v50 = vld [vmem:[%s4641_s7 + $0x20] sm:$0xff] }
 0x752   :  { %v1920_v48 = vrot.slane %v1912_v52, %v3445_v60  ;;  %v1927_v55 = vrot.slane %v1913_v62, %v3445_v60 }
 0x754   :  { %v1928_v2 = vcombine.low %v1920_v48, %v1927_v55  ;;  %v1929_v3 = vcombine.high %v1920_v48, %v1927_v55  ;;  %v2172_v48 = vld [vmem:[%s4641_s7 + $0x18] sm:$0xff] }
 0x756   :  { %v1936_v6 = vrot.slane %v1928_v2, %v3445_v60  ;;  %v1943_v8 = vrot.slane %v1929_v3, %v3445_v60  ;;  %v2171_v2 = vld [vmem:[%s4641_s7 + $0x10] sm:$0xff] }
 0x758   :  { %v1946_v15 = vadd.f32 %v2559_v4, %v1936_v6  ;;  %v1947_v18 = vadd.f32 %v2560_v5, %v1943_v8  ;;  %v2169_v5 = vld [vmem:[%s4641_s7] sm:$0xff] }
 0x75a   :  { %v2561_v25 = vmul.f32 -1.442695, %v1946_v15  ;;  %v2562_v0 = vmul.f32 -1.442695, %v1947_v18  ;;  %v1962_v17 = vrot.slane %v1946_v15, 1  ;;  %v1963_v7 = vrot.slane %v1947_v18, 1 }
 0x75b   :  { %v1984_v58 = vrot.slane %v1946_v15, 3  ;;  %v1985_v12 = vrot.slane %v1947_v18, 3  ;;  %v1978_v14 = vrot.slane %v1946_v15, 2  ;;  %v1979_v21 = vrot.slane %v1947_v18, 2 }
 0x75c   :  { %2861 = vpow2.f32 %v2561_v25  ;;  %v2563_v16 = vmul.f32 -1.442695, %v1962_v17  ;;  %v2564_v11 = vmul.f32 -1.442695, %v1963_v7 }
 0x75d   :  { %2863 = vpow2.f32 %v2562_v0  ;;  %v2565_v13 = vmul.f32 -1.442695, %v1984_v58  ;;  %v2566_v19 = vmul.f32 -1.442695, %v1985_v12  ;;  %v2411_v58 = vld [vmem:[%s4643_s9 + $0xe8] sm:$0xff]  ;;  %v2410_v12 = vld [vmem:[%s4643_s9 + $0xe0] sm:$0xff] }
 0x75e   :  { %2865 = vpow2.f32 %v2563_v16  ;;  %v2412_v16 = vld [vmem:[%s4643_s9 + $0xf0] sm:$0xff] }
 0x75f   :  { %2867 = vpow2.f32 %v2564_v11  ;;  %v2396_v11 = vld [vmem:[%s4643_s9 + $0x70] sm:$0xff]  ;;  %2609 = vmatprep.subr.mxu0 %v2412_v16 }
 0x760   :  { %2869 = vtanh.f32 %v1978_v14  ;;  %2610 = vmatpush3.msra.mxu0 %v2396_v11  ;;  %v2394_v14 = vld [vmem:[%s4643_s9 + $0x60] sm:$0xff] }
 0x761   :  { %2871 = vtanh.f32 %v1979_v21  ;;  %2611 = vmatprep.subr.mxu0 %v2411_v58  ;;  %v2409_v21 = vld [vmem:[%s4643_s9 + $0xd8] sm:$0xff] }
 0x762   :  { %2873 = vpow2.f32 %v2565_v13  ;;  %v2393_v13 = vld [vmem:[%s4643_s9 + $0x58] sm:$0xff] }
 0x763   :  { %2875 = vpow2.f32 %v2566_v19  ;;  %v2408_v19 = vld [vmem:[%s4643_s9 + $0xd0] sm:$0xff] }
 0x769   :  { %v2862_v24 = vpop.eup %2861 }
 0x76a   :  { %v2864_v23 = vpop.eup %2863  ;;  %v1954_v22 = vadd.f32 1.0, %v2862_v24  ;;  %v2392_v24 = vld [vmem:[%s4643_s9 + $0x50] sm:$0xff] }
 0x76b   :  { %v2866_v26 = vpop.eup %2865  ;;  %v1955_v27 = vadd.f32 1.0, %v2864_v23  ;;  %v2407_v23 = vld [vmem:[%s4643_s9 + $0xc8] sm:$0xff] }
 0x76c   :  { %v2868_v28 = vpop.eup %2867  ;;  %2877 = vrcp.f32 %v1954_v22  ;;  %v1972_v29 = vadd.f32 1.0, %v2866_v26  ;;  %v2391_v22 = vld [vmem:[%s4643_s9 + $0x48] sm:$0xff]  ;;  %v2406_v26 = vld [vmem:[%s4643_s9 + $0xc0] sm:$0xff] }
 0x76d   :  { %2879 = vrcp.f32 %v1955_v27  ;;  %v1973_v30 = vadd.f32 1.0, %v2868_v28  ;;  %v2604_v31 = vpop.f32.mrf.mxu0  ;;  %v2870_v20 = vpop.eup %2869  ;;  %v2390_v27 = vld [vmem:[%s4643_s9 + $0x40] sm:$0xff]  ;;  %v2405_v28 = vld [vmem:[%s4643_s9 + $0xb8] sm:$0xff] }
 0x76e   :  { %2881 = vrcp.f32 %v1972_v29  ;;  %v2872_v42 = vpop.eup %2871  ;;  %v2389_v29 = vld [vmem:[%s4643_s9 + $0x38] sm:$0xff] }
 0x76f   :  { %2883 = vrcp.f32 %v1973_v30  ;;  %v2605_v33 = vpop.f32.mrf.mxu0  ;;  %v2874_v45 = vpop.eup %2873  ;;  %v2404_v30 = vld [vmem:[%s4643_s9 + $0xb0] sm:$0xff] }
 0x770   :  { %v2606_v34 = vadd.f32 %v2605_v33, %v2604_v31  ;;  %v2876_v53 = vpop.eup %2875  ;;  %v1994_v56 = vadd.f32 1.0, %v2874_v45  ;;  %v2388_v31 = vld [vmem:[%s4643_s9 + $0x30] sm:$0xff]  ;;  %v2387_v33 = vld [vmem:[%s4643_s9 + $0x28] sm:$0xff]  ;;  %v2382_v45 = vld [vmem:[%s4643_s9] sm:$0xff] }
 0x771   :  { %v1995_v59 = vadd.f32 1.0, %v2876_v53  ;;  %v2366_v53 = vld [vmem:[%s4642_s8] sm:$0x3]  ;;  %s2981_s8 = smov [#allocation2]  }
 0x772   :  { %v2166_v35 = vadd.f32 %v2606_v34, %v2568_v32  ;;  %2885 = vrcp.f32 %v1994_v56  ;;  %v2403_v32 = vld [vmem:[%s4643_s9 + $0xa8] sm:$0xff]  ;;  %v2402_v34 = vld [vmem:[%s4643_s9 + $0xa0] sm:$0xff]  ;;  %v2375_v56 = vrot.slane %v2366_v53, %v4288_v40  ;;  %s2498_s5 = sshll.u32 %s2981_s8, 4  ;;  %s2499_s5 = int_to_ptr.vmem [resolvable:$true] %s2498_s5 }
 0x773   :  { %2887 = vrcp.f32 %v1995_v59  ;;  %s2957_s21 = scalar_lea.vmem %s2499_s5, 32  ;;  %p2962_p1 = scmp.lt.s32.totalorder %s2499_s5, %s2499_s5 }
 0x774   :  { %2569 = vmatmul.mubr.msk.f32.vlgmr.msra.gmra.mxu1 %vm2201_vm1, %v2166_v35  ;;  %v2386_v35 = vld [vmem:[%s4643_s9 + $0x20] sm:$0xff]  ;;  %p2958_p0 = scmp.ne.s32.totalorder %s2499_s5, %s2957_s21  ;;  %p2963_p2 = scmp.lt.s32.totalorder %s2957_s21, %s2957_s21 }
 0x775   :  { %2312 = vmatpush1.msra.mxu1 %v2183_v36  ;;  %2359 = vmatprep.mubr.f32.mxu1 %v4889_v1  ;;  %v2176_v1 = vld [vmem:[%s4641_s7 + $0x38] sm:$0xff] }
 0x776   :  { %2313 = vmatprep.subr.mxu1 %v2182_v39  ;;  %v2401_v36 = vld [vmem:[%s4643_s9 + $0x98] sm:$0xff]  ;;  %p2964_p3 = por %p2963_p2, %p2962_p1 }
 0x777   :  { %2314 = vmatpush1.msra.mxu1 %v2181_v41  ;;  %v2385_v39 = vld [vmem:[%s4643_s9 + $0x18] sm:$0xff]  ;;  %v2400_v41 = vld [vmem:[%s4643_s9 + $0x90] sm:$0xff] }
 0x778   :  { %2315 = vmatprep.subr.mxu1 %v2180_v10  ;;  %v2399_v10 = vld [vmem:[%s4643_s9 + $0x88] sm:$0xff]  ;;  %p2965_p4 = pnand %p2964_p3, %p2958_p0 }
 0x779   :  { %v2878_v46 = vpop.eup %2877  ;;  %2316 = vmatpush1.msra.mxu1 %v2179_v43  ;;  %v2398_v43 = vld [vmem:[%s4643_s9 + $0x80] sm:$0xff] }
 0x77a   :  { %v2880_v44 = vpop.eup %2879  ;;  %2317 = vmatprep.subr.mxu1 %v2178_v49  ;;  %v2002_v54 = vmul.f32 %v2878_v46, %v2870_v20  ;;  %v2384_v20 = vld [vmem:[%s4643_s9 + $0x10] sm:$0xff] }
 0x77b   :  { %v2882_v63 = vpop.eup %2881  ;;  %2318 = vmatpush1.msra.mxu1 %v2177_v51  ;;  %v2003_v62 = vmul.f32 %v2880_v44, %v2872_v42  ;;  %v2383_v42 = vld [vmem:[%s4643_s9 + $0x8] sm:$0xff] }
 0x77c   :  { %v2884_v47 = vpop.eup %2883  ;;  %2319 = vmatprep.subr.mxu1 %v2176_v1  ;;  %v2000_v52 = vmul.f32 %v2882_v63, %v4281_v37  ;;  %v2170_v37 = vld [vmem:[%s4641_s7 + $0x8] sm:$0xff]  ;;  %v2371_v1 = vrot.slane %v2366_v53, %v4356_v9 }
 0x77d   :  { %2320 = vmatpush1.msra.mxu1 %v2175_v61  ;;  %v2001_v55 = vmul.f32 %v2884_v47, %v4283_v38 }
 0x77e   :  { %2321 = vmatprep.subr.mxu1 %v2174_v57  ;;  %v2004_v3 = vadd.f32 %v2002_v54, %v2000_v52 }
 0x77f   :  { %2322 = vmatpush1.msra.mxu1 %v2173_v50  ;;  %v2005_v4 = vadd.f32 %v2003_v62, %v2001_v55  ;;  %v2886_v38 = vpop.eup %2885  ;;  %v2571_v62 = vld [vmem:[%s4644_s10] ss:$0 sm:$0xff] }
 0x780   :  { %2323 = vmatprep.subr.mxu1 %v2172_v48  ;;  %2889 = vtanh.f32 %v2004_v3  ;;  %v2888_v6 = vpop.eup %2887 }
 0x781   :  { %2324 = vmatpush1.msra.mxu1 %v2171_v2  ;;  %2891 = vtanh.f32 %v2005_v4 }
 0x782   :  { %2325 = vmatprep.subr.mxu1 %v2170_v37 }
 0x783   :  { %2326 = vmatpush1.msra.mxu1 %v2169_v5 }
 0x78d   :  { %v2890_v8 = vpop.eup %2889 }
 0x78e   :  { %v2892_v15 = vpop.eup %2891  ;;  %v2008_v18 = vmul.f32 %v2890_v8, %v2886_v38 }
 0x78f   :  { %v2009_v25 = vmul.f32 %v2892_v15, %v2888_v6 }
 0x791   :  { %v2278_v0 = vcombine.low %v2008_v18, %v2009_v25 }
 0x793   :  { %v2285_v17 = vrot.slane %v2278_v0, %v3445_v60 }
 0x795   :  { %v2292_v7 = vrot.slane %v2285_v17, %v3445_v60  ;;  %v2395_v60 = vld [vmem:[%s4643_s9 + $0x68] sm:$0xff] }
 0x796   :  { %2612 = vmatpush3.msra.mxu0 %v2395_v60 }
 0x797   :  { %2570 = vmatmul.mubr.msk.f32.vlgmr.msra.gmra.mxu1 %vm2201_vm1, %v2292_v7  ;;  %2613 = vmatprep.subr.mxu0 %v2410_v12 }
 0x798   :  { %2614 = vmatpush3.msra.mxu0 %v2394_v14 }
 0x799   :  { %2615 = vmatprep.subr.mxu0 %v2409_v21 }
 0x79a   :  { %2616 = vmatpush3.msra.mxu0 %v2393_v13 }
 0x79b   :  { %2617 = vmatprep.subr.mxu0 %v2408_v19 }
 0x79c   :  { %2618 = vmatpush3.msra.mxu0 %v2392_v24 }
 0x79d   :  { %2619 = vmatprep.subr.mxu0 %v2407_v23 }
 0x79e   :  { %2620 = vmatpush3.msra.mxu0 %v2391_v22 }
 0x79f   :  { %2621 = vmatprep.subr.mxu0 %v2406_v26 }
 0x7a0   :  { %2622 = vmatpush3.msra.mxu0 %v2390_v27 }
 0x7a1   :  { %2623 = vmatprep.subr.mxu0 %v2405_v28 }
 0x7a2   :  { %2624 = vmatpush3.msra.mxu0 %v2389_v29 }
 0x7a3   :  { %2625 = vmatprep.subr.mxu0 %v2404_v30 }
 0x7a4   :  { %2626 = vmatpush3.msra.mxu0 %v2388_v31 }
 0x7a5   :  { %2627 = vmatprep.subr.mxu0 %v2403_v32 }
 0x7a6   :  { %2628 = vmatpush3.msra.mxu0 %v2387_v33 }
 0x7a7   :  { %2629 = vmatprep.subr.mxu0 %v2402_v34 }
 0x7a8   :  { %2630 = vmatpush3.msra.mxu0 %v2386_v35 }
 0x7a9   :  { %2631 = vmatprep.subr.mxu0 %v2401_v36 }
 0x7aa   :  { %2632 = vmatpush3.msra.mxu0 %v2385_v39 }
 0x7ab   :  { %2633 = vmatprep.subr.mxu0 %v2400_v41 }
 0x7ac   :  { %2634 = vmatpush3.msra.mxu0 %v2384_v20 }
 0x7ad   :  { %2635 = vmatprep.subr.mxu0 %v2399_v10 }
 0x7ae   :  { %2636 = vmatpush3.msra.mxu0 %v2383_v42 }
 0x7af   :  { %2637 = vmatprep.subr.mxu0 %v2398_v43 }
 0x7b0   :  { %2638 = vmatpush3.msra.mxu0 %v2382_v45 }
 0x834   :  { %v2271_v49 = vpop.f32.mrf.mxu1 }
 0x836   :  { %v2273_v51 = vpop.f32.mrf.mxu1 }
 0x857   :  { %v2361_v46 = vpop.f32.mrf.mxu1 }
 0x858   :  { %v2362_v44 = vadd.f32 %v2361_v46, %v2271_v49 }
 0x859   :  { %v2363_v61 = vpop.f32.mrf.mxu1 }
 0x85a   :  { %v2364_v63 = vadd.f32 %v2363_v61, %v2273_v51  ;;  %v2378_v59 = vadd.f32 %v2371_v1, %v2362_v44 }
 0x85c   :  { %v2379_v57 = vadd.f32 %v2375_v56, %v2364_v63  ;;  %v2380_v54 = vmax.f32 %v2378_v59, 0.0 }
 0x85e   :  { %v2381_v47 = vmax.f32 %v2379_v57, 0.0 }
 0x860   :  { %2485 = vmatprep.mubr.f32.mxu0 %v2381_v47 }
 0x861   :  { %2486 = vmatmul.mubr.f32.vlgmr.msra.gmra.mxu0 %v2380_v54 }
 0x921   :  { %v2639_v50 = vpop.f32.mrf.mxu0 }
 0x923   :  { %v2640_v52 = vpop.f32.mrf.mxu0 }
 0x924   :  { %v2641_v9 = vadd.f32 %v2640_v52, %v2639_v50 }
 0x926   :  { %v2488_v48 = vadd.f32 %v2641_v9, %v2571_v62 }
 0x928   :  { %2491 = vst [vmem:[#allocation2] sm:$0x3] %v2488_v48 }
 0x929   :  { %2968 = shalt.err (!%p2965_p4)
}
 0x92a   :  { %2501 = dma.vmem_to_hbm [thread:$0]  %s2499_s5, 32, %s4645_s11, [#allocation3]  }
 0x92b   :  { %2977 = dma.done.wait [#allocation3], 32  }
 0x92c   :  { %2978 = vsyncadd [#allocation3], 4294967264 }
 0x92d   :  { %2505 = vsyncpa [#allocation3], 1 }

</bundles_post_ra>
